<compile_context>
chip_gen: v5e
topology: v5e:2x2
jax: 0.10.0
libtpu: 0.0.40
codegen_flags: <defaults>
</compile_context>

<pallas_src>
import jax
import jax.numpy as jnp
from jax.experimental import pallas as pl
from jax.experimental.pallas import tpu as pltpu


def _round_up(x, m):
    return (x + m - 1) // m * m


# ---------------- Kernel A: conv1 (3->6, k5) + ReLU + 2x2 maxpool ----------------

def _conv1_pool_kernel(x_ref, w_ref, b_ref, o_ref):
    # x_ref: (4, tm, Kp) bf16 (pool-group patches), w_ref: (Kp, 128) bf16,
    # b_ref: (1, 128) f32, o_ref: (tm, 8) bf16.
    pools, tm, kp = x_ref.shape
    x = x_ref[...].reshape(pools * tm, kp)            # free reshape (tm % 8 == 0)
    y = jnp.dot(x, w_ref[...], preferred_element_type=jnp.float32)
    y = jnp.maximum(y + b_ref[...], 0.0)
    y = y.reshape(pools, tm, w_ref.shape[1])          # free reshape
    y = jnp.max(y, axis=0)                            # 2x2 maxpool (VPU)
    o_ref[...] = y[:, :o_ref.shape[1]].astype(o_ref.dtype)


def conv1_relu_pool(x_nchw, w_oikk, b):
    """conv1 (valid 5x5, stride 1) + ReLU + 2x2/2 maxpool.

    x_nchw: (N, 3, 32, 32) f32.  Returns (N, 14, 14, 8) bf16 (channels 6,7 = 0).
    """
    N = x_nchw.shape[0]
    OC, C, k, _ = w_oikk.shape                      # (6, 3, 5, 5)
    H = x_nchw.shape[2]
    P = (H - k + 1) // 2                            # pooled spatial = 14
    K = k * k * C                                   # 75
    Kp = _round_up(K, 128)                          # 128
    OC_mm = 128                                     # matmul lane width
    OC_out = _round_up(OC, 8)                       # 8: compact output channels

    xb = x_nchw.transpose(0, 2, 3, 1).astype(jnp.bfloat16)      # NHWC
    # Build the 4 pool-group im2cols directly from strided slices (no full
    # (N, OH, OW, K) patch tensor).  Rows: (img, ph, pw); columns: (kh, kw, c).
    groups = jnp.stack([
        jnp.stack([xb[:, dh + kh: dh + kh + 2 * P - 1: 2,
                      dw + kw: dw + kw + 2 * P - 1: 2, :]
                   for kh in range(k) for kw in range(k)], axis=3)
        .reshape(N, P * P, K)
        for dh in (0, 1) for dw in (0, 1)], axis=0)             # (4, N, 196, 75)

    M = N * P * P
    groups = groups.reshape(4, M, K)
    # >= 2 parallel row tiles (v7x dual-TC), tile <= 256 rows, minimal padding.
    n_tiles = max(2, -(-M // 256))
    tm = _round_up(-(-M // n_tiles), 8)
    Mpad = _round_up(M, tm)
    groups = jnp.pad(groups, ((0, 0), (0, Mpad - M), (0, Kp - K)))

    w_mat = w_oikk.transpose(2, 3, 1, 0).reshape(K, OC)          # rows (kh, kw, c)
    w_mat = jnp.pad(w_mat, ((0, Kp - K), (0, OC_mm - OC))).astype(jnp.bfloat16)
    b_row = jnp.pad(b, (0, OC_mm - OC)).reshape(1, OC_mm).astype(jnp.float32)

    out = pl.pallas_call(
        _conv1_pool_kernel,
        out_shape=jax.ShapeDtypeStruct((Mpad, OC_out), jnp.bfloat16),
        grid_spec=pltpu.PrefetchScalarGridSpec(
            num_scalar_prefetch=0,
            grid=(Mpad // tm,),
            in_specs=[pl.BlockSpec((4, tm, Kp), lambda i: (0, i, 0)),
                      pl.BlockSpec((Kp, OC_mm), lambda i: (0, 0)),
                      pl.BlockSpec((1, OC_mm), lambda i: (0, 0))],
            out_specs=pl.BlockSpec((tm, OC_out), lambda i: (i, 0))),
        compiler_params=pltpu.CompilerParams(
            dimension_semantics=("parallel",)),
    )(groups, w_mat, b_row)
    return out[:M].reshape(N, P, P, OC_out)


# ------- Kernel B: conv2 (6->16, k5) + ReLU + 2x2 maxpool + fc0/fc1/fc2 ---------

def _conv2_mlp_kernel(g_ref, wc_ref, bc_ref, w0_ref, b0_ref, w1_ref, b1_ref,
                      w2_ref, b2_ref, o_ref, pooled_ref):
    # g_ref: (4, nimg*32, 256) bf16 conv2 pool-group patches (32 rows/image,
    #        rows 25..31 padding).  pooled_ref scratch: (nimg, 32, 128) bf16.
    nimg = o_ref.shape[0]
    pools, mt, kp = g_ref.shape
    ocp = wc_ref.shape[1]

    # conv2 + ReLU + 2x2 maxpool, kept entirely in VMEM.
    x = g_ref[...].reshape(pools * mt, kp)            # free reshape
    y = jnp.dot(x, wc_ref[...], preferred_element_type=jnp.float32)
    y = jnp.maximum(y + bc_ref[...], 0.0).reshape(pools, mt, ocp)
    pooled = jnp.max(y, axis=0)                       # (nimg*32, 128)
    pooled_ref[...] = pooled.astype(jnp.bfloat16).reshape(nimg, 32, ocp)

    # fc0 as 25 position-wise dots (weight rows pre-permuted at trace time),
    # accumulated in f32 -> no activation flatten/transpose needed.
    d0 = w0_ref.shape[2]
    h = jnp.zeros((nimg, d0), jnp.float32)
    for p in range(w0_ref.shape[0]):
        h = h + jnp.dot(pooled_ref[:, p, :], w0_ref[p],
                        preferred_element_type=jnp.float32)
    h = jnp.maximum(h + b0_ref[...], 0.0)
    # fc1 + ReLU
    h = jnp.dot(h.astype(jnp.bfloat16), w1_ref[...],
                preferred_element_type=jnp.float32)
    h = jnp.maximum(h + b1_ref[...], 0.0)
    # fc2
    h = jnp.dot(h.astype(jnp.bfloat16), w2_ref[...],
                preferred_element_type=jnp.float32)
    o_ref[...] = (h + b2_ref[...]).astype(o_ref.dtype)


def conv2_relu_pool_mlp(h_nhwc, conv2, fc0, fc1, fc2):
    """h_nhwc: (N, 14, 14, 8) bf16 conv1 output (channels 6,7 zero).
    Returns (N, 10) f32 logits."""
    (wc, bc), (w0, b0), (w1, b1), (w2, b2) = conv2, fc0, fc1, fc2
    N, Hh, _, C_in = h_nhwc.shape                   # (N, 14, 14, 8)
    OC, C_real, k, _ = wc.shape                     # (16, 6, 5, 5)
    P = (Hh - k + 1) // 2                           # pooled spatial = 5
    K = k * k * C_in                                # 200 (incl. 2 zero channels)
    Kp = _round_up(K, 128)                          # 256
    OCp = 128
    D0, D1, D2 = w0.shape[1], w1.shape[1], w2.shape[1]          # 200, 100, 10
    D0p, D1p, D2p = _round_up(D0, 128), _round_up(D1, 128), _round_up(D2, 128)

    # 4 pool-group im2cols of the conv1 output; rows (img, ph, pw), cols (kh,kw,c);
    # rows per image padded 25 -> 32 for clean (8,128) tiling.
    g = jnp.stack([
        jnp.stack([h_nhwc[:, dh + kh: dh + kh + 2 * P - 1: 2,
                          dw + kw: dw + kw + 2 * P - 1: 2, :]
                   for kh in range(k) for kw in range(k)], axis=3)
        .reshape(N, P * P, K)
        for dh in (0, 1) for dw in (0, 1)], axis=0)             # (4, N, 25, 200)

    if N <= 8:
        n_tile, Npad = N, N
    else:
        n_tile, Npad = 8, _round_up(N, 8)
    g = jnp.pad(g, ((0, 0), (0, Npad - N), (0, 32 - P * P), (0, Kp - K)))
    g = g.reshape(4, Npad * 32, Kp)

    # conv2 weight rows in (kh, kw, c) order with c padded 6 -> 8 (matches conv1 out).
    wc_mat = jnp.pad(wc.transpose(2, 3, 1, 0),
                     ((0, 0), (0, 0), (0, C_in - C_real), (0, 0))).reshape(K, OC)
    wc_mat = jnp.pad(wc_mat, ((0, Kp - K), (0, OCp - OC))).astype(jnp.bfloat16)
    bc_row = jnp.pad(bc, (0, OCp - OC)).reshape(1, OCp).astype(jnp.float32)

    # fc0 weight rows permuted from PyTorch (c, h, w) flatten order into 25
    # position-indexed (128, D0p) slabs (trace-time, free).
    w0k = w0.reshape(OC, P * P, D0).transpose(1, 0, 2)           # (25, 16, 200)
    w0k = jnp.pad(w0k, ((0, 0), (0, OCp - OC), (0, D0p - D0))).astype(jnp.bfloat16)
    b0r = jnp.pad(b0, (0, D0p - D0)).reshape(1, D0p).astype(jnp.float32)
    w1k = jnp.pad(w1, ((0, D0p - D0), (0, D1p - D1))).astype(jnp.bfloat16)
    b1r = jnp.pad(b1, (0, D1p - D1)).reshape(1, D1p).astype(jnp.float32)
    w2k = jnp.pad(w2, ((0, D1p - D1), (0, D2p - D2))).astype(jnp.bfloat16)
    b2r = jnp.pad(b2, (0, D2p - D2)).reshape(1, D2p).astype(jnp.float32)

    out = pl.pallas_call(
        _conv2_mlp_kernel,
        out_shape=jax.ShapeDtypeStruct((Npad, D2p), jnp.float32),
        grid_spec=pltpu.PrefetchScalarGridSpec(
            num_scalar_prefetch=0,
            grid=(Npad // n_tile,),
            in_specs=[pl.BlockSpec((4, n_tile * 32, Kp), lambda i: (0, i, 0)),
                      pl.BlockSpec((Kp, OCp), lambda i: (0, 0)),
                      pl.BlockSpec((1, OCp), lambda i: (0, 0)),
                      pl.BlockSpec((P * P, OCp, D0p), lambda i: (0, 0, 0)),
                      pl.BlockSpec((1, D0p), lambda i: (0, 0)),
                      pl.BlockSpec((D0p, D1p), lambda i: (0, 0)),
                      pl.BlockSpec((1, D1p), lambda i: (0, 0)),
                      pl.BlockSpec((D1p, D2p), lambda i: (0, 0)),
                      pl.BlockSpec((1, D2p), lambda i: (0, 0))],
            out_specs=pl.BlockSpec((n_tile, D2p), lambda i: (i, 0)),
            scratch_shapes=[pltpu.VMEM((n_tile, 32, OCp), jnp.bfloat16)]),
        compiler_params=pltpu.CompilerParams(
            dimension_semantics=("parallel",)),
    )(g, wc_mat, bc_row, w0k, b0r, w1k, b1r, w2k, b2r)
    return out[:N, :D2]


# ------------------------------- parameters --------------------------------

def init_params(key):
    # PyTorch-default-style init: U(-1/sqrt(fan_in), 1/sqrt(fan_in)).
    def lin(k, fan_in, fan_out):
        kw, kb = jax.random.split(k)
        bound = 1.0 / float(fan_in) ** 0.5
        w = jax.random.uniform(kw, (fan_in, fan_out), jnp.float32, -bound, bound)
        b = jax.random.uniform(kb, (fan_out,), jnp.float32, -bound, bound)
        return w, b

    def conv(k, oc, ic, ks):
        kw, kb = jax.random.split(k)
        fan_in = ic * ks * ks
        bound = 1.0 / float(fan_in) ** 0.5
        w = jax.random.uniform(kw, (oc, ic, ks, ks), jnp.float32, -bound, bound)
        b = jax.random.uniform(kb, (oc,), jnp.float32, -bound, bound)
        return w, b

    k1, k2, k3, k4, k5 = jax.random.split(key, 5)
    return {
        "conv1": conv(k1, 6, 3, 5),
        "conv2": conv(k2, 16, 6, 5),
        "fc0": lin(k3, 16 * 5 * 5, 200),   # stored (in, out); flatten order (c,h,w)
        "fc1": lin(k4, 200, 100),
        "fc2": lin(k5, 100, 10),
    }


# -------------------------------- forward ----------------------------------

def net_forward(params, x):
    # x: (N, 3, 32, 32) f32, NCHW (PyTorch convention); spatial must be 32x32
    # so the 16*5*5 flatten holds.
    w1, b1 = params["conv1"]
    h = conv1_relu_pool(x, w1, b1)                       # (N, 14, 14, 8) bf16
    return conv2_relu_pool_mlp(h, params["conv2"], params["fc0"],
                               params["fc1"], params["fc2"])      # (N, 10) f32


if __name__ == "__main__":
    key = jax.random.PRNGKey(0)
    kx, kp = jax.random.split(key)
    x = jax.random.normal(kx, (2, 3, 32, 32), dtype=jnp.float32)
    params = init_params(kp)
    out = jax.block_until_ready(jax.jit(net_forward)(params, x))
    assert out.shape == (2, 10) and out.dtype == jnp.float32
    assert bool(jnp.all(jnp.isfinite(out)))
    print("KERNEL_OK")
</pallas_src>

<mosaic_0001>
module attributes {stable_mosaic.version = 11 : i64} {
  func.func @_conv1_pool_kernel(%arg0: i32, %arg1: memref<4x200x128xbf16, #tpu.memory_space<vmem>>, %arg2: memref<128x128xbf16, #tpu.memory_space<vmem>>, %arg3: memref<1x128xf32, #tpu.memory_space<vmem>>, %arg4: memref<200x8xbf16, #tpu.memory_space<vmem>>) attributes {dimension_semantics = [#tpu.dimension_semantics<parallel>], iteration_bounds = array<i64: 2>, scalar_prefetch = 0 : i64, scratch_operands = 0 : i64, tpu.core_type = #tpu.core_type<tc>, window_params = [{transform_indices = @transform_0, window_bounds = array<i64: 4, 200, 128>}, {pipeline_mode = #tpu.pipeline_mode<synchronous>, transform_indices = @transform_1, window_bounds = array<i64: 128, 128>}, {pipeline_mode = #tpu.pipeline_mode<synchronous>, transform_indices = @transform_2, window_bounds = array<i64: 1, 128>}, {transform_indices = @transform_3, window_bounds = array<i64: 200, 8>}]} {
    %c0 = arith.constant 0 : index
    %c0_0 = arith.constant 0 : index
    %c0_1 = arith.constant 0 : index
    %0 = vector.load %arg1[%c0, %c0_0, %c0_1] : memref<4x200x128xbf16, #tpu.memory_space<vmem>>, vector<4x200x128xbf16>
    %1 = vector.shape_cast %0 : vector<4x200x128xbf16> to vector<800x128xbf16>
    %c0_2 = arith.constant 0 : index
    %c0_3 = arith.constant 0 : index
    %2 = vector.load %arg2[%c0_2, %c0_3] : memref<128x128xbf16, #tpu.memory_space<vmem>>, vector<128x128xbf16>
    %cst = arith.constant dense<0.000000e+00> : vector<800x128xf32>
    %3 = tpu.matmul %1, %2, %cst {dimension_numbers = #tpu.dot_dimension_numbers<[1], [0], [0], [1], [0, 0, 1, 1], [], []>} : vector<800x128xbf16>, vector<128x128xbf16>, vector<800x128xf32> -> vector<800x128xf32>
    %c0_4 = arith.constant 0 : index
    %c0_5 = arith.constant 0 : index
    %4 = vector.load %arg3[%c0_4, %c0_5] : memref<1x128xf32, #tpu.memory_space<vmem>>, vector<1x128xf32>
    %5 = vector.broadcast %4 : vector<1x128xf32> to vector<800x128xf32>
    %6 = arith.addf %3, %5 : vector<800x128xf32>
    %cst_6 = arith.constant 0.000000e+00 : f32
    %7 = vector.broadcast %cst_6 : f32 to vector<800x128xf32>
    %8 = arith.maximumf %6, %7 : vector<800x128xf32>
    %9 = vector.shape_cast %8 : vector<800x128xf32> to vector<4x200x128xf32>
    %cst_7 = arith.constant dense<0xFF800000> : vector<200x128xf32>
    %10 = vector.multi_reduction <maximumf>, %9, %cst_7 [0] : vector<4x200x128xf32> to vector<200x128xf32>
    %11 = vector.extract_strided_slice %10 {offsets = [0, 0], sizes = [200, 8], strides = [1, 1]} : vector<200x128xf32> to vector<200x8xf32>
    %12 = arith.truncf %11 : vector<200x8xf32> to vector<200x8xbf16>
    %c0_8 = arith.constant 0 : index
    %c0_9 = arith.constant 0 : index
    %13 = vector.load %arg4[%c0_8, %c0_9] : memref<200x8xbf16, #tpu.memory_space<vmem>>, vector<200x8xbf16>
    tpu.vector_store %arg4[%c0_8, %c0_9], %12 {strides = array<i32>} : memref<200x8xbf16, #tpu.memory_space<vmem>>, vector<200x8xbf16>,
    return
  }
  func.func @transform_0(%arg0: i32) -> (i32, i32, i32) {
    %c0_i32 = arith.constant 0 : i32
    %c0_i32_0 = arith.constant 0 : i32
    %c0_i32_1 = arith.constant 0 : i32
    return %c0_i32, %arg0, %c0_i32_0 : i32, i32, i32
  }
  func.func @transform_1(%arg0: i32) -> (i32, i32) {
    %c0_i32 = arith.constant 0 : i32
    %c0_i32_0 = arith.constant 0 : i32
    %c0_i32_1 = arith.constant 0 : i32
    return %c0_i32, %c0_i32_0 : i32, i32
  }
  func.func @transform_2(%arg0: i32) -> (i32, i32) {
    %c0_i32 = arith.constant 0 : i32
    %c0_i32_0 = arith.constant 0 : i32
    %c0_i32_1 = arith.constant 0 : i32
    return %c0_i32, %c0_i32_0 : i32, i32
  }
  func.func @transform_3(%arg0: i32) -> (i32, i32) {
    %c0_i32 = arith.constant 0 : i32
    %c0_i32_0 = arith.constant 0 : i32
    return %arg0, %c0_i32 : i32, i32
  }
}

module attributes {stable_mosaic.version = 11 : i64} {
  func.func @_conv2_mlp_kernel(%arg0: i32, %arg1: memref<4x64x256xbf16, #tpu.memory_space<vmem>>, %arg2: memref<256x128xbf16, #tpu.memory_space<vmem>>, %arg3: memref<1x128xf32, #tpu.memory_space<vmem>>, %arg4: memref<25x128x256xbf16, #tpu.memory_space<vmem>>, %arg5: memref<1x256xf32, #tpu.memory_space<vmem>>, %arg6: memref<256x128xbf16, #tpu.memory_space<vmem>>, %arg7: memref<1x128xf32, #tpu.memory_space<vmem>>, %arg8: memref<128x128xbf16, #tpu.memory_space<vmem>>, %arg9: memref<1x128xf32, #tpu.memory_space<vmem>>, %arg10: memref<2x128xf32, #tpu.memory_space<vmem>>, %arg11: memref<2x32x128xbf16, #tpu.memory_space<vmem>>) attributes {dimension_semantics = [#tpu.dimension_semantics<parallel>], iteration_bounds = array<i64: 1>, scalar_prefetch = 0 : i64, scratch_operands = 1 : i64, tpu.core_type = #tpu.core_type<tc>, window_params = [{transform_indices = @transform_0, window_bounds = array<i64: 4, 64, 256>}, {pipeline_mode = #tpu.pipeline_mode<synchronous>, transform_indices = @transform_1, window_bounds = array<i64: 256, 128>}, {pipeline_mode = #tpu.pipeline_mode<synchronous>, transform_indices = @transform_2, window_bounds = array<i64: 1, 128>}, {pipeline_mode = #tpu.pipeline_mode<synchronous>, transform_indices = @transform_3, window_bounds = array<i64: 25, 128, 256>}, {pipeline_mode = #tpu.pipeline_mode<synchronous>, transform_indices = @transform_4, window_bounds = array<i64: 1, 256>}, {pipeline_mode = #tpu.pipeline_mode<synchronous>, transform_indices = @transform_5, window_bounds = array<i64: 256, 128>}, {pipeline_mode = #tpu.pipeline_mode<synchronous>, transform_indices = @transform_6, window_bounds = array<i64: 1, 128>}, {pipeline_mode = #tpu.pipeline_mode<synchronous>, transform_indices = @transform_7, window_bounds = array<i64: 128, 128>}, {pipeline_mode = #tpu.pipeline_mode<synchronous>, transform_indices = @transform_8, window_bounds = array<i64: 1, 128>}, {transform_indices = @transform_9, window_bounds = array<i64: 2, 128>}]} {
    %c0 = arith.constant 0 : index
    %c0_0 = arith.constant 0 : index
    %c0_1 = arith.constant 0 : index
    %0 = vector.load %arg1[%c0, %c0_0, %c0_1] : memref<4x64x256xbf16, #tpu.memory_space<vmem>>, vector<4x64x256xbf16>
    %1 = vector.shape_cast %0 : vector<4x64x256xbf16> to vector<256x256xbf16>
    %c0_2 = arith.constant 0 : index
    %c0_3 = arith.constant 0 : index
    %2 = vector.load %arg2[%c0_2, %c0_3] : memref<256x128xbf16, #tpu.memory_space<vmem>>, vector<256x128xbf16>
    %cst = arith.constant dense<0.000000e+00> : vector<256x128xf32>
    %3 = tpu.matmul %1, %2, %cst {dimension_numbers = #tpu.dot_dimension_numbers<[1], [0], [0], [1], [0, 0, 1, 1], [], []>} : vector<256x256xbf16>, vector<256x128xbf16>, vector<256x128xf32> -> vector<256x128xf32>
    %c0_4 = arith.constant 0 : index
    %c0_5 = arith.constant 0 : index
    %4 = vector.load %arg3[%c0_4, %c0_5] : memref<1x128xf32, #tpu.memory_space<vmem>>, vector<1x128xf32>
    %5 = vector.broadcast %4 : vector<1x128xf32> to vector<256x128xf32>
    %6 = arith.addf %3, %5 : vector<256x128xf32>
    %cst_6 = arith.constant 0.000000e+00 : f32
    %7 = vector.broadcast %cst_6 : f32 to vector<256x128xf32>
    %8 = arith.maximumf %6, %7 : vector<256x128xf32>
    %9 = vector.shape_cast %8 : vector<256x128xf32> to vector<4x64x128xf32>
    %cst_7 = arith.constant dense<0xFF800000> : vector<64x128xf32>
    %10 = vector.multi_reduction <maximumf>, %9, %cst_7 [0] : vector<4x64x128xf32> to vector<64x128xf32>
    %11 = arith.truncf %10 : vector<64x128xf32> to vector<64x128xbf16>
    %12 = vector.shape_cast %11 : vector<64x128xbf16> to vector<2x32x128xbf16>
    %c0_8 = arith.constant 0 : index
    %c0_9 = arith.constant 0 : index
    %c0_10 = arith.constant 0 : index
    %13 = vector.load %arg11[%c0_8, %c0_9, %c0_10] : memref<2x32x128xbf16, #tpu.memory_space<vmem>>, vector<2x32x128xbf16>
    tpu.vector_store %arg11[%c0_8, %c0_9, %c0_10], %12 {strides = array<i32>} : memref<2x32x128xbf16, #tpu.memory_space<vmem>>, vector<2x32x128xbf16>,
    %cst_11 = arith.constant 0.000000e+00 : f32
    %14 = vector.broadcast %cst_11 : f32 to vector<2x256xf32>
    %c0_12 = arith.constant 0 : index
    %c0_13 = arith.constant 0 : index
    %c0_14 = arith.constant 0 : index
    %15 = vector.load %arg11[%c0_12, %c0_13, %c0_14] : memref<2x32x128xbf16, #tpu.memory_space<vmem>>, vector<2x1x128xbf16>
    %16 = vector.shape_cast %15 : vector<2x1x128xbf16> to vector<2x128xbf16>
    %c0_15 = arith.constant 0 : index
    %c0_16 = arith.constant 0 : index
    %c0_17 = arith.constant 0 : index
    %17 = vector.load %arg4[%c0_15, %c0_16, %c0_17] : memref<25x128x256xbf16, #tpu.memory_space<vmem>>, vector<1x128x256xbf16>
    %18 = vector.shape_cast %17 : vector<1x128x256xbf16> to vector<128x256xbf16>
    %cst_18 = arith.constant dense<0.000000e+00> : vector<2x256xf32>
    %19 = tpu.matmul %16, %18, %cst_18 {dimension_numbers = #tpu.dot_dimension_numbers<[1], [0], [0], [1], [0, 0, 1, 1], [], []>} : vector<2x128xbf16>, vector<128x256xbf16>, vector<2x256xf32> -> vector<2x256xf32>
    %20 = arith.addf %14, %19 : vector<2x256xf32>
    %c0_19 = arith.constant 0 : index
    %c1 = arith.constant 1 : index
    %c0_20 = arith.constant 0 : index
    %21 = vector.load %arg11[%c0_19, %c1, %c0_20] : memref<2x32x128xbf16, #tpu.memory_space<vmem>>, vector<2x1x128xbf16>
    %22 = vector.shape_cast %21 : vector<2x1x128xbf16> to vector<2x128xbf16>
    %c1_21 = arith.constant 1 : index
    %c0_22 = arith.constant 0 : index
    %c0_23 = arith.constant 0 : index
    %23 = vector.load %arg4[%c1_21, %c0_22, %c0_23] : memref<25x128x256xbf16, #tpu.memory_space<vmem>>, vector<1x128x256xbf16>
    %24 = vector.shape_cast %23 : vector<1x128x256xbf16> to vector<128x256xbf16>
    %cst_24 = arith.constant dense<0.000000e+00> : vector<2x256xf32>
    %25 = tpu.matmul %22, %24, %cst_24 {dimension_numbers = #tpu.dot_dimension_numbers<[1], [0], [0], [1], [0, 0, 1, 1], [], []>} : vector<2x128xbf16>, vector<128x256xbf16>, vector<2x256xf32> -> vector<2x256xf32>
    %26 = arith.addf %20, %25 : vector<2x256xf32>
    %c0_25 = arith.constant 0 : index
    %c2 = arith.constant 2 : index
    %c0_26 = arith.constant 0 : index
    %27 = vector.load %arg11[%c0_25, %c2, %c0_26] : memref<2x32x128xbf16, #tpu.memory_space<vmem>>, vector<2x1x128xbf16>
    %28 = vector.shape_cast %27 : vector<2x1x128xbf16> to vector<2x128xbf16>
    %c2_27 = arith.constant 2 : index
    %c0_28 = arith.constant 0 : index
    %c0_29 = arith.constant 0 : index
    %29 = vector.load %arg4[%c2_27, %c0_28, %c0_29] : memref<25x128x256xbf16, #tpu.memory_space<vmem>>, vector<1x128x256xbf16>
    %30 = vector.shape_cast %29 : vector<1x128x256xbf16> to vector<128x256xbf16>
    %cst_30 = arith.constant dense<0.000000e+00> : vector<2x256xf32>
    %31 = tpu.matmul %28, %30, %cst_30 {dimension_numbers = #tpu.dot_dimension_numbers<[1], [0], [0], [1], [0, 0, 1, 1], [], []>} : vector<2x128xbf16>, vector<128x256xbf16>, vector<2x256xf32> -> vector<2x256xf32>
    %32 = arith.addf %26, %31 : vector<2x256xf32>
    %c0_31 = arith.constant 0 : index
    %c3 = arith.constant 3 : index
    %c0_32 = arith.constant 0 : index
    %33 = vector.load %arg11[%c0_31, %c3, %c0_32] : memref<2x32x128xbf16, #tpu.memory_space<vmem>>, vector<2x1x128xbf16>
    %34 = vector.shape_cast %33 : vector<2x1x128xbf16> to vector<2x128xbf16>
    %c3_33 = arith.constant 3 : index
    %c0_34 = arith.constant 0 : index
    %c0_35 = arith.constant 0 : index
    %35 = vector.load %arg4[%c3_33, %c0_34, %c0_35] : memref<25x128x256xbf16, #tpu.memory_space<vmem>>, vector<1x128x256xbf16>
    %36 = vector.shape_cast %35 : vector<1x128x256xbf16> to vector<128x256xbf16>
    %cst_36 = arith.constant dense<0.000000e+00> : vector<2x256xf32>
    %37 = tpu.matmul %34, %36, %cst_36 {dimension_numbers = #tpu.dot_dimension_numbers<[1], [0], [0], [1], [0, 0, 1, 1], [], []>} : vector<2x128xbf16>, vector<128x256xbf16>, vector<2x256xf32> -> vector<2x256xf32>
    %38 = arith.addf %32, %37 : vector<2x256xf32>
    %c0_37 = arith.constant 0 : index
    %c4 = arith.constant 4 : index
    %c0_38 = arith.constant 0 : index
    %39 = vector.load %arg11[%c0_37, %c4, %c0_38] : memref<2x32x128xbf16, #tpu.memory_space<vmem>>, vector<2x1x128xbf16>
    %40 = vector.shape_cast %39 : vector<2x1x128xbf16> to vector<2x128xbf16>
    %c4_39 = arith.constant 4 : index
    %c0_40 = arith.constant 0 : index
    %c0_41 = arith.constant 0 : index
    %41 = vector.load %arg4[%c4_39, %c0_40, %c0_41] : memref<25x128x256xbf16, #tpu.memory_space<vmem>>, vector<1x128x256xbf16>
    %42 = vector.shape_cast %41 : vector<1x128x256xbf16> to vector<128x256xbf16>
    %cst_42 = arith.constant dense<0.000000e+00> : vector<2x256xf32>
    %43 = tpu.matmul %40, %42, %cst_42 {dimension_numbers = #tpu.dot_dimension_numbers<[1], [0], [0], [1], [0, 0, 1, 1], [], []>} : vector<2x128xbf16>, vector<128x256xbf16>, vector<2x256xf32> -> vector<2x256xf32>
    %44 = arith.addf %38, %43 : vector<2x256xf32>
    %c0_43 = arith.constant 0 : index
    %c5 = arith.constant 5 : index
    %c0_44 = arith.constant 0 : index
    %45 = vector.load %arg11[%c0_43, %c5, %c0_44] : memref<2x32x128xbf16, #tpu.memory_space<vmem>>, vector<2x1x128xbf16>
    %46 = vector.shape_cast %45 : vector<2x1x128xbf16> to vector<2x128xbf16>
    %c5_45 = arith.constant 5 : index
    %c0_46 = arith.constant 0 : index
    %c0_47 = arith.constant 0 : index
    %47 = vector.load %arg4[%c5_45, %c0_46, %c0_47] : memref<25x128x256xbf16, #tpu.memory_space<vmem>>, vector<1x128x256xbf16>
    %48 = vector.shape_cast %47 : vector<1x128x256xbf16> to vector<128x256xbf16>
    %cst_48 = arith.constant dense<0.000000e+00> : vector<2x256xf32>
    %49 = tpu.matmul %46, %48, %cst_48 {dimension_numbers = #tpu.dot_dimension_numbers<[1], [0], [0], [1], [0, 0, 1, 1], [], []>} : vector<2x128xbf16>, vector<128x256xbf16>, vector<2x256xf32> -> vector<2x256xf32>
    %50 = arith.addf %44, %49 : vector<2x256xf32>
    %c0_49 = arith.constant 0 : index
    %c6 = arith.constant 6 : index
    %c0_50 = arith.constant 0 : index
    %51 = vector.load %arg11[%c0_49, %c6, %c0_50] : memref<2x32x128xbf16, #tpu.memory_space<vmem>>, vector<2x1x128xbf16>
    %52 = vector.shape_cast %51 : vector<2x1x128xbf16> to vector<2x128xbf16>
    %c6_51 = arith.constant 6 : index
    %c0_52 = arith.constant 0 : index
    %c0_53 = arith.constant 0 : index
    %53 = vector.load %arg4[%c6_51, %c0_52, %c0_53] : memref<25x128x256xbf16, #tpu.memory_space<vmem>>, vector<1x128x256xbf16>
    %54 = vector.shape_cast %53 : vector<1x128x256xbf16> to vector<128x256xbf16>
    %cst_54 = arith.constant dense<0.000000e+00> : vector<2x256xf32>
    %55 = tpu.matmul %52, %54, %cst_54 {dimension_numbers = #tpu.dot_dimension_numbers<[1], [0], [0], [1], [0, 0, 1, 1], [], []>} : vector<2x128xbf16>, vector<128x256xbf16>, vector<2x256xf32> -> vector<2x256xf32>
    %56 = arith.addf %50, %55 : vector<2x256xf32>
    %c0_55 = arith.constant 0 : index
    %c7 = arith.constant 7 : index
    %c0_56 = arith.constant 0 : index
    %57 = vector.load %arg11[%c0_55, %c7, %c0_56] : memref<2x32x128xbf16, #tpu.memory_space<vmem>>, vector<2x1x128xbf16>
    %58 = vector.shape_cast %57 : vector<2x1x128xbf16> to vector<2x128xbf16>
    %c7_57 = arith.constant 7 : index
    %c0_58 = arith.constant 0 : index
    %c0_59 = arith.constant 0 : index
    %59 = vector.load %arg4[%c7_57, %c0_58, %c0_59] : memref<25x128x256xbf16, #tpu.memory_space<vmem>>, vector<1x128x256xbf16>
    %60 = vector.shape_cast %59 : vector<1x128x256xbf16> to vector<128x256xbf16>
    %cst_60 = arith.constant dense<0.000000e+00> : vector<2x256xf32>
    %61 = tpu.matmul %58, %60, %cst_60 {dimension_numbers = #tpu.dot_dimension_numbers<[1], [0], [0], [1], [0, 0, 1, 1], [], []>} : vector<2x128xbf16>, vector<128x256xbf16>, vector<2x256xf32> -> vector<2x256xf32>
    %62 = arith.addf %56, %61 : vector<2x256xf32>
    %c0_61 = arith.constant 0 : index
    %c8 = arith.constant 8 : index
    %c0_62 = arith.constant 0 : index
    %63 = vector.load %arg11[%c0_61, %c8, %c0_62] : memref<2x32x128xbf16, #tpu.memory_space<vmem>>, vector<2x1x128xbf16>
    %64 = vector.shape_cast %63 : vector<2x1x128xbf16> to vector<2x128xbf16>
    %c8_63 = arith.constant 8 : index
    %c0_64 = arith.constant 0 : index
    %c0_65 = arith.constant 0 : index
    %65 = vector.load %arg4[%c8_63, %c0_64, %c0_65] : memref<25x128x256xbf16, #tpu.memory_space<vmem>>, vector<1x128x256xbf16>
    %66 = vector.shape_cast %65 : vector<1x128x256xbf16> to vector<128x256xbf16>
    %cst_66 = arith.constant dense<0.000000e+00> : vector<2x256xf32>
    %67 = tpu.matmul %64, %66, %cst_66 {dimension_numbers = #tpu.dot_dimension_numbers<[1], [0], [0], [1], [0, 0, 1, 1], [], []>} : vector<2x128xbf16>, vector<128x256xbf16>, vector<2x256xf32> -> vector<2x256xf32>
    %68 = arith.addf %62, %67 : vector<2x256xf32>
    %c0_67 = arith.constant 0 : index
    %c9 = arith.constant 9 : index
    %c0_68 = arith.constant 0 : index
    %69 = vector.load %arg11[%c0_67, %c9, %c0_68] : memref<2x32x128xbf16, #tpu.memory_space<vmem>>, vector<2x1x128xbf16>
    %70 = vector.shape_cast %69 : vector<2x1x128xbf16> to vector<2x128xbf16>
    %c9_69 = arith.constant 9 : index
    %c0_70 = arith.constant 0 : index
    %c0_71 = arith.constant 0 : index
    %71 = vector.load %arg4[%c9_69, %c0_70, %c0_71] : memref<25x128x256xbf16, #tpu.memory_space<vmem>>, vector<1x128x256xbf16>
    %72 = vector.shape_cast %71 : vector<1x128x256xbf16> to vector<128x256xbf16>
    %cst_72 = arith.constant dense<0.000000e+00> : vector<2x256xf32>
    %73 = tpu.matmul %70, %72, %cst_72 {dimension_numbers = #tpu.dot_dimension_numbers<[1], [0], [0], [1], [0, 0, 1, 1], [], []>} : vector<2x128xbf16>, vector<128x256xbf16>, vector<2x256xf32> -> vector<2x256xf32>
    %74 = arith.addf %68, %73 : vector<2x256xf32>
    %c0_73 = arith.constant 0 : index
    %c10 = arith.constant 10 : index
    %c0_74 = arith.constant 0 : index
    %75 = vector.load %arg11[%c0_73, %c10, %c0_74] : memref<2x32x128xbf16, #tpu.memory_space<vmem>>, vector<2x1x128xbf16>
    %76 = vector.shape_cast %75 : vector<2x1x128xbf16> to vector<2x128xbf16>
    %c10_75 = arith.constant 10 : index
    %c0_76 = arith.constant 0 : index
    %c0_77 = arith.constant 0 : index
    %77 = vector.load %arg4[%c10_75, %c0_76, %c0_77] : memref<25x128x256xbf16, #tpu.memory_space<vmem>>, vector<1x128x256xbf16>
    %78 = vector.shape_cast %77 : vector<1x128x256xbf16> to vector<128x256xbf16>
    %cst_78 = arith.constant dense<0.000000e+00> : vector<2x256xf32>
    %79 = tpu.matmul %76, %78, %cst_78 {dimension_numbers = #tpu.dot_dimension_numbers<[1], [0], [0], [1], [0, 0, 1, 1], [], []>} : vector<2x128xbf16>, vector<128x256xbf16>, vector<2x256xf32> -> vector<2x256xf32>
    %80 = arith.addf %74, %79 : vector<2x256xf32>
    %c0_79 = arith.constant 0 : index
    %c11 = arith.constant 11 : index
    %c0_80 = arith.constant 0 : index
    %81 = vector.load %arg11[%c0_79, %c11, %c0_80] : memref<2x32x128xbf16, #tpu.memory_space<vmem>>, vector<2x1x128xbf16>
    %82 = vector.shape_cast %81 : vector<2x1x128xbf16> to vector<2x128xbf16>
    %c11_81 = arith.constant 11 : index
    %c0_82 = arith.constant 0 : index
    %c0_83 = arith.constant 0 : index
    %83 = vector.load %arg4[%c11_81, %c0_82, %c0_83] : memref<25x128x256xbf16, #tpu.memory_space<vmem>>, vector<1x128x256xbf16>
    %84 = vector.shape_cast %83 : vector<1x128x256xbf16> to vector<128x256xbf16>
    %cst_84 = arith.constant dense<0.000000e+00> : vector<2x256xf32>
    %85 = tpu.matmul %82, %84, %cst_84 {dimension_numbers = #tpu.dot_dimension_numbers<[1], [0], [0], [1], [0, 0, 1, 1], [], []>} : vector<2x128xbf16>, vector<128x256xbf16>, vector<2x256xf32> -> vector<2x256xf32>
    %86 = arith.addf %80, %85 : vector<2x256xf32>
    %c0_85 = arith.constant 0 : index
    %c12 = arith.constant 12 : index
    %c0_86 = arith.constant 0 : index
    %87 = vector.load %arg11[%c0_85, %c12, %c0_86] : memref<2x32x128xbf16, #tpu.memory_space<vmem>>, vector<2x1x128xbf16>
    %88 = vector.shape_cast %87 : vector<2x1x128xbf16> to vector<2x128xbf16>
    %c12_87 = arith.constant 12 : index
    %c0_88 = arith.constant 0 : index
    %c0_89 = arith.constant 0 : index
    %89 = vector.load %arg4[%c12_87, %c0_88, %c0_89] : memref<25x128x256xbf16, #tpu.memory_space<vmem>>, vector<1x128x256xbf16>
    %90 = vector.shape_cast %89 : vector<1x128x256xbf16> to vector<128x256xbf16>
    %cst_90 = arith.constant dense<0.000000e+00> : vector<2x256xf32>
    %91 = tpu.matmul %88, %90, %cst_90 {dimension_numbers = #tpu.dot_dimension_numbers<[1], [0], [0], [1], [0, 0, 1, 1], [], []>} : vector<2x128xbf16>, vector<128x256xbf16>, vector<2x256xf32> -> vector<2x256xf32>
    %92 = arith.addf %86, %91 : vector<2x256xf32>
    %c0_91 = arith.constant 0 : index
    %c13 = arith.constant 13 : index
    %c0_92 = arith.constant 0 : index
    %93 = vector.load %arg11[%c0_91, %c13, %c0_92] : memref<2x32x128xbf16, #tpu.memory_space<vmem>>, vector<2x1x128xbf16>
    %94 = vector.shape_cast %93 : vector<2x1x128xbf16> to vector<2x128xbf16>
    %c13_93 = arith.constant 13 : index
    %c0_94 = arith.constant 0 : index
    %c0_95 = arith.constant 0 : index
    %95 = vector.load %arg4[%c13_93, %c0_94, %c0_95] : memref<25x128x256xbf16, #tpu.memory_space<vmem>>, vector<1x128x256xbf16>
    %96 = vector.shape_cast %95 : vector<1x128x256xbf16> to vector<128x256xbf16>
    %cst_96 = arith.constant dense<0.000000e+00> : vector<2x256xf32>
    %97 = tpu.matmul %94, %96, %cst_96 {dimension_numbers = #tpu.dot_dimension_numbers<[1], [0], [0], [1], [0, 0, 1, 1], [], []>} : vector<2x128xbf16>, vector<128x256xbf16>, vector<2x256xf32> -> vector<2x256xf32>
    %98 = arith.addf %92, %97 : vector<2x256xf32>
    %c0_97 = arith.constant 0 : index
    %c14 = arith.constant 14 : index
    %c0_98 = arith.constant 0 : index
    %99 = vector.load %arg11[%c0_97, %c14, %c0_98] : memref<2x32x128xbf16, #tpu.memory_space<vmem>>, vector<2x1x128xbf16>
    %100 = vector.shape_cast %99 : vector<2x1x128xbf16> to vector<2x128xbf16>
    %c14_99 = arith.constant 14 : index
    %c0_100 = arith.constant 0 : index
    %c0_101 = arith.constant 0 : index
    %101 = vector.load %arg4[%c14_99, %c0_100, %c0_101] : memref<25x128x256xbf16, #tpu.memory_space<vmem>>, vector<1x128x256xbf16>
    %102 = vector.shape_cast %101 : vector<1x128x256xbf16> to vector<128x256xbf16>
    %cst_102 = arith.constant dense<0.000000e+00> : vector<2x256xf32>
    %103 = tpu.matmul %100, %102, %cst_102 {dimension_numbers = #tpu.dot_dimension_numbers<[1], [0], [0], [1], [0, 0, 1, 1], [], []>} : vector<2x128xbf16>, vector<128x256xbf16>, vector<2x256xf32> -> vector<2x256xf32>
    %104 = arith.addf %98, %103 : vector<2x256xf32>
    %c0_103 = arith.constant 0 : index
    %c15 = arith.constant 15 : index
    %c0_104 = arith.constant 0 : index
    %105 = vector.load %arg11[%c0_103, %c15, %c0_104] : memref<2x32x128xbf16, #tpu.memory_space<vmem>>, vector<2x1x128xbf16>
    %106 = vector.shape_cast %105 : vector<2x1x128xbf16> to vector<2x128xbf16>
    %c15_105 = arith.constant 15 : index
    %c0_106 = arith.constant 0 : index
    %c0_107 = arith.constant 0 : index
    %107 = vector.load %arg4[%c15_105, %c0_106, %c0_107] : memref<25x128x256xbf16, #tpu.memory_space<vmem>>, vector<1x128x256xbf16>
    %108 = vector.shape_cast %107 : vector<1x128x256xbf16> to vector<128x256xbf16>
    %cst_108 = arith.constant dense<0.000000e+00> : vector<2x256xf32>
    %109 = tpu.matmul %106, %108, %cst_108 {dimension_numbers = #tpu.dot_dimension_numbers<[1], [0], [0], [1], [0, 0, 1, 1], [], []>} : vector<2x128xbf16>, vector<128x256xbf16>, vector<2x256xf32> -> vector<2x256xf32>
    %110 = arith.addf %104, %109 : vector<2x256xf32>
    %c0_109 = arith.constant 0 : index
    %c16 = arith.constant 16 : index
    %c0_110 = arith.constant 0 : index
    %111 = vector.load %arg11[%c0_109, %c16, %c0_110] : memref<2x32x128xbf16, #tpu.memory_space<vmem>>, vector<2x1x128xbf16>
    %112 = vector.shape_cast %111 : vector<2x1x128xbf16> to vector<2x128xbf16>
    %c16_111 = arith.constant 16 : index
    %c0_112 = arith.constant 0 : index
    %c0_113 = arith.constant 0 : index
    %113 = vector.load %arg4[%c16_111, %c0_112, %c0_113] : memref<25x128x256xbf16, #tpu.memory_space<vmem>>, vector<1x128x256xbf16>
    %114 = vector.shape_cast %113 : vector<1x128x256xbf16> to vector<128x256xbf16>
    %cst_114 = arith.constant dense<0.000000e+00> : vector<2x256xf32>
    %115 = tpu.matmul %112, %114, %cst_114 {dimension_numbers = #tpu.dot_dimension_numbers<[1], [0], [0], [1], [0, 0, 1, 1], [], []>} : vector<2x128xbf16>, vector<128x256xbf16>, vector<2x256xf32> -> vector<2x256xf32>
    %116 = arith.addf %110, %115 : vector<2x256xf32>
    %c0_115 = arith.constant 0 : index
    %c17 = arith.constant 17 : index
    %c0_116 = arith.constant 0 : index
    %117 = vector.load %arg11[%c0_115, %c17, %c0_116] : memref<2x32x128xbf16, #tpu.memory_space<vmem>>, vector<2x1x128xbf16>
    %118 = vector.shape_cast %117 : vector<2x1x128xbf16> to vector<2x128xbf16>
    %c17_117 = arith.constant 17 : index
    %c0_118 = arith.constant 0 : index
    %c0_119 = arith.constant 0 : index
    %119 = vector.load %arg4[%c17_117, %c0_118, %c0_119] : memref<25x128x256xbf16, #tpu.memory_space<vmem>>, vector<1x128x256xbf16>
    %120 = vector.shape_cast %119 : vector<1x128x256xbf16> to vector<128x256xbf16>
    %cst_120 = arith.constant dense<0.000000e+00> : vector<2x256xf32>
    %121 = tpu.matmul %118, %120, %cst_120 {dimension_numbers = #tpu.dot_dimension_numbers<[1], [0], [0], [1], [0, 0, 1, 1], [], []>} : vector<2x128xbf16>, vector<128x256xbf16>, vector<2x256xf32> -> vector<2x256xf32>
    %122 = arith.addf %116, %121 : vector<2x256xf32>
    %c0_121 = arith.constant 0 : index
    %c18 = arith.constant 18 : index
    %c0_122 = arith.constant 0 : index
    %123 = vector.load %arg11[%c0_121, %c18, %c0_122] : memref<2x32x128xbf16, #tpu.memory_space<vmem>>, vector<2x1x128xbf16>
    %124 = vector.shape_cast %123 : vector<2x1x128xbf16> to vector<2x128xbf16>
    %c18_123 = arith.constant 18 : index
    %c0_124 = arith.constant 0 : index
    %c0_125 = arith.constant 0 : index
    %125 = vector.load %arg4[%c18_123, %c0_124, %c0_125] : memref<25x128x256xbf16, #tpu.memory_space<vmem>>, vector<1x128x256xbf16>
    %126 = vector.shape_cast %125 : vector<1x128x256xbf16> to vector<128x256xbf16>
    %cst_126 = arith.constant dense<0.000000e+00> : vector<2x256xf32>
    %127 = tpu.matmul %124, %126, %cst_126 {dimension_numbers = #tpu.dot_dimension_numbers<[1], [0], [0], [1], [0, 0, 1, 1], [], []>} : vector<2x128xbf16>, vector<128x256xbf16>, vector<2x256xf32> -> vector<2x256xf32>
    %128 = arith.addf %122, %127 : vector<2x256xf32>
    %c0_127 = arith.constant 0 : index
    %c19 = arith.constant 19 : index
    %c0_128 = arith.constant 0 : index
    %129 = vector.load %arg11[%c0_127, %c19, %c0_128] : memref<2x32x128xbf16, #tpu.memory_space<vmem>>, vector<2x1x128xbf16>
    %130 = vector.shape_cast %129 : vector<2x1x128xbf16> to vector<2x128xbf16>
    %c19_129 = arith.constant 19 : index
    %c0_130 = arith.constant 0 : index
    %c0_131 = arith.constant 0 : index
    %131 = vector.load %arg4[%c19_129, %c0_130, %c0_131] : memref<25x128x256xbf16, #tpu.memory_space<vmem>>, vector<1x128x256xbf16>
    %132 = vector.shape_cast %131 : vector<1x128x256xbf16> to vector<128x256xbf16>
    %cst_132 = arith.constant dense<0.000000e+00> : vector<2x256xf32>
    %133 = tpu.matmul %130, %132, %cst_132 {dimension_numbers = #tpu.dot_dimension_numbers<[1], [0], [0], [1], [0, 0, 1, 1], [], []>} : vector<2x128xbf16>, vector<128x256xbf16>, vector<2x256xf32> -> vector<2x256xf32>
    %134 = arith.addf %128, %133 : vector<2x256xf32>
    %c0_133 = arith.constant 0 : index
    %c20 = arith.constant 20 : index
    %c0_134 = arith.constant 0 : index
    %135 = vector.load %arg11[%c0_133, %c20, %c0_134] : memref<2x32x128xbf16, #tpu.memory_space<vmem>>, vector<2x1x128xbf16>
    %136 = vector.shape_cast %135 : vector<2x1x128xbf16> to vector<2x128xbf16>
    %c20_135 = arith.constant 20 : index
    %c0_136 = arith.constant 0 : index
    %c0_137 = arith.constant 0 : index
    %137 = vector.load %arg4[%c20_135, %c0_136, %c0_137] : memref<25x128x256xbf16, #tpu.memory_space<vmem>>, vector<1x128x256xbf16>
    %138 = vector.shape_cast %137 : vector<1x128x256xbf16> to vector<128x256xbf16>
    %cst_138 = arith.constant dense<0.000000e+00> : vector<2x256xf32>
    %139 = tpu.matmul %136, %138, %cst_138 {dimension_numbers = #tpu.dot_dimension_numbers<[1], [0], [0], [1], [0, 0, 1, 1], [], []>} : vector<2x128xbf16>, vector<128x256xbf16>, vector<2x256xf32> -> vector<2x256xf32>
    %140 = arith.addf %134, %139 : vector<2x256xf32>
    %c0_139 = arith.constant 0 : index
    %c21 = arith.constant 21 : index
    %c0_140 = arith.constant 0 : index
    %141 = vector.load %arg11[%c0_139, %c21, %c0_140] : memref<2x32x128xbf16, #tpu.memory_space<vmem>>, vector<2x1x128xbf16>
    %142 = vector.shape_cast %141 : vector<2x1x128xbf16> to vector<2x128xbf16>
    %c21_141 = arith.constant 21 : index
    %c0_142 = arith.constant 0 : index
    %c0_143 = arith.constant 0 : index
    %143 = vector.load %arg4[%c21_141, %c0_142, %c0_143] : memref<25x128x256xbf16, #tpu.memory_space<vmem>>, vector<1x128x256xbf16>
    %144 = vector.shape_cast %143 : vector<1x128x256xbf16> to vector<128x256xbf16>
    %cst_144 = arith.constant dense<0.000000e+00> : vector<2x256xf32>
    %145 = tpu.matmul %142, %144, %cst_144 {dimension_numbers = #tpu.dot_dimension_numbers<[1], [0], [0], [1], [0, 0, 1, 1], [], []>} : vector<2x128xbf16>, vector<128x256xbf16>, vector<2x256xf32> -> vector<2x256xf32>
    %146 = arith.addf %140, %145 : vector<2x256xf32>
    %c0_145 = arith.constant 0 : index
    %c22 = arith.constant 22 : index
    %c0_146 = arith.constant 0 : index
    %147 = vector.load %arg11[%c0_145, %c22, %c0_146] : memref<2x32x128xbf16, #tpu.memory_space<vmem>>, vector<2x1x128xbf16>
    %148 = vector.shape_cast %147 : vector<2x1x128xbf16> to vector<2x128xbf16>
    %c22_147 = arith.constant 22 : index
    %c0_148 = arith.constant 0 : index
    %c0_149 = arith.constant 0 : index
    %149 = vector.load %arg4[%c22_147, %c0_148, %c0_149] : memref<25x128x256xbf16, #tpu.memory_space<vmem>>, vector<1x128x256xbf16>
    %150 = vector.shape_cast %149 : vector<1x128x256xbf16> to vector<128x256xbf16>
    %cst_150 = arith.constant dense<0.000000e+00> : vector<2x256xf32>
    %151 = tpu.matmul %148, %150, %cst_150 {dimension_numbers = #tpu.dot_dimension_numbers<[1], [0], [0], [1], [0, 0, 1, 1], [], []>} : vector<2x128xbf16>, vector<128x256xbf16>, vector<2x256xf32> -> vector<2x256xf32>
    %152 = arith.addf %146, %151 : vector<2x256xf32>
    %c0_151 = arith.constant 0 : index
    %c23 = arith.constant 23 : index
    %c0_152 = arith.constant 0 : index
    %153 = vector.load %arg11[%c0_151, %c23, %c0_152] : memref<2x32x128xbf16, #tpu.memory_space<vmem>>, vector<2x1x128xbf16>
    %154 = vector.shape_cast %153 : vector<2x1x128xbf16> to vector<2x128xbf16>
    %c23_153 = arith.constant 23 : index
    %c0_154 = arith.constant 0 : index
    %c0_155 = arith.constant 0 : index
    %155 = vector.load %arg4[%c23_153, %c0_154, %c0_155] : memref<25x128x256xbf16, #tpu.memory_space<vmem>>, vector<1x128x256xbf16>
    %156 = vector.shape_cast %155 : vector<1x128x256xbf16> to vector<128x256xbf16>
    %cst_156 = arith.constant dense<0.000000e+00> : vector<2x256xf32>
    %157 = tpu.matmul %154, %156, %cst_156 {dimension_numbers = #tpu.dot_dimension_numbers<[1], [0], [0], [1], [0, 0, 1, 1], [], []>} : vector<2x128xbf16>, vector<128x256xbf16>, vector<2x256xf32> -> vector<2x256xf32>
    %158 = arith.addf %152, %157 : vector<2x256xf32>
    %c0_157 = arith.constant 0 : index
    %c24 = arith.constant 24 : index
    %c0_158 = arith.constant 0 : index
    %159 = vector.load %arg11[%c0_157, %c24, %c0_158] : memref<2x32x128xbf16, #tpu.memory_space<vmem>>, vector<2x1x128xbf16>
    %160 = vector.shape_cast %159 : vector<2x1x128xbf16> to vector<2x128xbf16>
    %c24_159 = arith.constant 24 : index
    %c0_160 = arith.constant 0 : index
    %c0_161 = arith.constant 0 : index
    %161 = vector.load %arg4[%c24_159, %c0_160, %c0_161] : memref<25x128x256xbf16, #tpu.memory_space<vmem>>, vector<1x128x256xbf16>
    %162 = vector.shape_cast %161 : vector<1x128x256xbf16> to vector<128x256xbf16>
    %cst_162 = arith.constant dense<0.000000e+00> : vector<2x256xf32>
    %163 = tpu.matmul %160, %162, %cst_162 {dimension_numbers = #tpu.dot_dimension_numbers<[1], [0], [0], [1], [0, 0, 1, 1], [], []>} : vector<2x128xbf16>, vector<128x256xbf16>, vector<2x256xf32> -> vector<2x256xf32>
    %164 = arith.addf %158, %163 : vector<2x256xf32>
    %c0_163 = arith.constant 0 : index
    %c0_164 = arith.constant 0 : index
    %165 = vector.load %arg5[%c0_163, %c0_164] : memref<1x256xf32, #tpu.memory_space<vmem>>, vector<1x256xf32>
    %166 = vector.broadcast %165 : vector<1x256xf32> to vector<2x256xf32>
    %167 = arith.addf %164, %166 : vector<2x256xf32>
    %cst_165 = arith.constant 0.000000e+00 : f32
    %168 = vector.broadcast %cst_165 : f32 to vector<2x256xf32>
    %169 = arith.maximumf %167, %168 : vector<2x256xf32>
    %170 = arith.truncf %169 : vector<2x256xf32> to vector<2x256xbf16>
    %c0_166 = arith.constant 0 : index
    %c0_167 = arith.constant 0 : index
    %171 = vector.load %arg6[%c0_166, %c0_167] : memref<256x128xbf16, #tpu.memory_space<vmem>>, vector<256x128xbf16>
    %cst_168 = arith.constant dense<0.000000e+00> : vector<2x128xf32>
    %172 = tpu.matmul %170, %171, %cst_168 {dimension_numbers = #tpu.dot_dimension_numbers<[1], [0], [0], [1], [0, 0, 1, 1], [], []>} : vector<2x256xbf16>, vector<256x128xbf16>, vector<2x128xf32> -> vector<2x128xf32>
    %c0_169 = arith.constant 0 : index
    %c0_170 = arith.constant 0 : index
    %173 = vector.load %arg7[%c0_169, %c0_170] : memref<1x128xf32, #tpu.memory_space<vmem>>, vector<1x128xf32>
    %174 = vector.broadcast %173 : vector<1x128xf32> to vector<2x128xf32>
    %175 = arith.addf %172, %174 : vector<2x128xf32>
    %cst_171 = arith.constant 0.000000e+00 : f32
    %176 = vector.broadcast %cst_171 : f32 to vector<2x128xf32>
    %177 = arith.maximumf %175, %176 : vector<2x128xf32>
    %178 = arith.truncf %177 : vector<2x128xf32> to vector<2x128xbf16>
    %c0_172 = arith.constant 0 : index
    %c0_173 = arith.constant 0 : index
    %179 = vector.load %arg8[%c0_172, %c0_173] : memref<128x128xbf16, #tpu.memory_space<vmem>>, vector<128x128xbf16>
    %cst_174 = arith.constant dense<0.000000e+00> : vector<2x128xf32>
    %180 = tpu.matmul %178, %179, %cst_174 {dimension_numbers = #tpu.dot_dimension_numbers<[1], [0], [0], [1], [0, 0, 1, 1], [], []>} : vector<2x128xbf16>, vector<128x128xbf16>, vector<2x128xf32> -> vector<2x128xf32>
    %c0_175 = arith.constant 0 : index
    %c0_176 = arith.constant 0 : index
    %181 = vector.load %arg9[%c0_175, %c0_176] : memref<1x128xf32, #tpu.memory_space<vmem>>, vector<1x128xf32>
    %182 = vector.broadcast %181 : vector<1x128xf32> to vector<2x128xf32>
    %183 = arith.addf %180, %182 : vector<2x128xf32>
    %c0_177 = arith.constant 0 : index
    %c0_178 = arith.constant 0 : index
    %184 = vector.load %arg10[%c0_177, %c0_178] : memref<2x128xf32, #tpu.memory_space<vmem>>, vector<2x128xf32>
    tpu.vector_store %arg10[%c0_177, %c0_178], %183 {strides = array<i32>} : memref<2x128xf32, #tpu.memory_space<vmem>>, vector<2x128xf32>,
    return
  }
  func.func @transform_0(%arg0: i32) -> (i32, i32, i32) {
    %c0_i32 = arith.constant 0 : i32
    %c0_i32_0 = arith.constant 0 : i32
    %c0_i32_1 = arith.constant 0 : i32
    return %c0_i32, %arg0, %c0_i32_0 : i32, i32, i32
  }
  func.func @transform_1(%arg0: i32) -> (i32, i32) {
    %c0_i32 = arith.constant 0 : i32
    %c0_i32_0 = arith.constant 0 : i32
    %c0_i32_1 = arith.constant 0 : i32
    return %c0_i32, %c0_i32_0 : i32, i32
  }
  func.func @transform_2(%arg0: i32) -> (i32, i32) {
    %c0_i32 = arith.constant 0 : i32
    %c0_i32_0 = arith.constant 0 : i32
    %c0_i32_1 = arith.constant 0 : i32
    return %c0_i32, %c0_i32_0 : i32, i32
  }
  func.func @transform_3(%arg0: i32) -> (i32, i32, i32) {
    %c0_i32 = arith.constant 0 : i32
    %c0_i32_0 = arith.constant 0 : i32
    %c0_i32_1 = arith.constant 0 : i32
    %c0_i32_2 = arith.constant 0 : i32
    return %c0_i32, %c0_i32_0, %c0_i32_1 : i32, i32, i32
  }
  func.func @transform_4(%arg0: i32) -> (i32, i32) {
    %c0_i32 = arith.constant 0 : i32
    %c0_i32_0 = arith.constant 0 : i32
    %c0_i32_1 = arith.constant 0 : i32
    return %c0_i32, %c0_i32_0 : i32, i32
  }
  func.func @transform_5(%arg0: i32) -> (i32, i32) {
    %c0_i32 = arith.constant 0 : i32
    %c0_i32_0 = arith.constant 0 : i32
    %c0_i32_1 = arith.constant 0 : i32
    return %c0_i32, %c0_i32_0 : i32, i32
  }
  func.func @transform_6(%arg0: i32) -> (i32, i32) {
    %c0_i32 = arith.constant 0 : i32
    %c0_i32_0 = arith.constant 0 : i32
    %c0_i32_1 = arith.constant 0 : i32
    return %c0_i32, %c0_i32_0 : i32, i32
  }
  func.func @transform_7(%arg0: i32) -> (i32, i32) {
    %c0_i32 = arith.constant 0 : i32
    %c0_i32_0 = arith.constant 0 : i32
    %c0_i32_1 = arith.constant 0 : i32
    return %c0_i32, %c0_i32_0 : i32, i32
  }
  func.func @transform_8(%arg0: i32) -> (i32, i32) {
    %c0_i32 = arith.constant 0 : i32
    %c0_i32_0 = arith.constant 0 : i32
    %c0_i32_1 = arith.constant 0 : i32
    return %c0_i32, %c0_i32_0 : i32, i32
  }
  func.func @transform_9(%arg0: i32) -> (i32, i32) {
    %c0_i32 = arith.constant 0 : i32
    %c0_i32_0 = arith.constant 0 : i32
    return %arg0, %c0_i32 : i32, i32
  }
}

</mosaic_0001>

<bundles_post_ra>
// kernel: net_forward.2
= control target key start
LH: loop header
LB: loop body
LE: loop exit
PB: predicated region body
PF: predicated region fallthrough
CT: control target
= control target key end

     0   :  { %s2023_s12 = smov 0   ;;  %s2025_s13 = smov 0   ;;  %s2422_s0 = inlined_call_operand.vmem [shape: bf16[4,400,128], index: 0, kind: input, shape index: {}]   ;;  %s2423_s1 = inlined_call_operand.vmem [shape: bf16[128,128], index: 1, kind: input, shape index: {}]   ;;  %s2424_s2 = inlined_call_operand.vmem [shape: f32[1,128], index: 2, kind: input, shape index: {}]   ;;  %s2425_s3 = inlined_call_operand.vmem [shape: bf16[400,8], index: 3, kind: output, shape index: {}]  }
   0x1   :  { %s2027_s14 = smov 0  }
   0x2 LB: > { %s1628_s15 = sadd.s32 4294967295, %s2001_s14   ;;  %s2040_s16 = sadd.s32 1, %s2001_s14   ;;  %s2001_s14 = sphi %s2027_s14, %s2428_s14   ;;  %s1997_s13 = sphi %s2025_s13, %s2427_s13   ;;  %s1993_s12 = sphi %s2023_s12, %s2426_s12  }
   0x3   : > { %s17_s17 = ssub.s32 %s2001_s14, %s2040_s16  ;;  %s20_s18 = sadd.s32 1, %s1997_s13 }
   0x4   : > { %p18_p0 = scmp.eq.s32.totalorder %s17_s17, 0  ;;  %p27_p1 = scmp.ne.s32.totalorder %s1997_s13, %s1993_s12 }
   0x5   : > { %p28_p2 = scmp.eq.s32.totalorder %s2001_s14, 0  ;;  %p1631_p4 = scmp.ge.s32.totalorder %s2001_s14, 2 }
   0x6   : > { %s2049_s19 = scalar_select %p18_p0, %s1997_s13, %s20_s18  }
   0x7   : > { %p29_p3 = por %p28_p2, %p27_p1  ;;  %127 = sbr.rel (%p1631_p4) target bundleno = 69 (0x45), region = 24 }
   0xc   : > { %130 = sbr.rel (!%p29_p3) target bundleno = 69 (0x45), region = 28  ;;  %s132_s20 = sand.u32 (%p29_p3), 1, %s1997_s13  }
   0xd   : > { %s1869_s21 = smul.u32 (%p29_p3), 100, %s2001_s14 }
   0xe   : > { %s1952_s22 = smul.u32 (%p29_p3), 400, %s132_s20 }
   0xf   : > { %s2057_s25 = scalar_lea.vmem (%p29_p3), %s2422_s0, %s1869_s21 }
  0x10   : > { %v154_v0 = vld [vmem:[%s2057_s25] sm:$0xff] (%p29_p3)   ;;  %v158_v1 = vld [vmem:[%s2057_s25 + $0x8] sm:$0xff] (%p29_p3)   ;;  %v162_v2 = vld [vmem:[%s2057_s25 + $0x10] sm:$0xff] (%p29_p3)   ;;  %s2062_s26 = scalar_lea.vmem (%p29_p3), [#allocation2], %s1952_s22 }
  0x11   : > { %155 = vst [vmem:[%s2062_s26] sm:$0xff] %v154_v0   ;;  %v166_v3 = vld [vmem:[%s2057_s25 + $0x18] sm:$0xff]   ;;  %v170_v4 = vld [vmem:[%s2057_s25 + $0x20] sm:$0xff]   ;;  %v174_v5 = vld [vmem:[%s2057_s25 + $0x28] sm:$0xff]  }
  0x12   : > { %159 = vst [vmem:[%s2062_s26 + $0x8] sm:$0xff] %v158_v1   ;;  %v178_v6 = vld [vmem:[%s2057_s25 + $0x30] sm:$0xff]   ;;  %v182_v7 = vld [vmem:[%s2057_s25 + $0x38] sm:$0xff]   ;;  %v186_v8 = vld [vmem:[%s2057_s25 + $0x40] sm:$0xff]  }
  0x13   : > { %163 = vst [vmem:[%s2062_s26 + $0x10] sm:$0xff] %v162_v2   ;;  %v190_v9 = vld [vmem:[%s2057_s25 + $0x48] sm:$0xff]   ;;  %v194_v10 = vld [vmem:[%s2057_s25 + $0x50] sm:$0xff]   ;;  %v198_v11 = vld [vmem:[%s2057_s25 + $0x58] sm:$0xff]  }
  0x14   : > { %167 = vst [vmem:[%s2062_s26 + $0x18] sm:$0xff] %v166_v3   ;;  %v202_v12 = vld [vmem:[%s2057_s25 + $0x60] sm:$0xf]  ;;  %v204_v13 = vld [vmem:[%s2057_s25 + $0xc8] sm:$0xff]   ;;  %v208_v14 = vld [vmem:[%s2057_s25 + $0xd0] sm:$0xff]  }
  0x15   : > { %171 = vst [vmem:[%s2062_s26 + $0x20] sm:$0xff] %v170_v4   ;;  %v212_v15 = vld [vmem:[%s2057_s25 + $0xd8] sm:$0xff]   ;;  %v216_v16 = vld [vmem:[%s2057_s25 + $0xe0] sm:$0xff]   ;;  %v220_v17 = vld [vmem:[%s2057_s25 + $0xe8] sm:$0xff]  }
  0x16   : > { %175 = vst [vmem:[%s2062_s26 + $0x28] sm:$0xff] %v174_v5   ;;  %v224_v18 = vld [vmem:[%s2057_s25 + $0xf0] sm:$0xff]   ;;  %v228_v19 = vld [vmem:[%s2057_s25 + $0xf8] sm:$0xff]   ;;  %v232_v20 = vld [vmem:[%s2057_s25 + $0x100] sm:$0xff]  }
  0x17   : > { %179 = vst [vmem:[%s2062_s26 + $0x30] sm:$0xff] %v178_v6   ;;  %v236_v21 = vld [vmem:[%s2057_s25 + $0x108] sm:$0xff]   ;;  %v240_v22 = vld [vmem:[%s2057_s25 + $0x110] sm:$0xff]   ;;  %v244_v23 = vld [vmem:[%s2057_s25 + $0x118] sm:$0xff]  }
  0x18   : > { %183 = vst [vmem:[%s2062_s26 + $0x38] sm:$0xff] %v182_v7   ;;  %v248_v24 = vld [vmem:[%s2057_s25 + $0x120] sm:$0xff]   ;;  %v252_v25 = vld [vmem:[%s2057_s25 + $0x128] sm:$0xf]  ;;  %v254_v26 = vld [vmem:[%s2057_s25 + $0x190] sm:$0xff]  }
  0x19   : > { %187 = vst [vmem:[%s2062_s26 + $0x40] sm:$0xff] %v186_v8   ;;  %v258_v27 = vld [vmem:[%s2057_s25 + $0x198] sm:$0xff]   ;;  %v262_v28 = vld [vmem:[%s2057_s25 + $0x1a0] sm:$0xff]   ;;  %v266_v29 = vld [vmem:[%s2057_s25 + $0x1a8] sm:$0xff]  }
  0x1a   : > { %191 = vst [vmem:[%s2062_s26 + $0x48] sm:$0xff] %v190_v9   ;;  %v270_v30 = vld [vmem:[%s2057_s25 + $0x1b0] sm:$0xff]   ;;  %v274_v31 = vld [vmem:[%s2057_s25 + $0x1b8] sm:$0xff]   ;;  %v278_v32 = vld [vmem:[%s2057_s25 + $0x1c0] sm:$0xff]  }
  0x1b   : > { %195 = vst [vmem:[%s2062_s26 + $0x50] sm:$0xff] %v194_v10   ;;  %v282_v33 = vld [vmem:[%s2057_s25 + $0x1c8] sm:$0xff]   ;;  %v286_v34 = vld [vmem:[%s2057_s25 + $0x1d0] sm:$0xff]   ;;  %v290_v35 = vld [vmem:[%s2057_s25 + $0x1d8] sm:$0xff]  }
  0x1c   : > { %199 = vst [vmem:[%s2062_s26 + $0x58] sm:$0xff] %v198_v11   ;;  %v294_v36 = vld [vmem:[%s2057_s25 + $0x1e0] sm:$0xff]   ;;  %v298_v37 = vld [vmem:[%s2057_s25 + $0x1e8] sm:$0xff]   ;;  %v302_v38 = vld [vmem:[%s2057_s25 + $0x1f0] sm:$0xf] }
  0x1d   : > { %203 = vst [vmem:[%s2062_s26 + $0x60] sm:$0xf] %v202_v12  ;;  %v304_v39 = vld [vmem:[%s2057_s25 + $0x258] sm:$0xff]   ;;  %v308_v40 = vld [vmem:[%s2057_s25 + $0x260] sm:$0xff]   ;;  %v312_v41 = vld [vmem:[%s2057_s25 + $0x268] sm:$0xff]  }
  0x1e   : > { %205 = vst [vmem:[%s2062_s26 + $0x64] sm:$0xff] %v204_v13   ;;  %v316_v42 = vld [vmem:[%s2057_s25 + $0x270] sm:$0xff]   ;;  %v320_v43 = vld [vmem:[%s2057_s25 + $0x278] sm:$0xff]   ;;  %v324_v44 = vld [vmem:[%s2057_s25 + $0x280] sm:$0xff]  }
  0x1f   : > { %209 = vst [vmem:[%s2062_s26 + $0x6c] sm:$0xff] %v208_v14   ;;  %v328_v45 = vld [vmem:[%s2057_s25 + $0x288] sm:$0xff]   ;;  %v332_v46 = vld [vmem:[%s2057_s25 + $0x290] sm:$0xff]   ;;  %v336_v47 = vld [vmem:[%s2057_s25 + $0x298] sm:$0xff]  }
  0x20   : > { %213 = vst [vmem:[%s2062_s26 + $0x74] sm:$0xff] %v212_v15   ;;  %v340_v48 = vld [vmem:[%s2057_s25 + $0x2a0] sm:$0xff]   ;;  %v344_v49 = vld [vmem:[%s2057_s25 + $0x2a8] sm:$0xff]   ;;  %v348_v50 = vld [vmem:[%s2057_s25 + $0x2b0] sm:$0xff]  }
  0x21   : > { %217 = vst [vmem:[%s2062_s26 + $0x7c] sm:$0xff] %v216_v16   ;;  %v352_v51 = vld [vmem:[%s2057_s25 + $0x2b8] sm:$0xf] }
  0x22   : > { %221 = vst [vmem:[%s2062_s26 + $0x84] sm:$0xff] %v220_v17  }
  0x23   : > { %225 = vst [vmem:[%s2062_s26 + $0x8c] sm:$0xff] %v224_v18  }
  0x24   : > { %229 = vst [vmem:[%s2062_s26 + $0x94] sm:$0xff] %v228_v19  }
  0x25   : > { %233 = vst [vmem:[%s2062_s26 + $0x9c] sm:$0xff] %v232_v20  }
  0x26   : > { %237 = vst [vmem:[%s2062_s26 + $0xa4] sm:$0xff] %v236_v21  }
  0x27   : > { %241 = vst [vmem:[%s2062_s26 + $0xac] sm:$0xff] %v240_v22  }
  0x28   : > { %245 = vst [vmem:[%s2062_s26 + $0xb4] sm:$0xff] %v244_v23  }
  0x29   : > { %249 = vst [vmem:[%s2062_s26 + $0xbc] sm:$0xff] %v248_v24  }
  0x2a   : > { %253 = vst [vmem:[%s2062_s26 + $0xc4] sm:$0xf] %v252_v25 }
  0x2b   : > { %255 = vst [vmem:[%s2062_s26 + $0xc8] sm:$0xff] %v254_v26  }
  0x2c   : > { %259 = vst [vmem:[%s2062_s26 + $0xd0] sm:$0xff] %v258_v27  }
  0x2d   : > { %263 = vst [vmem:[%s2062_s26 + $0xd8] sm:$0xff] %v262_v28  }
  0x2e   : > { %267 = vst [vmem:[%s2062_s26 + $0xe0] sm:$0xff] %v266_v29  }
  0x2f   : > { %271 = vst [vmem:[%s2062_s26 + $0xe8] sm:$0xff] %v270_v30  }
  0x30   : > { %275 = vst [vmem:[%s2062_s26 + $0xf0] sm:$0xff] %v274_v31  }
  0x31   : > { %279 = vst [vmem:[%s2062_s26 + $0xf8] sm:$0xff] %v278_v32  }
  0x32   : > { %283 = vst [vmem:[%s2062_s26 + $0x100] sm:$0xff] %v282_v33  }
  0x33   : > { %287 = vst [vmem:[%s2062_s26 + $0x108] sm:$0xff] %v286_v34  }
  0x34   : > { %291 = vst [vmem:[%s2062_s26 + $0x110] sm:$0xff] %v290_v35  }
  0x35   : > { %295 = vst [vmem:[%s2062_s26 + $0x118] sm:$0xff] %v294_v36  }
  0x36   : > { %299 = vst [vmem:[%s2062_s26 + $0x120] sm:$0xff] %v298_v37  }
  0x37   : > { %303 = vst [vmem:[%s2062_s26 + $0x128] sm:$0xf] %v302_v38 }
  0x38   : > { %305 = vst [vmem:[%s2062_s26 + $0x12c] sm:$0xff] %v304_v39  }
  0x39   : > { %309 = vst [vmem:[%s2062_s26 + $0x134] sm:$0xff] %v308_v40  }
  0x3a   : > { %313 = vst [vmem:[%s2062_s26 + $0x13c] sm:$0xff] %v312_v41  }
  0x3b   : > { %317 = vst [vmem:[%s2062_s26 + $0x144] sm:$0xff] %v316_v42  }
  0x3c   : > { %321 = vst [vmem:[%s2062_s26 + $0x14c] sm:$0xff] %v320_v43  }
  0x3d   : > { %325 = vst [vmem:[%s2062_s26 + $0x154] sm:$0xff] %v324_v44  }
  0x3e   : > { %329 = vst [vmem:[%s2062_s26 + $0x15c] sm:$0xff] %v328_v45  }
  0x3f   : > { %333 = vst [vmem:[%s2062_s26 + $0x164] sm:$0xff] %v332_v46  }
  0x40   : > { %337 = vst [vmem:[%s2062_s26 + $0x16c] sm:$0xff] %v336_v47  }
  0x41   : > { %341 = vst [vmem:[%s2062_s26 + $0x174] sm:$0xff] %v340_v48  }
  0x42   : > { %345 = vst [vmem:[%s2062_s26 + $0x17c] sm:$0xff] %v344_v49  }
  0x43   : > { %349 = vst [vmem:[%s2062_s26 + $0x184] sm:$0xff] %v348_v50  }
  0x44   : > { %353 = vst [vmem:[%s2062_s26 + $0x18c] sm:$0xf] %v352_v51 }
  0x45 PF: > { %p1633_p5 = scmp.ge.s32.totalorder %s2001_s14, 1  ;;  %p576_p6 = scmp.lt.s32.totalorder %s2001_s14, 3 }
  0x47   : > { %p577_p7 = pnand %p1633_p5, %p576_p6 }
  0x48   : > { %s583_s17 = sand.u32 (!%p577_p7), 1, %s1993_s12   ;;  %s607_s26 = smul.u32 (!%p577_p7), 25, %s1628_s15 }
  0x49   : > { %580 = sbr.rel (%p577_p7) target bundleno = 453 (0x1c5), region = 69 }
  0x4a   : > { %s1953_s21 = smul.u32 (!%p577_p7), 400, %s583_s17  ;;  %p608_p8 = scmp.lt.s32.totalorder (!%p577_p7), %s607_s26, 49 }
  0x4c   : > { %s2192_s24 = scalar_lea.vmem (!%p577_p7), [#allocation2], %s1953_s21 }
  0x4e   : > { %v1927_v52 = vld [vmem:[%s2423_s1 + $0x38] sm:$0xff]  ;;  %v1926_v53 = vld [vmem:[%s2423_s1 + $0x30] sm:$0xff]  ;;  %v1925_v54 = vld [vmem:[%s2423_s1 + $0x28] sm:$0xff]  ;;  %s2430_s26 = smov (!%p608_p8, %s607_s26), 49  ;;  %vm1540_vm0 = vcmask 60416  }
  0x4f   : > { %1081 = vmatpush.bf16.msra.mxu0 %v1927_v52  ;;  %1929 = vmatpush.bf16.msra.mxu2 %v1927_v52  ;;  %v1924_v55 = vld [vmem:[%s2423_s1 + $0x20] sm:$0xff]  ;;  %v1923_v56 = vld [vmem:[%s2423_s1 + $0x18] sm:$0xff]  ;;  %v1922_v57 = vld [vmem:[%s2423_s1 + $0x10] sm:$0xff]  ;;  %s1634_s14 = sshll.u32 %s2430_s26, 2 }
  0x50   : > { %1930 = vmatpush.bf16.msra.mxu3 %v1927_v52  ;;  %1928 = vmatpush.bf16.msra.mxu1 %v1927_v52  ;;  %v1921_v58 = vld [vmem:[%s2423_s1 + $0x8] sm:$0xff]  ;;  %v1920_v59 = vld [vmem:[%s2423_s1] sm:$0xff]  ;;  %s2258_s28 = scalar_lea.vmem %s2425_s3, %s1634_s14 }
  0x51   : > { %v1870_v60 = vld [vmem:[%s2192_s24] sm:$0xff]  ;;  %v1907_v62 = vld [vmem:[%s2192_s24 + $0x128] sm:$0xff]  ;;  %v1908_v2 = vld [vmem:[%s2192_s24 + $0x130] sm:$0xff] }
  0x52   : > { %v1894_v61 = vld [vmem:[%s2192_s24 + $0xc0] sm:$0xff]  ;;  %v1871_v0 = vld [vmem:[%s2192_s24 + $0x8] sm:$0xff]  ;;  %v1872_v4 = vld [vmem:[%s2192_s24 + $0x10] sm:$0xff] }
  0x53   : > { %1082 = vmatpush.bf16.msra.mxu0 %v1926_v53  ;;  %1932 = vmatpush.bf16.msra.mxu2 %v1926_v53  ;;  %v1882_v63 = vld [vmem:[%s2192_s24 + $0x60] sm:$0xff]  ;;  %v1895_v1 = vld [vmem:[%s2192_s24 + $0xc8] sm:$0xff]  ;;  %v1896_v5 = vld [vmem:[%s2192_s24 + $0xd0] sm:$0xff] }
  0x54   : > { %1933 = vmatpush.bf16.msra.mxu3 %v1926_v53  ;;  %1931 = vmatpush.bf16.msra.mxu1 %v1926_v53  ;;  %v1883_v3 = vld [vmem:[%s2192_s24 + $0x68] sm:$0xff]  ;;  %v1909_v6 = vld [vmem:[%s2192_s24 + $0x138] sm:$0xff]  ;;  %v1884_v7 = vld [vmem:[%s2192_s24 + $0x70] sm:$0xff] }
  0x55   : > { %v1873_v8 = vld [vmem:[%s2192_s24 + $0x18] sm:$0xff]  ;;  %v1910_v10 = vld [vmem:[%s2192_s24 + $0x140] sm:$0xff]  ;;  %v1911_v14 = vld [vmem:[%s2192_s24 + $0x148] sm:$0xff] }
  0x56   : > { %v1897_v9 = vld [vmem:[%s2192_s24 + $0xd8] sm:$0xff]  ;;  %v1874_v12 = vld [vmem:[%s2192_s24 + $0x20] sm:$0xff]  ;;  %v1875_v16 = vld [vmem:[%s2192_s24 + $0x28] sm:$0xff] }
  0x57   : > { %1083 = vmatpush.bf16.msra.mxu0 %v1925_v54  ;;  %1935 = vmatpush.bf16.msra.mxu2 %v1925_v54  ;;  %v1885_v11 = vld [vmem:[%s2192_s24 + $0x78] sm:$0xff]  ;;  %v1898_v13 = vld [vmem:[%s2192_s24 + $0xe0] sm:$0xff]  ;;  %v1899_v17 = vld [vmem:[%s2192_s24 + $0xe8] sm:$0xff] }
  0x58   : > { %1936 = vmatpush.bf16.msra.mxu3 %v1925_v54  ;;  %1934 = vmatpush.bf16.msra.mxu1 %v1925_v54  ;;  %v1886_v15 = vld [vmem:[%s2192_s24 + $0x80] sm:$0xff]  ;;  %v1912_v18 = vld [vmem:[%s2192_s24 + $0x150] sm:$0xff]  ;;  %v1887_v19 = vld [vmem:[%s2192_s24 + $0x88] sm:$0xff] }
  0x59   : > { %v1876_v20 = vld [vmem:[%s2192_s24 + $0x30] sm:$0xff]  ;;  %v1913_v22 = vld [vmem:[%s2192_s24 + $0x158] sm:$0xff]  ;;  %v1914_v26 = vld [vmem:[%s2192_s24 + $0x160] sm:$0xff] }
  0x5a   : > { %v1900_v21 = vld [vmem:[%s2192_s24 + $0xf0] sm:$0xff]  ;;  %v1877_v24 = vld [vmem:[%s2192_s24 + $0x38] sm:$0xff]  ;;  %v1878_v28 = vld [vmem:[%s2192_s24 + $0x40] sm:$0xff] }
  0x5b   : > { %1084 = vmatpush.bf16.msra.mxu0 %v1924_v55  ;;  %1938 = vmatpush.bf16.msra.mxu2 %v1924_v55  ;;  %v1888_v23 = vld [vmem:[%s2192_s24 + $0x90] sm:$0xff]  ;;  %v1901_v25 = vld [vmem:[%s2192_s24 + $0xf8] sm:$0xff]  ;;  %v1902_v29 = vld [vmem:[%s2192_s24 + $0x100] sm:$0xff] }
  0x5c   : > { %1939 = vmatpush.bf16.msra.mxu3 %v1924_v55  ;;  %1937 = vmatpush.bf16.msra.mxu1 %v1924_v55  ;;  %v1889_v27 = vld [vmem:[%s2192_s24 + $0x98] sm:$0xff]  ;;  %v1915_v31 = vld [vmem:[%s2192_s24 + $0x168] sm:$0xff]  ;;  %v1890_v32 = vld [vmem:[%s2192_s24 + $0xa0] sm:$0xff] }
  0x5d   : > { %v2235_v37 = vld [vmem:[%s2424_s2] ss:$0 sm:$0xff]  ;;  %v1879_v47 = vld [vmem:[%s2192_s24 + $0x48] sm:$0xff] }
  0x5e   : > { %v1903_v48 = vld [vmem:[%s2192_s24 + $0x108] sm:$0xff]  ;;  %v1916_v50 = vld [vmem:[%s2192_s24 + $0x170] sm:$0xff] }
  0x5f   : > { %1085 = vmatpush.bf16.msra.mxu0 %v1923_v56  ;;  %1941 = vmatpush.bf16.msra.mxu2 %v1923_v56  ;;  %v1891_v51 = vld [vmem:[%s2192_s24 + $0xa8] sm:$0xff] }
  0x60   : > { %1942 = vmatpush.bf16.msra.mxu3 %v1923_v56  ;;  %1940 = vmatpush.bf16.msra.mxu1 %v1923_v56 }
  0x63   : > { %1086 = vmatpush.bf16.msra.mxu0 %v1922_v57  ;;  %1944 = vmatpush.bf16.msra.mxu2 %v1922_v57 }
  0x64   : > { %1945 = vmatpush.bf16.msra.mxu3 %v1922_v57  ;;  %1943 = vmatpush.bf16.msra.mxu1 %v1922_v57 }
  0x67   : > { %1087 = vmatpush.bf16.msra.mxu0 %v1921_v58  ;;  %1947 = vmatpush.bf16.msra.mxu2 %v1921_v58 }
  0x68   : > { %1948 = vmatpush.bf16.msra.mxu3 %v1921_v58  ;;  %1946 = vmatpush.bf16.msra.mxu1 %v1921_v58 }
  0x6b   : > { %1088 = vmatpush.bf16.msra.mxu0 %v1920_v59  ;;  %1950 = vmatpush.bf16.msra.mxu2 %v1920_v59 }
  0x6c   : > { %1951 = vmatpush.bf16.msra.mxu3 %v1920_v59  ;;  %1949 = vmatpush.bf16.msra.mxu1 %v1920_v59 }
  0x6e   : > { %1089 = vmatmul.bf16.vlgmr.msra.gmra.mxu0 %v1870_v60  ;;  %1209 = vmatmul.bf16.vlgmr.msra.gmra.mxu2 %v1894_v61 }
  0x6f   : > { %1274 = vmatmul.bf16.vlgmr.msra.gmra.mxu3 %v1907_v62  ;;  %1149 = vmatmul.bf16.vlgmr.msra.gmra.mxu1 %v1882_v63 }
  0x7e   : > { %1094 = vmatmul.bf16.gmra.mxu0 %v1871_v0  ;;  %1214 = vmatmul.bf16.gmra.mxu2 %v1895_v1 }
  0x7f   : > { %1279 = vmatmul.bf16.gmra.mxu3 %v1908_v2  ;;  %1154 = vmatmul.bf16.gmra.mxu1 %v1883_v3 }
  0x8e   : > { %1099 = vmatmul.bf16.gmra.mxu0 %v1872_v4  ;;  %1219 = vmatmul.bf16.gmra.mxu2 %v1896_v5 }
  0x8f   : > { %1284 = vmatmul.bf16.gmra.mxu3 %v1909_v6  ;;  %1159 = vmatmul.bf16.gmra.mxu1 %v1884_v7 }
  0x9e   : > { %1104 = vmatmul.bf16.gmra.mxu0 %v1873_v8  ;;  %1224 = vmatmul.bf16.gmra.mxu2 %v1897_v9 }
  0x9f   : > { %1289 = vmatmul.bf16.gmra.mxu3 %v1910_v10  ;;  %1164 = vmatmul.bf16.gmra.mxu1 %v1885_v11 }
  0xae   : > { %1109 = vmatmul.bf16.gmra.mxu0 %v1874_v12  ;;  %1229 = vmatmul.bf16.gmra.mxu2 %v1898_v13 }
  0xaf   : > { %1294 = vmatmul.bf16.gmra.mxu3 %v1911_v14  ;;  %1169 = vmatmul.bf16.gmra.mxu1 %v1886_v15 }
  0xbe   : > { %1114 = vmatmul.bf16.gmra.mxu0 %v1875_v16  ;;  %1234 = vmatmul.bf16.gmra.mxu2 %v1899_v17  ;;  %v1880_v17 = vld [vmem:[%s2192_s24 + $0x50] sm:$0xff] }
  0xbf   : > { %1299 = vmatmul.bf16.gmra.mxu3 %v1912_v18  ;;  %1174 = vmatmul.bf16.gmra.mxu1 %v1887_v19  ;;  %v1904_v18 = vld [vmem:[%s2192_s24 + $0x110] sm:$0xff] }
  0xce   : > { %1119 = vmatmul.bf16.gmra.mxu0 %v1876_v20  ;;  %1239 = vmatmul.bf16.gmra.mxu2 %v1900_v21  ;;  %v1917_v20 = vld [vmem:[%s2192_s24 + $0x178] sm:$0xff]  ;;  %v1892_v21 = vld [vmem:[%s2192_s24 + $0xb0] sm:$0xff] }
  0xcf   : > { %1304 = vmatmul.bf16.gmra.mxu3 %v1913_v22  ;;  %1179 = vmatmul.bf16.gmra.mxu1 %v1888_v23 }
  0xde   : > { %1124 = vmatmul.bf16.gmra.mxu0 %v1877_v24  ;;  %1244 = vmatmul.bf16.gmra.mxu2 %v1901_v25 }
  0xdf   : > { %1309 = vmatmul.bf16.gmra.mxu3 %v1914_v26  ;;  %1184 = vmatmul.bf16.gmra.mxu1 %v1889_v27 }
  0xeb   : > { %v1090_v30 = vpop.f32.mrf.mxu0 }
  0xec   : > { %v1150_v33 = vpop.f32.mrf.mxu1  ;;  %v1091_v40 = vadd.f32 %v2235_v37, %v1090_v30 }
  0xed   : > { %v1151_v39 = vadd.f32 %v2235_v37, %v1150_v33 }
  0xee   : > { %1129 = vmatmul.bf16.gmra.mxu0 %v1878_v28  ;;  %1249 = vmatmul.bf16.gmra.mxu2 %v1902_v29  ;;  %v1340_v54 = vmax.f32 %v1091_v40, 0.0 }
  0xef   : > { %1314 = vmatmul.bf16.gmra.mxu3 %v1915_v31  ;;  %1189 = vmatmul.bf16.gmra.mxu1 %v1890_v32  ;;  %v1364_v42 = vmax.f32 %v1151_v39, 0.0 }
  0xf1   : > { %v2230_v34 = vpop.f32.mrf.mxu2 }
  0xf2   : > { %v1275_v35 = vpop.f32.mrf.mxu3 }
  0xf3   : > { %v1092_v36 = vpop.f32.mrf.mxu0  ;;  %v1276_v43 = vadd.f32 %v2235_v37, %v1275_v35 }
  0xf4   : > { %v1152_v38 = vpop.f32.mrf.mxu1  ;;  %v1093_v1 = vadd.f32 %v2235_v37, %v1092_v36 }
  0xf5   : > { %v1153_v44 = vadd.f32 %v2235_v37, %v1152_v38  ;;  %v1414_v55 = vmax.f32 %v1276_v43, 0.0 }
  0xf6   : > { %v1341_v7 = vmax.f32 %v1093_v1, 0.0 }
  0xf7   : > { %v1365_v56 = vmax.f32 %v1153_v44, 0.0 }
  0xf9   : > { %v1212_v41 = vpop.f32.mrf.mxu2  ;;  %v1440_v60 = vmax.f32 %v1340_v54, %v1365_v56  ;;  %v1905_v56 = vld [vmem:[%s2192_s24 + $0x118] sm:$0xff] }
  0xfa   : > { %v1213_v45 = vadd.f32 %v2235_v37, %v1212_v41  ;;  %v1277_v46 = vpop.f32.mrf.mxu3 }
  0xfb   : > { %v1095_v49 = vpop.f32.mrf.mxu0  ;;  %v1278_v61 = vadd.f32 %v2235_v37, %v1277_v46 }
  0xfc   : > { %v1389_v52 = vmax.f32 %v1213_v45, 0.0  ;;  %v1155_v53 = vpop.f32.mrf.mxu1  ;;  %v1096_v10 = vadd.f32 %v2235_v37, %v1095_v49 }
  0xfd   : > { %v1156_v2 = vadd.f32 %v2235_v37, %v1155_v53  ;;  %v1415_v5 = vmax.f32 %v1278_v61, 0.0 }
  0xfe   : > { %v1512_v57 = vmax.f32 %v1364_v42, %v1389_v52  ;;  %1134 = vmatmul.bf16.gmra.mxu0 %v1879_v47  ;;  %1254 = vmatmul.bf16.gmra.mxu2 %v1903_v48  ;;  %v1342_v25 = vmax.f32 %v1096_v10, 0.0 }
  0xff   : > { %1319 = vmatmul.bf16.gmra.mxu3 %v1916_v50  ;;  %1194 = vmatmul.bf16.gmra.mxu1 %v1891_v51  ;;  %v1366_v8 = vmax.f32 %v1156_v2, 0.0 }
 0x100   : > { %v2248_v58 = vmax.f32 %v1512_v57, %v1414_v55  ;;  %v1881_v55 = vld [vmem:[%s2192_s24 + $0x58] sm:$0xff] }
 0x101   : > { %v1215_v59 = vpop.f32.mrf.mxu2  ;;  %v1443_v22 = vmax.f32 %v1341_v7, %v1366_v8 }
 0x102   : > { %v1216_v62 = vadd.f32 %v2235_v37, %v1215_v59  ;;  %v1280_v63 = vpop.f32.mrf.mxu3  ;;  %v1918_v59 = vld [vmem:[%s2192_s24 + $0x180] sm:$0xff] }
 0x103   : > { %v1097_v0 = vpop.f32.mrf.mxu0  ;;  %v1281_v13 = vadd.f32 %v2235_v37, %v1280_v63 }
 0x104   : > { %v1390_v3 = vmax.f32 %v1216_v62, 0.0  ;;  %v1157_v4 = vpop.f32.mrf.mxu1  ;;  %v1098_v39 = vadd.f32 %v2235_v37, %v1097_v0 }
 0x105   : > { %v1158_v14 = vadd.f32 %v2235_v37, %v1157_v4  ;;  %v1416_v26 = vmax.f32 %v1281_v13, 0.0 }
 0x106   : > { %v1441_v6 = vmax.f32 %v1440_v60, %v1390_v3  ;;  %v1343_v45 = vmax.f32 %v1098_v39, 0.0  ;;  %v1893_v60 = vld [vmem:[%s2192_s24 + $0xb8] sm:$0xff] }
 0x107   : > { %v1367_v27 = vmax.f32 %v1158_v14, 0.0 }
 0x108   : > { %v1442_v9 = vmax.f32 %v1441_v6, %v1415_v5 }
 0x109   : > { %v1217_v11 = vpop.f32.mrf.mxu2  ;;  %v1446_v31 = vmax.f32 %v1342_v25, %v1367_v27 }
 0x10a   : > { %v1515_v12 = vpack.c.bf16 %v1442_v9, %v1442_v9  ;;  %v1218_v15 = vadd.f32 %v2235_v37, %v1217_v11  ;;  %v1282_v16 = vpop.f32.mrf.mxu3 }
 0x10b   : > { %v1100_v19 = vpop.f32.mrf.mxu0  ;;  %v1283_v33 = vadd.f32 %v2235_v37, %v1282_v16 }
 0x10c   : > { %1541 = vst.msk [vmem:[%s2258_s28] sm:$0xf] %vm1540_vm0, %v1515_v12  ;;  %v1391_v23 = vmax.f32 %v1218_v15, 0.0  ;;  %v1160_v24 = vpop.f32.mrf.mxu1  ;;  %v1101_v48 = vadd.f32 %v2235_v37, %v1100_v19 }
 0x10d   : > { %v1161_v40 = vadd.f32 %v2235_v37, %v1160_v24  ;;  %v1417_v43 = vmax.f32 %v1283_v33, 0.0 }
 0x10e   : > { %v1444_v28 = vmax.f32 %v1443_v22, %v1391_v23  ;;  %1139 = vmatmul.bf16.gmra.mxu0 %v1880_v17  ;;  %1259 = vmatmul.bf16.gmra.mxu2 %v1904_v18  ;;  %v1344_v0 = vmax.f32 %v1101_v48, 0.0 }
 0x10f   : > { %1324 = vmatmul.bf16.gmra.mxu3 %v1917_v20  ;;  %1199 = vmatmul.bf16.gmra.mxu1 %v1892_v21  ;;  %v1368_v46 = vmax.f32 %v1161_v40, 0.0 }
 0x110   : > { %v1445_v29 = vmax.f32 %v1444_v28, %v1416_v26  ;;  %v1906_v28 = vld [vmem:[%s2192_s24 + $0x120] sm:$0xff] }
 0x111   : > { %v1220_v30 = vpop.f32.mrf.mxu2  ;;  %v1449_v61 = vmax.f32 %v1343_v45, %v1368_v46 }
 0x112   : > { %v1516_v32 = vpack.c.bf16 %v1445_v29, %v1445_v29  ;;  %v1221_v35 = vadd.f32 %v2235_v37, %v1220_v30  ;;  %v1285_v36 = vpop.f32.mrf.mxu3  ;;  %v1919_v30 = vld [vmem:[%s2192_s24 + $0x188] sm:$0xff] }
 0x113   : > { %v1102_v38 = vpop.f32.mrf.mxu0  ;;  %v1286_v51 = vadd.f32 %v2235_v37, %v1285_v36 }
 0x114   : > { %1542 = vst.msk [vmem:[%s2258_s28 + $0x4] sm:$0xf] %vm1540_vm0, %v1516_v32  ;;  %v1392_v41 = vmax.f32 %v1221_v35, 0.0  ;;  %v1162_v42 = vpop.f32.mrf.mxu1  ;;  %v1103_v12 = vadd.f32 %v2235_v37, %v1102_v38 }
 0x115   : > { %v1163_v52 = vadd.f32 %v2235_v37, %v1162_v42  ;;  %v1418_v1 = vmax.f32 %v1286_v51, 0.0 }
 0x116   : > { %v1447_v44 = vmax.f32 %v1446_v31, %v1392_v41  ;;  %v1345_v18 = vmax.f32 %v1103_v12, 0.0 }
 0x117   : > { %v1369_v2 = vmax.f32 %v1163_v52, 0.0 }
 0x118   : > { %v1448_v47 = vmax.f32 %v1447_v44, %v1417_v43 }
 0x119   : > { %v1222_v49 = vpop.f32.mrf.mxu2  ;;  %v1452_v6 = vmax.f32 %v1344_v0, %v1369_v2 }
 0x11a   : > { %v1517_v50 = vpack.c.bf16 %v1448_v47, %v1448_v47  ;;  %v1223_v53 = vadd.f32 %v2235_v37, %v1222_v49  ;;  %v1287_v54 = vpop.f32.mrf.mxu3 }
 0x11b   : > { %v1105_v57 = vpop.f32.mrf.mxu0  ;;  %v1288_v8 = vadd.f32 %v2235_v37, %v1287_v54 }
 0x11c   : > { %1543 = vst.msk [vmem:[%s2258_s28 + $0x8] sm:$0xf] %vm1540_vm0, %v1517_v50  ;;  %v1393_v62 = vmax.f32 %v1223_v53, 0.0  ;;  %v1165_v63 = vpop.f32.mrf.mxu1  ;;  %v1106_v21 = vadd.f32 %v2235_v37, %v1105_v57 }
 0x11d   : > { %v1166_v13 = vadd.f32 %v2235_v37, %v1165_v63  ;;  %v1419_v16 = vmax.f32 %v1288_v8, 0.0 }
 0x11e   : > { %v1450_v3 = vmax.f32 %v1449_v61, %v1393_v62  ;;  %1144 = vmatmul.bf16.gmra.mxu0 %v1881_v55  ;;  %1264 = vmatmul.bf16.gmra.mxu2 %v1905_v56  ;;  %v1346_v35 = vmax.f32 %v1106_v21, 0.0 }
 0x11f   : > { %1329 = vmatmul.bf16.gmra.mxu3 %v1918_v59  ;;  %1204 = vmatmul.bf16.gmra.mxu1 %v1893_v60  ;;  %v1370_v19 = vmax.f32 %v1166_v13, 0.0 }
 0x120   : > { %v1451_v4 = vmax.f32 %v1450_v3, %v1418_v1 }
 0x121   : > { %v1225_v5 = vpop.f32.mrf.mxu2  ;;  %v1455_v31 = vmax.f32 %v1345_v18, %v1370_v19 }
 0x122   : > { %v1518_v7 = vpack.c.bf16 %v1451_v4, %v1451_v4  ;;  %v1226_v9 = vadd.f32 %v2235_v37, %v1225_v5  ;;  %v1290_v10 = vpop.f32.mrf.mxu3 }
 0x123   : > { %v1107_v11 = vpop.f32.mrf.mxu0  ;;  %v1291_v24 = vadd.f32 %v2235_v37, %v1290_v10 }
 0x124   : > { %1544 = vst.msk [vmem:[%s2258_s28 + $0xc] sm:$0xf] %vm1540_vm0, %v1518_v7  ;;  %v1394_v14 = vmax.f32 %v1226_v9, 0.0  ;;  %v1167_v15 = vpop.f32.mrf.mxu1  ;;  %v1108_v48 = vadd.f32 %v2235_v37, %v1107_v11 }
 0x125   : > { %v1168_v25 = vadd.f32 %v2235_v37, %v1167_v15  ;;  %v1420_v36 = vmax.f32 %v1291_v24, 0.0 }
 0x126   : > { %v1453_v17 = vmax.f32 %v1452_v6, %v1394_v14  ;;  %v1347_v54 = vmax.f32 %v1108_v48, 0.0 }
 0x127   : > { %v1371_v38 = vmax.f32 %v1168_v25, 0.0 }
 0x128   : > { %v1454_v20 = vmax.f32 %v1453_v17, %v1419_v16 }
 0x129   : > { %v1227_v22 = vpop.f32.mrf.mxu2  ;;  %v1458_v42 = vmax.f32 %v1346_v35, %v1371_v38 }
 0x12a   : > { %v1519_v23 = vpack.c.bf16 %v1454_v20, %v1454_v20  ;;  %v1228_v26 = vadd.f32 %v2235_v37, %v1227_v22  ;;  %v1292_v27 = vpop.f32.mrf.mxu3 }
 0x12b   : > { %v1110_v29 = vpop.f32.mrf.mxu0  ;;  %v1293_v44 = vadd.f32 %v2235_v37, %v1292_v27 }
 0x12c   : > { %1545 = vst.msk [vmem:[%s2258_s28 + $0x10] sm:$0xf] %vm1540_vm0, %v1519_v23  ;;  %v1395_v32 = vmax.f32 %v1228_v26, 0.0  ;;  %v1170_v33 = vpop.f32.mrf.mxu1  ;;  %v1111_v57 = vadd.f32 %v2235_v37, %v1110_v29 }
 0x12d   : > { %v1171_v49 = vadd.f32 %v2235_v37, %v1170_v33  ;;  %v1421_v52 = vmax.f32 %v1293_v44, 0.0 }
 0x12e   : > { %v1456_v39 = vmax.f32 %v1455_v31, %v1395_v32  ;;  %1269 = vmatmul.bf16.gmra.mxu2 %v1906_v28  ;;  %v1348_v5 = vmax.f32 %v1111_v57, 0.0 }
 0x12f   : > { %1334 = vmatmul.bf16.gmra.mxu3 %v1919_v30  ;;  %v1372_v55 = vmax.f32 %v1171_v49, 0.0 }
 0x130   : > { %v1457_v40 = vmax.f32 %v1456_v39, %v1420_v36 }
 0x131   : > { %v1230_v41 = vpop.f32.mrf.mxu2  ;;  %v1461_v2 = vmax.f32 %v1347_v54, %v1372_v55 }
 0x132   : > { %v1520_v43 = vpack.c.bf16 %v1457_v40, %v1457_v40  ;;  %v1231_v45 = vadd.f32 %v2235_v37, %v1230_v41  ;;  %v1295_v46 = vpop.f32.mrf.mxu3 }
 0x133   : > { %v1112_v47 = vpop.f32.mrf.mxu0  ;;  %v1296_v61 = vadd.f32 %v2235_v37, %v1295_v46 }
 0x134   : > { %1546 = vst.msk [vmem:[%s2258_s28 + $0x14] sm:$0xf] %vm1540_vm0, %v1520_v43  ;;  %v1396_v50 = vmax.f32 %v1231_v45, 0.0  ;;  %v1172_v51 = vpop.f32.mrf.mxu1  ;;  %v1113_v17 = vadd.f32 %v2235_v37, %v1112_v47 }
 0x135   : > { %v1173_v62 = vadd.f32 %v2235_v37, %v1172_v51  ;;  %v1422_v6 = vmax.f32 %v1296_v61, 0.0 }
 0x136   : > { %v1459_v53 = vmax.f32 %v1458_v42, %v1396_v50  ;;  %v1349_v23 = vmax.f32 %v1113_v17, 0.0 }
 0x137   : > { %v1373_v7 = vmax.f32 %v1173_v62, 0.0 }
 0x138   : > { %v1460_v56 = vmax.f32 %v1459_v53, %v1421_v52 }
 0x139   : > { %v1232_v59 = vpop.f32.mrf.mxu2  ;;  %v1464_v11 = vmax.f32 %v1348_v5, %v1373_v7 }
 0x13a   : > { %v1521_v60 = vpack.c.bf16 %v1460_v56, %v1460_v56  ;;  %v1233_v63 = vadd.f32 %v2235_v37, %v1232_v59  ;;  %v1297_v0 = vpop.f32.mrf.mxu3 }
 0x13b   : > { %v1115_v1 = vpop.f32.mrf.mxu0  ;;  %v1298_v13 = vadd.f32 %v2235_v37, %v1297_v0 }
 0x13c   : > { %1547 = vst.msk [vmem:[%s2258_s28 + $0x18] sm:$0xf] %vm1540_vm0, %v1521_v60  ;;  %v1397_v3 = vmax.f32 %v1233_v63, 0.0  ;;  %v1175_v4 = vpop.f32.mrf.mxu1  ;;  %v1116_v26 = vadd.f32 %v2235_v37, %v1115_v1 }
 0x13d   : > { %v1176_v18 = vadd.f32 %v2235_v37, %v1175_v4  ;;  %v1423_v21 = vmax.f32 %v1298_v13, 0.0 }
 0x13e   : > { %v1462_v8 = vmax.f32 %v1461_v2, %v1397_v3  ;;  %v1350_v39 = vmax.f32 %v1116_v26, 0.0 }
 0x13f   : > { %v1374_v24 = vmax.f32 %v1176_v18, 0.0 }
 0x140   : > { %v1463_v9 = vmax.f32 %v1462_v8, %v1422_v6 }
 0x141   : > { %v1235_v10 = vpop.f32.mrf.mxu2  ;;  %v1467_v35 = vmax.f32 %v1349_v23, %v1374_v24 }
 0x142   : > { %v1522_v12 = vpack.c.bf16 %v1463_v9, %v1463_v9  ;;  %v1236_v14 = vadd.f32 %v2235_v37, %v1235_v10  ;;  %v1300_v15 = vpop.f32.mrf.mxu3 }
 0x143   : > { %v1117_v16 = vpop.f32.mrf.mxu0  ;;  %v1301_v29 = vadd.f32 %v2235_v37, %v1300_v15 }
 0x144   : > { %1548 = vst.msk [vmem:[%s2258_s28 + $0x1c] sm:$0xf] %vm1540_vm0, %v1522_v12  ;;  %v1398_v19 = vmax.f32 %v1236_v14, 0.0  ;;  %v1177_v20 = vpop.f32.mrf.mxu1  ;;  %v1118_v51 = vadd.f32 %v2235_v37, %v1117_v16 }
 0x145   : > { %v1178_v30 = vadd.f32 %v2235_v37, %v1177_v20  ;;  %v1424_v40 = vmax.f32 %v1301_v29, 0.0 }
 0x146   : > { %v1465_v22 = vmax.f32 %v1464_v11, %v1398_v19  ;;  %v1351_v57 = vmax.f32 %v1118_v51, 0.0 }
 0x147   : > { %v1375_v41 = vmax.f32 %v1178_v30, 0.0 }
 0x148   : > { %v1466_v25 = vmax.f32 %v1465_v22, %v1423_v21 }
 0x149   : > { %v1237_v27 = vpop.f32.mrf.mxu2  ;;  %v1470_v45 = vmax.f32 %v1350_v39, %v1375_v41 }
 0x14a   : > { %v1523_v28 = vpack.c.bf16 %v1466_v25, %v1466_v25  ;;  %v1238_v31 = vadd.f32 %v2235_v37, %v1237_v27  ;;  %v1302_v32 = vpop.f32.mrf.mxu3 }
 0x14b   : > { %v1120_v33 = vpop.f32.mrf.mxu0  ;;  %v1303_v47 = vadd.f32 %v2235_v37, %v1302_v32 }
 0x14c   : > { %1549 = vst.msk [vmem:[%s2258_s28 + $0x20] sm:$0xf] %vm1540_vm0, %v1523_v28  ;;  %v1399_v36 = vmax.f32 %v1238_v31, 0.0  ;;  %v1180_v38 = vpop.f32.mrf.mxu1  ;;  %v1121_v61 = vadd.f32 %v2235_v37, %v1120_v33 }
 0x14d   : > { %v1181_v52 = vadd.f32 %v2235_v37, %v1180_v38  ;;  %v1425_v55 = vmax.f32 %v1303_v47, 0.0 }
 0x14e   : > { %v1468_v42 = vmax.f32 %v1467_v35, %v1399_v36  ;;  %v1352_v8 = vmax.f32 %v1121_v61, 0.0 }
 0x14f   : > { %v1376_v59 = vmax.f32 %v1181_v52, 0.0 }
 0x150   : > { %v1469_v43 = vmax.f32 %v1468_v42, %v1424_v40 }
 0x151   : > { %v1240_v44 = vpop.f32.mrf.mxu2  ;;  %v1473_v5 = vmax.f32 %v1351_v57, %v1376_v59 }
 0x152   : > { %v1524_v46 = vpack.c.bf16 %v1469_v43, %v1469_v43  ;;  %v1241_v48 = vadd.f32 %v2235_v37, %v1240_v44  ;;  %v1305_v49 = vpop.f32.mrf.mxu3 }
 0x153   : > { %v1122_v50 = vpop.f32.mrf.mxu0  ;;  %v1306_v0 = vadd.f32 %v2235_v37, %v1305_v49 }
 0x154   : > { %1550 = vst.msk [vmem:[%s2258_s28 + $0x24] sm:$0xf] %vm1540_vm0, %v1524_v46  ;;  %v1400_v53 = vmax.f32 %v1241_v48, 0.0  ;;  %v1182_v54 = vpop.f32.mrf.mxu1  ;;  %v1123_v20 = vadd.f32 %v2235_v37, %v1122_v50 }
 0x155   : > { %v1183_v1 = vadd.f32 %v2235_v37, %v1182_v54  ;;  %v1426_v9 = vmax.f32 %v1306_v0, 0.0 }
 0x156   : > { %v1471_v56 = vmax.f32 %v1470_v45, %v1400_v53  ;;  %v1353_v26 = vmax.f32 %v1123_v20, 0.0 }
 0x157   : > { %v1377_v10 = vmax.f32 %v1183_v1, 0.0 }
 0x158   : > { %v1472_v60 = vmax.f32 %v1471_v56, %v1425_v55 }
 0x159   : > { %v1242_v62 = vpop.f32.mrf.mxu2  ;;  %v1476_v14 = vmax.f32 %v1352_v8, %v1377_v10 }
 0x15a   : > { %v1525_v63 = vpack.c.bf16 %v1472_v60, %v1472_v60  ;;  %v1243_v2 = vadd.f32 %v2235_v37, %v1242_v62  ;;  %v1307_v3 = vpop.f32.mrf.mxu3 }
 0x15b   : > { %v1125_v4 = vpop.f32.mrf.mxu0  ;;  %v1308_v16 = vadd.f32 %v2235_v37, %v1307_v3 }
 0x15c   : > { %1551 = vst.msk [vmem:[%s2258_s28 + $0x28] sm:$0xf] %vm1540_vm0, %v1525_v63  ;;  %v1401_v6 = vmax.f32 %v1243_v2, 0.0  ;;  %v1185_v7 = vpop.f32.mrf.mxu1  ;;  %v1126_v29 = vadd.f32 %v2235_v37, %v1125_v4 }
 0x15d   : > { %v1186_v21 = vadd.f32 %v2235_v37, %v1185_v7  ;;  %v1427_v24 = vmax.f32 %v1308_v16, 0.0 }
 0x15e   : > { %v1474_v11 = vmax.f32 %v1473_v5, %v1401_v6  ;;  %v1354_v42 = vmax.f32 %v1126_v29, 0.0 }
 0x15f   : > { %v1378_v27 = vmax.f32 %v1186_v21, 0.0 }
 0x160   : > { %v1475_v12 = vmax.f32 %v1474_v11, %v1426_v9 }
 0x161   : > { %v1245_v13 = vpop.f32.mrf.mxu2  ;;  %v1479_v39 = vmax.f32 %v1353_v26, %v1378_v27 }
 0x162   : > { %v1526_v15 = vpack.c.bf16 %v1475_v12, %v1475_v12  ;;  %v1246_v17 = vadd.f32 %v2235_v37, %v1245_v13  ;;  %v1310_v18 = vpop.f32.mrf.mxu3 }
 0x163   : > { %v1127_v19 = vpop.f32.mrf.mxu0  ;;  %v1311_v32 = vadd.f32 %v2235_v37, %v1310_v18 }
 0x164   : > { %1552 = vst.msk [vmem:[%s2258_s28 + $0x2c] sm:$0xf] %vm1540_vm0, %v1526_v15  ;;  %v1402_v22 = vmax.f32 %v1246_v17, 0.0  ;;  %v1187_v23 = vpop.f32.mrf.mxu1  ;;  %v1128_v53 = vadd.f32 %v2235_v37, %v1127_v19 }
 0x165   : > { %v1188_v33 = vadd.f32 %v2235_v37, %v1187_v23  ;;  %v1428_v43 = vmax.f32 %v1311_v32, 0.0 }
 0x166   : > { %v1477_v25 = vmax.f32 %v1476_v14, %v1402_v22  ;;  %v1355_v61 = vmax.f32 %v1128_v53, 0.0 }
 0x167   : > { %v1379_v44 = vmax.f32 %v1188_v33, 0.0 }
 0x168   : > { %v1478_v28 = vmax.f32 %v1477_v25, %v1427_v24 }
 0x169   : > { %v1247_v30 = vpop.f32.mrf.mxu2  ;;  %v1482_v48 = vmax.f32 %v1354_v42, %v1379_v44 }
 0x16a   : > { %v1527_v31 = vpack.c.bf16 %v1478_v28, %v1478_v28  ;;  %v1248_v35 = vadd.f32 %v2235_v37, %v1247_v30  ;;  %v1312_v36 = vpop.f32.mrf.mxu3 }
 0x16b   : > { %v1130_v38 = vpop.f32.mrf.mxu0  ;;  %v1313_v50 = vadd.f32 %v2235_v37, %v1312_v36 }
 0x16c   : > { %1553 = vst.msk [vmem:[%s2258_s28 + $0x30] sm:$0xf] %vm1540_vm0, %v1527_v31  ;;  %v1403_v40 = vmax.f32 %v1248_v35, 0.0  ;;  %v1190_v41 = vpop.f32.mrf.mxu1  ;;  %v1131_v0 = vadd.f32 %v2235_v37, %v1130_v38 }
 0x16d   : > { %v1191_v54 = vadd.f32 %v2235_v37, %v1190_v41  ;;  %v1429_v59 = vmax.f32 %v1313_v50, 0.0 }
 0x16e   : > { %v1480_v45 = vmax.f32 %v1479_v39, %v1403_v40  ;;  %v1356_v10 = vmax.f32 %v1131_v0, 0.0 }
 0x16f   : > { %v1380_v62 = vmax.f32 %v1191_v54, 0.0 }
 0x170   : > { %v1481_v46 = vmax.f32 %v1480_v45, %v1428_v43 }
 0x171   : > { %v1250_v47 = vpop.f32.mrf.mxu2  ;;  %v1485_v7 = vmax.f32 %v1355_v61, %v1380_v62 }
 0x172   : > { %v1528_v49 = vpack.c.bf16 %v1481_v46, %v1481_v46  ;;  %v1251_v51 = vadd.f32 %v2235_v37, %v1250_v47  ;;  %v1315_v52 = vpop.f32.mrf.mxu3 }
 0x173   : > { %v1132_v57 = vpop.f32.mrf.mxu0  ;;  %v1316_v3 = vadd.f32 %v2235_v37, %v1315_v52 }
 0x174   : > { %1554 = vst.msk [vmem:[%s2258_s28 + $0x34] sm:$0xf] %vm1540_vm0, %v1528_v49  ;;  %v1404_v55 = vmax.f32 %v1251_v51, 0.0  ;;  %v1192_v56 = vpop.f32.mrf.mxu1  ;;  %v1133_v22 = vadd.f32 %v2235_v37, %v1132_v57 }
 0x175   : > { %v1193_v4 = vadd.f32 %v2235_v37, %v1192_v56  ;;  %v1430_v11 = vmax.f32 %v1316_v3, 0.0 }
 0x176   : > { %v1483_v60 = vmax.f32 %v1482_v48, %v1404_v55  ;;  %v1357_v28 = vmax.f32 %v1133_v22, 0.0 }
 0x177   : > { %v1381_v12 = vmax.f32 %v1193_v4, 0.0 }
 0x178   : > { %v1484_v63 = vmax.f32 %v1483_v60, %v1429_v59 }
 0x179   : > { %v1252_v1 = vpop.f32.mrf.mxu2  ;;  %v1488_v17 = vmax.f32 %v1356_v10, %v1381_v12 }
 0x17a   : > { %v1529_v2 = vpack.c.bf16 %v1484_v63, %v1484_v63  ;;  %v1253_v5 = vadd.f32 %v2235_v37, %v1252_v1  ;;  %v1317_v6 = vpop.f32.mrf.mxu3 }
 0x17b   : > { %v1135_v14 = vpop.f32.mrf.mxu0  ;;  %v1318_v19 = vadd.f32 %v2235_v37, %v1317_v6 }
 0x17c   : > { %1555 = vst.msk [vmem:[%s2258_s28 + $0x38] sm:$0xf] %vm1540_vm0, %v1529_v2  ;;  %v1405_v8 = vmax.f32 %v1253_v5, 0.0  ;;  %v1195_v9 = vpop.f32.mrf.mxu1  ;;  %v1136_v31 = vadd.f32 %v2235_v37, %v1135_v14 }
 0x17d   : > { %v1196_v23 = vadd.f32 %v2235_v37, %v1195_v9  ;;  %v1431_v26 = vmax.f32 %v1318_v19, 0.0 }
 0x17e   : > { %v1486_v13 = vmax.f32 %v1485_v7, %v1405_v8  ;;  %v1358_v44 = vmax.f32 %v1136_v31, 0.0 }
 0x17f   : > { %v1382_v29 = vmax.f32 %v1196_v23, 0.0 }
 0x180   : > { %v1487_v15 = vmax.f32 %v1486_v13, %v1430_v11 }
 0x181   : > { %v1255_v16 = vpop.f32.mrf.mxu2  ;;  %v1491_v41 = vmax.f32 %v1357_v28, %v1382_v29 }
 0x182   : > { %v1530_v18 = vpack.c.bf16 %v1487_v15, %v1487_v15  ;;  %v1256_v20 = vadd.f32 %v2235_v37, %v1255_v16  ;;  %v1320_v21 = vpop.f32.mrf.mxu3 }
 0x183   : > { %v1137_v32 = vpop.f32.mrf.mxu0  ;;  %v1321_v36 = vadd.f32 %v2235_v37, %v1320_v21 }
 0x184   : > { %1556 = vst.msk [vmem:[%s2258_s28 + $0x3c] sm:$0xf] %vm1540_vm0, %v1530_v18  ;;  %v1406_v24 = vmax.f32 %v1256_v20, 0.0  ;;  %v1197_v25 = vpop.f32.mrf.mxu1  ;;  %v1138_v56 = vadd.f32 %v2235_v37, %v1137_v32 }
 0x185   : > { %v1198_v38 = vadd.f32 %v2235_v37, %v1197_v25  ;;  %v1432_v45 = vmax.f32 %v1321_v36, 0.0 }
 0x186   : > { %v1489_v27 = vmax.f32 %v1488_v17, %v1406_v24  ;;  %v1359_v63 = vmax.f32 %v1138_v56, 0.0 }
 0x187   : > { %v1383_v46 = vmax.f32 %v1198_v38, 0.0 }
 0x188   : > { %v1490_v30 = vmax.f32 %v1489_v27, %v1431_v26 }
 0x189   : > { %v1257_v33 = vpop.f32.mrf.mxu2  ;;  %v1494_v50 = vmax.f32 %v1358_v44, %v1383_v46 }
 0x18a   : > { %v1531_v35 = vpack.c.bf16 %v1490_v30, %v1490_v30  ;;  %v1258_v39 = vadd.f32 %v2235_v37, %v1257_v33  ;;  %v1322_v40 = vpop.f32.mrf.mxu3 }
 0x18b   : > { %v1323_v52 = vadd.f32 %v2235_v37, %v1322_v40  ;;  %v1140_v55 = vpop.f32.mrf.mxu0 }
 0x18c   : > { %1557 = vst.msk [vmem:[%s2258_s28 + $0x40] sm:$0xf] %vm1540_vm0, %v1531_v35  ;;  %v1407_v42 = vmax.f32 %v1258_v39, 0.0  ;;  %v1200_v43 = vpop.f32.mrf.mxu1  ;;  %v1141_v2 = vadd.f32 %v2235_v37, %v1140_v55 }
 0x18d   : > { %v1201_v57 = vadd.f32 %v2235_v37, %v1200_v43  ;;  %v1433_v61 = vmax.f32 %v1323_v52, 0.0 }
 0x18e   : > { %v1492_v47 = vmax.f32 %v1491_v41, %v1407_v42  ;;  %v1360_v12 = vmax.f32 %v1141_v2, 0.0 }
 0x18f   : > { %v1384_v0 = vmax.f32 %v1201_v57, 0.0 }
 0x190   : > { %v1493_v48 = vmax.f32 %v1492_v47, %v1432_v45 }
 0x191   : > { %v1260_v49 = vpop.f32.mrf.mxu2  ;;  %v1497_v9 = vmax.f32 %v1359_v63, %v1384_v0 }
 0x192   : > { %v1532_v51 = vpack.c.bf16 %v1493_v48, %v1493_v48  ;;  %v1261_v53 = vadd.f32 %v2235_v37, %v1260_v49  ;;  %v1325_v54 = vpop.f32.mrf.mxu3 }
 0x193   : > { %v1326_v5 = vadd.f32 %v2235_v37, %v1325_v54  ;;  %v1142_v11 = vpop.f32.mrf.mxu0 }
 0x194   : > { %1558 = vst.msk [vmem:[%s2258_s28 + $0x44] sm:$0xf] %vm1540_vm0, %v1532_v51  ;;  %v1408_v59 = vmax.f32 %v1261_v53, 0.0  ;;  %v1202_v60 = vpop.f32.mrf.mxu1  ;;  %v1143_v24 = vadd.f32 %v2235_v37, %v1142_v11 }
 0x195   : > { %v1203_v6 = vadd.f32 %v2235_v37, %v1202_v60  ;;  %v1434_v13 = vmax.f32 %v1326_v5, 0.0  ;;  %v1211_v60 = vadd.f32 %v2235_v37, %v2230_v34 }
 0x196   : > { %v1495_v62 = vmax.f32 %v1494_v50, %v1408_v59  ;;  %v1361_v31 = vmax.f32 %v1143_v24, 0.0 }
 0x197   : > { %v1385_v14 = vmax.f32 %v1203_v6, 0.0  ;;  %v1388_v2 = vmax.f32 %v1211_v60, 0.0 }
 0x198   : > { %v1496_v1 = vmax.f32 %v1495_v62, %v1433_v61 }
 0x199   : > { %v1262_v3 = vpop.f32.mrf.mxu2  ;;  %v1500_v19 = vmax.f32 %v1360_v12, %v1385_v14 }
 0x19a   : > { %v1533_v4 = vpack.c.bf16 %v1496_v1, %v1496_v1  ;;  %v1263_v7 = vadd.f32 %v2235_v37, %v1262_v3  ;;  %v1327_v8 = vpop.f32.mrf.mxu3 }
 0x19b   : > { %v1328_v21 = vadd.f32 %v2235_v37, %v1327_v8  ;;  %v1145_v29 = vpop.f32.mrf.mxu0 }
 0x19c   : > { %1559 = vst.msk [vmem:[%s2258_s28 + $0x48] sm:$0xf] %vm1540_vm0, %v1533_v4  ;;  %v1409_v10 = vmax.f32 %v1263_v7, 0.0  ;;  %v1205_v16 = vpop.f32.mrf.mxu1  ;;  %v1146_v35 = vadd.f32 %v2235_v37, %v1145_v29 }
 0x19d   : > { %v1206_v25 = vadd.f32 %v2235_v37, %v1205_v16  ;;  %v1435_v27 = vmax.f32 %v1328_v21, 0.0 }
 0x19e   : > { %v1498_v15 = vmax.f32 %v1497_v9, %v1409_v10  ;;  %v1362_v45 = vmax.f32 %v1146_v35, 0.0 }
 0x19f   : > { %v1386_v32 = vmax.f32 %v1206_v25, 0.0 }
 0x1a0   : > { %v1499_v17 = vmax.f32 %v1498_v15, %v1434_v13 }
 0x1a1   : > { %v1265_v18 = vpop.f32.mrf.mxu2  ;;  %v1503_v43 = vmax.f32 %v1361_v31, %v1386_v32 }
 0x1a2   : > { %v1534_v20 = vpack.c.bf16 %v1499_v17, %v1499_v17  ;;  %v1266_v22 = vadd.f32 %v2235_v37, %v1265_v18  ;;  %v1330_v23 = vpop.f32.mrf.mxu3 }
 0x1a3   : > { %v1331_v39 = vadd.f32 %v2235_v37, %v1330_v23  ;;  %v1147_v50 = vpop.f32.mrf.mxu0 }
 0x1a4   : > { %1560 = vst.msk [vmem:[%s2258_s28 + $0x4c] sm:$0xf] %vm1540_vm0, %v1534_v20  ;;  %v1410_v26 = vmax.f32 %v1266_v22, 0.0  ;;  %v1207_v30 = vpop.f32.mrf.mxu1  ;;  %v1148_v57 = vadd.f32 %v2235_v37, %v1147_v50 }
 0x1a5   : > { %v1208_v42 = vadd.f32 %v2235_v37, %v1207_v30  ;;  %v1436_v46 = vmax.f32 %v1331_v39, 0.0 }
 0x1a6   : > { %v1501_v28 = vmax.f32 %v1500_v19, %v1410_v26  ;;  %v1363_v63 = vmax.f32 %v1148_v57, 0.0 }
 0x1a7   : > { %v1387_v48 = vmax.f32 %v1208_v42, 0.0 }
 0x1a8   : > { %v1502_v33 = vmax.f32 %v1501_v28, %v1435_v27  ;;  %v1509_v8 = vmax.f32 %v1363_v63, %v1388_v2 }
 0x1a9   : > { %v1267_v36 = vpop.f32.mrf.mxu2  ;;  %v1506_v54 = vmax.f32 %v1362_v45, %v1387_v48 }
 0x1aa   : > { %v1535_v38 = vpack.c.bf16 %v1502_v33, %v1502_v33  ;;  %v1268_v40 = vadd.f32 %v2235_v37, %v1267_v36  ;;  %v1332_v41 = vpop.f32.mrf.mxu3 }
 0x1ab   : > { %v1333_v53 = vadd.f32 %v2235_v37, %v1332_v41 }
 0x1ac   : > { %1561 = vst.msk [vmem:[%s2258_s28 + $0x50] sm:$0xf] %vm1540_vm0, %v1535_v38  ;;  %v1411_v44 = vmax.f32 %v1268_v40, 0.0 }
 0x1ad   : > { %v1437_v61 = vmax.f32 %v1333_v53, 0.0 }
 0x1ae   : > { %v1504_v47 = vmax.f32 %v1503_v43, %v1411_v44 }
 0x1b0   : > { %v1505_v49 = vmax.f32 %v1504_v47, %v1436_v46 }
 0x1b1   : > { %v1270_v51 = vpop.f32.mrf.mxu2 }
 0x1b2   : > { %v1536_v52 = vpack.c.bf16 %v1505_v49, %v1505_v49  ;;  %v1271_v55 = vadd.f32 %v2235_v37, %v1270_v51  ;;  %v1335_v56 = vpop.f32.mrf.mxu3 }
 0x1b3   : > { %v1336_v4 = vadd.f32 %v2235_v37, %v1335_v56 }
 0x1b4   : > { %1562 = vst.msk [vmem:[%s2258_s28 + $0x54] sm:$0xf] %vm1540_vm0, %v1536_v52  ;;  %v1412_v59 = vmax.f32 %v1271_v55, 0.0 }
 0x1b5   : > { %v1438_v10 = vmax.f32 %v1336_v4, 0.0 }
 0x1b6   : > { %v1507_v62 = vmax.f32 %v1506_v54, %v1412_v59 }
 0x1b8   : > { %v1508_v0 = vmax.f32 %v1507_v62, %v1437_v61 }
 0x1b9   : > { %v1272_v1 = vpop.f32.mrf.mxu2 }
 0x1ba   : > { %v1537_v3 = vpack.c.bf16 %v1508_v0, %v1508_v0  ;;  %v1273_v5 = vadd.f32 %v2235_v37, %v1272_v1  ;;  %v1337_v6 = vpop.f32.mrf.mxu3 }
 0x1bb   : > { %v1338_v7 = vadd.f32 %v2235_v37, %v1337_v6 }
 0x1bc   : > { %1563 = vst.msk [vmem:[%s2258_s28 + $0x58] sm:$0xf] %vm1540_vm0, %v1537_v3  ;;  %v1413_v34 = vmax.f32 %v1273_v5, 0.0 }
 0x1bd   : > { %v1439_v9 = vmax.f32 %v1338_v7, 0.0 }
 0x1be   : > { %v1510_v11 = vmax.f32 %v1509_v8, %v1413_v34 }
 0x1bf   : > { %v1514_v12 = vmax.f32 %v2248_v58, %v1439_v9 }
 0x1c0   : > { %v1511_v13 = vmax.f32 %v1510_v11, %v1438_v10 }
 0x1c1   : > { %v1539_v14 = vpack.c.bf16 %v1514_v12, %v1514_v12 }
 0x1c2   : > { %v1538_v15 = vpack.c.bf16 %v1511_v13, %v1511_v13 }
 0x1c3   : > { %1565 = vst.msk [vmem:[%s2258_s28 + $0x60] sm:$0xf] %vm1540_vm0, %v1539_v14 }
 0x1c4   : > { %1564 = vst.msk [vmem:[%s2258_s28 + $0x5c] sm:$0xf] %vm1540_vm0, %v1538_v15 }
 0x1c5 PF: > { %p10_p9 = scmp.ge.s32.totalorder %s2040_s16, 4   ;;  %s2426_s12 = smov %s1997_s13 }
 0x1c6   : > { %s2427_s13 = smov %s2049_s19  ;;  %s2428_s14 = smov %s2040_s16 }
 0x1c7   :  { %12 = sbr.rel (!%p10_p9) target bundleno = 2 (0x2), region = 108 }

// kernel: net_forward.3
= control target key start
LH: loop header
LB: loop body
LE: loop exit
PB: predicated region body
PF: predicated region fallthrough
CT: control target
= control target key end

     0   :  { %s10250_s0 = inlined_call_operand.vmem [shape: bf16[4,64,256], index: 0, kind: input, shape index: {}]   ;;  %s10251_s1 = inlined_call_operand.vmem [shape: bf16[256,128], index: 1, kind: input, shape index: {}]   ;;  %s10252_s2 = inlined_call_operand.vmem [shape: f32[1,128], index: 2, kind: input, shape index: {}]   ;;  %s10253_s3 = inlined_call_operand.vmem [shape: bf16[25,128,256], index: 3, kind: input, shape index: {}]   ;;  %s10254_s4 = inlined_call_operand.vmem [shape: f32[1,256], index: 4, kind: input, shape index: {}]   ;;  %s10255_s5 = inlined_call_operand.vmem [shape: bf16[256,128], index: 5, kind: input, shape index: {}]   ;;  %s10256_s6 = inlined_call_operand.vmem [shape: f32[1,128], index: 6, kind: input, shape index: {}]   ;;  %s10257_s7 = inlined_call_operand.vmem [shape: bf16[128,128], index: 7, kind: input, shape index: {}]   ;;  %s10258_s8 = inlined_call_operand.vmem [shape: f32[1,128], index: 8, kind: input, shape index: {}]   ;;  %s10259_s9 = inlined_call_operand.hbm [shape: f32[2,128], index: 9, kind: output, shape index: {}]  }
   0x1   :  { %v6583_v0 = vld [vmem:[%s10251_s1 + $0x38] sm:$0xff]  ;;  %v6582_v2 = vld [vmem:[%s10251_s1 + $0x30] sm:$0xff]  ;;  %v6581_v4 = vld [vmem:[%s10251_s1 + $0x28] sm:$0xff] }
   0x2   :  { %v6591_v1 = vld [vmem:[%s10251_s1 + $0x78] sm:$0xff]  ;;  %357 = vmatpush.bf16.msra.mxu0 %v6583_v0  ;;  %v6590_v3 = vld [vmem:[%s10251_s1 + $0x70] sm:$0xff]  ;;  %v6589_v5 = vld [vmem:[%s10251_s1 + $0x68] sm:$0xff] }
   0x3   :  { %446 = vmatpush.bf16.msra.mxu1 %v6591_v1 }
   0x6   :  { %358 = vmatpush.bf16.msra.mxu0 %v6582_v2 }
   0x7   :  { %447 = vmatpush.bf16.msra.mxu1 %v6590_v3 }
   0x8   :  { %14 = vsyncpa [#allocation4], 0  ;;  %v6580_v6 = vld [vmem:[%s10251_s1 + $0x20] sm:$0xff]  ;;  %v6579_v8 = vld [vmem:[%s10251_s1 + $0x18] sm:$0xff]  ;;  %vm651_vm0 = vcmask 1041409   ;;  %s7069_s29 = smov [#allocation3]  }
   0x9   :  { %v6588_v7 = vld [vmem:[%s10251_s1 + $0x60] sm:$0xff]  ;;  %v6587_v9 = vld [vmem:[%s10251_s1 + $0x58] sm:$0xff]  ;;  %v6578_v10 = vld [vmem:[%s10251_s1 + $0x10] sm:$0xff]  ;;  %s4237_s11 = sshll.u32 %s10259_s9, 4  ;;  %s4238_s11 = int_to_ptr.hbm [resolvable:$true] %s4237_s11 }
   0xa   :  { %359 = vmatpush.bf16.msra.mxu0 %v6581_v4  ;;  %v6586_v11 = vld [vmem:[%s10251_s1 + $0x50] sm:$0xff]  ;;  %v6577_v12 = vld [vmem:[%s10251_s1 + $0x8] sm:$0xff]  ;;  %v6576_v14 = vld [vmem:[%s10251_s1] sm:$0xff] }
   0xb   :  { %448 = vmatpush.bf16.msra.mxu1 %v6589_v5  ;;  %v6585_v13 = vld [vmem:[%s10251_s1 + $0x48] sm:$0xff]  ;;  %v6584_v15 = vld [vmem:[%s10251_s1 + $0x40] sm:$0xff]  ;;  %v4256_v22 = vld [vmem:[%s10250_s0 + $0x10] sm:$0xf] }
   0xc   :  { %v4248_v16 = vld [vmem:[%s10250_s0] sm:$0xf]  ;;  %v6545_v17 = vld [vmem:[%s10250_s0 + $0x4] sm:$0xf0]  ;;  %v6544_v18 = vld [vmem:[%s10250_s0 + $0x4] sm:$0xf] }
   0xd   :  { %v4250_v19 = vld [vmem:[%s10250_s0 + $0x8] sm:$0xf0]  ;;  %v4249_v20 = vor.u32 %v6545_v17, %v4248_v16  ;;  %v6547_v23 = vld [vmem:[%s10250_s0 + $0x14] sm:$0xf0]  ;;  %v6546_v24 = vld [vmem:[%s10250_s0 + $0x14] sm:$0xf] }
   0xe   :  { %360 = vmatpush.bf16.msra.mxu0 %v6580_v6  ;;  %v4253_v21 = vor.u32 %v6544_v18, %v4250_v19  ;;  %v4258_v25 = vld [vmem:[%s10250_s0 + $0x18] sm:$0xf0]  ;;  %v4257_v26 = vor.u32 %v6547_v23, %v4256_v22  ;;  %v4264_v28 = vld [vmem:[%s10250_s0 + $0x20] sm:$0xf]  ;;  %v6549_v29 = vld [vmem:[%s10250_s0 + $0x24] sm:$0xf0] }
   0xf   :  { %449 = vmatpush.bf16.msra.mxu1 %v6588_v7  ;;  %v4261_v27 = vor.u32 %v6546_v24, %v4258_v25  ;;  %v6548_v30 = vld [vmem:[%s10250_s0 + $0x24] sm:$0xf]  ;;  %v4266_v31 = vld [vmem:[%s10250_s0 + $0x28] sm:$0xf0]  ;;  %v4265_v32 = vor.u32 %v6549_v29, %v4264_v28  ;;  %v4272_v34 = vld [vmem:[%s10250_s0 + $0x30] sm:$0xf] }
  0x10   :  { %v4269_v33 = vor.u32 %v6548_v30, %v4266_v31  ;;  %v6551_v35 = vld [vmem:[%s10250_s0 + $0x34] sm:$0xf0]  ;;  %v6550_v36 = vld [vmem:[%s10250_s0 + $0x34] sm:$0xf]  ;;  %v4274_v37 = vld [vmem:[%s10250_s0 + $0x38] sm:$0xf0] }
  0x11   :  { %v4273_v38 = vor.u32 %v6551_v35, %v4272_v34  ;;  %v4277_v39 = vor.u32 %v6550_v36, %v4274_v37  ;;  %v4280_v40 = vld [vmem:[%s10250_s0 + $0x40] sm:$0xf]  ;;  %v6553_v41 = vld [vmem:[%s10250_s0 + $0x44] sm:$0xf0]  ;;  %v6552_v42 = vld [vmem:[%s10250_s0 + $0x44] sm:$0xf] }
  0x12   :  { %361 = vmatpush.bf16.msra.mxu0 %v6579_v8  ;;  %v4282_v43 = vld [vmem:[%s10250_s0 + $0x48] sm:$0xf0]  ;;  %v4281_v44 = vor.u32 %v6553_v41, %v4280_v40  ;;  %v4288_v46 = vld [vmem:[%s10250_s0 + $0x50] sm:$0xf]  ;;  %v6555_v47 = vld [vmem:[%s10250_s0 + $0x54] sm:$0xf0] }
  0x13   :  { %450 = vmatpush.bf16.msra.mxu1 %v6587_v9  ;;  %v4285_v45 = vor.u32 %v6552_v42, %v4282_v43  ;;  %v6554_v48 = vld [vmem:[%s10250_s0 + $0x54] sm:$0xf]  ;;  %v4290_v49 = vld [vmem:[%s10250_s0 + $0x58] sm:$0xf0]  ;;  %v4289_v50 = vor.u32 %v6555_v47, %v4288_v46  ;;  %v4296_v52 = vld [vmem:[%s10250_s0 + $0x60] sm:$0xf] }
  0x14   :  { %v4293_v51 = vor.u32 %v6554_v48, %v4290_v49  ;;  %v6557_v53 = vld [vmem:[%s10250_s0 + $0x64] sm:$0xf0]  ;;  %v6556_v54 = vld [vmem:[%s10250_s0 + $0x64] sm:$0xf]  ;;  %v4298_v55 = vld [vmem:[%s10250_s0 + $0x68] sm:$0xf0] }
  0x15   :  { %v4297_v56 = vor.u32 %v6557_v53, %v4296_v52  ;;  %v4301_v57 = vor.u32 %v6556_v54, %v4298_v55  ;;  %v4304_v58 = vld [vmem:[%s10250_s0 + $0x70] sm:$0xf]  ;;  %v6559_v59 = vld [vmem:[%s10250_s0 + $0x74] sm:$0xf0]  ;;  %v6558_v60 = vld [vmem:[%s10250_s0 + $0x74] sm:$0xf] }
  0x16   :  { %362 = vmatpush.bf16.msra.mxu0 %v6578_v10  ;;  %v4306_v61 = vld [vmem:[%s10250_s0 + $0x78] sm:$0xf0]  ;;  %v4305_v62 = vor.u32 %v6559_v59, %v4304_v58  ;;  %v4312_v0 = vld [vmem:[%s10250_s0 + $0x80] sm:$0xf]  ;;  %v6561_v1 = vld [vmem:[%s10250_s0 + $0x84] sm:$0xf0] }
  0x17   :  { %451 = vmatpush.bf16.msra.mxu1 %v6586_v11  ;;  %v4309_v63 = vor.u32 %v6558_v60, %v4306_v61  ;;  %v6560_v2 = vld [vmem:[%s10250_s0 + $0x84] sm:$0xf]  ;;  %v4314_v3 = vld [vmem:[%s10250_s0 + $0x88] sm:$0xf0]  ;;  %v7279_v4 = vld [vmem:[%s10252_s2] ss:$0 sm:$0xff]  ;;  %v4313_v5 = vor.u32 %v6561_v1, %v4312_v0 }
  0x18   :  { %v4317_v6 = vor.u32 %v6560_v2, %v4314_v3  ;;  %v6563_v16 = vld [vmem:[%s10250_s0 + $0x94] sm:$0xf0]  ;;  %v6562_v17 = vld [vmem:[%s10250_s0 + $0x94] sm:$0xf]  ;;  %v4322_v18 = vld [vmem:[%s10250_s0 + $0x98] sm:$0xf0] }
  0x19   :  { %v4328_v29 = vld [vmem:[%s10250_s0 + $0xa0] sm:$0xf]  ;;  %v6565_v30 = vld [vmem:[%s10250_s0 + $0xa4] sm:$0xf0]  ;;  %v6564_v31 = vld [vmem:[%s10250_s0 + $0xa4] sm:$0xf] }
  0x1a   :  { %363 = vmatpush.bf16.msra.mxu0 %v6577_v12  ;;  %v4336_v43 = vld [vmem:[%s10250_s0 + $0xb0] sm:$0xf]  ;;  %v4338_v46 = vld [vmem:[%s10250_s0 + $0xb8] sm:$0xf0]  ;;  %v6569_v58 = vld [vmem:[%s10250_s0 + $0xc4] sm:$0xf0] }
  0x1b   :  { %452 = vmatpush.bf16.msra.mxu1 %v6585_v13  ;;  %v6568_v59 = vld [vmem:[%s10250_s0 + $0xc4] sm:$0xf]  ;;  %v4346_v60 = vld [vmem:[%s10250_s0 + $0xc8] sm:$0xf0] }
  0x1e   :  { %364 = vmatpush.bf16.msra.mxu0 %v6576_v14 }
  0x1f   :  { %453 = vmatpush.bf16.msra.mxu1 %v6584_v15  ;;  %v4320_v15 = vld [vmem:[%s10250_s0 + $0x90] sm:$0xf] }
  0x20   :  { %v4321_v19 = vor.u32 %v6563_v16, %v4320_v15 }
  0x21   :  { %365 = vmatmul.bf16.vlgmr.msra.gmra.mxu0 %v4249_v20  ;;  %v4325_v20 = vor.u32 %v6562_v17, %v4322_v18 }
  0x22   :  { %454 = vmatmul.bf16.vlgmr.msra.gmra.mxu1 %v4253_v21 }
  0x31   :  { %370 = vmatmul.bf16.gmra.mxu0 %v4257_v26 }
  0x32   :  { %459 = vmatmul.bf16.gmra.mxu1 %v4261_v27 }
  0x41   :  { %375 = vmatmul.bf16.gmra.mxu0 %v4265_v32  ;;  %v4330_v32 = vld [vmem:[%s10250_s0 + $0xa8] sm:$0xf0] }
  0x42   :  { %464 = vmatmul.bf16.gmra.mxu1 %v4269_v33  ;;  %v4329_v33 = vor.u32 %v6565_v30, %v4328_v29  ;;  %v4333_v34 = vor.u32 %v6564_v31, %v4330_v32  ;;  %v6572_v29 = vld [vmem:[%s10250_s0 + $0xe4] sm:$0xf] }
  0x51   :  { %380 = vmatmul.bf16.gmra.mxu0 %v4273_v38 }
  0x52   :  { %469 = vmatmul.bf16.gmra.mxu1 %v4277_v39 }
  0x61   :  { %385 = vmatmul.bf16.gmra.mxu0 %v4281_v44  ;;  %v6567_v44 = vld [vmem:[%s10250_s0 + $0xb4] sm:$0xf0] }
  0x62   :  { %474 = vmatmul.bf16.gmra.mxu1 %v4285_v45  ;;  %v6566_v45 = vld [vmem:[%s10250_s0 + $0xb4] sm:$0xf]  ;;  %v4337_v47 = vor.u32 %v6567_v44, %v4336_v43  ;;  %v4368_v43 = vld [vmem:[%s10250_s0 + $0xf0] sm:$0xf]  ;;  %v6575_v44 = vld [vmem:[%s10250_s0 + $0xf4] sm:$0xf0] }
  0x63   :  { %v4341_v48 = vor.u32 %v6566_v45, %v4338_v46  ;;  %v6574_v45 = vld [vmem:[%s10250_s0 + $0xf4] sm:$0xf]  ;;  %v4369_v46 = vor.u32 %v6575_v44, %v4368_v43  ;;  %v6620_v43 = vld [vmem:[%s10253_s3 + $0xe4] sm:$0xf] }
  0x71   :  { %390 = vmatmul.bf16.gmra.mxu0 %v4289_v50 }
  0x72   :  { %479 = vmatmul.bf16.gmra.mxu1 %v4293_v51 }
  0x81   :  { %395 = vmatmul.bf16.gmra.mxu0 %v4297_v56 }
  0x82   :  { %484 = vmatmul.bf16.gmra.mxu1 %v4301_v57  ;;  %v4344_v57 = vld [vmem:[%s10250_s0 + $0xc0] sm:$0xf] }
  0x83   :  { %v4345_v61 = vor.u32 %v6569_v58, %v4344_v57 }
  0x91   :  { %400 = vmatmul.bf16.gmra.mxu0 %v4305_v62  ;;  %v4349_v62 = vor.u32 %v6568_v59, %v4346_v60 }
  0x92   :  { %489 = vmatmul.bf16.gmra.mxu1 %v4309_v63 }
  0x9e   :  { %v366_v7 = vpop.f32.mrf.mxu0 }
  0x9f   :  { %v455_v8 = vpop.f32.mrf.mxu1  ;;  %v367_v9 = vadd.f32 %v7279_v4, %v366_v7 }
  0xa1   :  { %v7282_v10 = vadd.f32 %v455_v8, %v367_v9  ;;  %405 = vmatmul.bf16.gmra.mxu0 %v4313_v5  ;;  %v4352_v9 = vld [vmem:[%s10250_s0 + $0xd0] sm:$0xf] }
  0xa2   :  { %494 = vmatmul.bf16.gmra.mxu1 %v4317_v6 }
  0xa3   :  { %v535_v3 = vmax.f32 %v7282_v10, 0.0  ;;  %v4354_v10 = vld [vmem:[%s10250_s0 + $0xd8] sm:$0xf0] }
  0xa6   :  { %v368_v11 = vpop.f32.mrf.mxu0 }
  0xa7   :  { %v457_v12 = vpop.f32.mrf.mxu1  ;;  %v369_v13 = vadd.f32 %v7279_v4, %v368_v11  ;;  %v6571_v11 = vld [vmem:[%s10250_s0 + $0xd4] sm:$0xf0] }
  0xa9   :  { %v7285_v14 = vadd.f32 %v457_v12, %v369_v13  ;;  %v6570_v12 = vld [vmem:[%s10250_s0 + $0xd4] sm:$0xf]  ;;  %v4353_v13 = vor.u32 %v6571_v11, %v4352_v9 }
  0xaa   :  { %v4357_v15 = vor.u32 %v6570_v12, %v4354_v10 }
  0xae   :  { %v371_v21 = vpop.f32.mrf.mxu0 }
  0xaf   :  { %v460_v22 = vpop.f32.mrf.mxu1  ;;  %v372_v23 = vadd.f32 %v7279_v4, %v371_v21 }
  0xb1   :  { %v7300_v24 = vadd.f32 %v460_v22, %v372_v23  ;;  %410 = vmatmul.bf16.gmra.mxu0 %v4321_v19 }
  0xb2   :  { %499 = vmatmul.bf16.gmra.mxu1 %v4325_v20 }
  0xb3   :  { %v537_v20 = vmax.f32 %v7300_v24, 0.0  ;;  %v4362_v24 = vld [vmem:[%s10250_s0 + $0xe8] sm:$0xf0] }
  0xb4   :  { %v4365_v31 = vor.u32 %v6572_v29, %v4362_v24  ;;  %v5146_v24 = vld [vmem:[%s10253_s3 + $0x470] sm:$0xf] }
  0xb6   :  { %v373_v25 = vpop.f32.mrf.mxu0 }
  0xb7   :  { %v462_v26 = vpop.f32.mrf.mxu1  ;;  %v374_v27 = vadd.f32 %v7279_v4, %v373_v25 }
  0xb9   :  { %v7303_v28 = vadd.f32 %v462_v26, %v374_v27  ;;  %v4360_v26 = vld [vmem:[%s10250_s0 + $0xe0] sm:$0xf]  ;;  %v6573_v27 = vld [vmem:[%s10250_s0 + $0xe4] sm:$0xf0] }
  0xba   :  { %v4361_v30 = vor.u32 %v6573_v27, %v4360_v26  ;;  %v4516_v26 = vld [vmem:[%s10253_s3 + $0xf8] sm:$0xf0] }
  0xbe   :  { %v376_v35 = vpop.f32.mrf.mxu0 }
  0xbf   :  { %v465_v36 = vpop.f32.mrf.mxu1  ;;  %v377_v37 = vadd.f32 %v7279_v4, %v376_v35 }
  0xc1   :  { %v7318_v38 = vadd.f32 %v465_v36, %v377_v37  ;;  %415 = vmatmul.bf16.gmra.mxu0 %v4329_v33 }
  0xc2   :  { %504 = vmatmul.bf16.gmra.mxu1 %v4333_v34 }
  0xc3   :  { %v539_v36 = vmax.f32 %v7318_v38, 0.0  ;;  %v4370_v38 = vld [vmem:[%s10250_s0 + $0xf8] sm:$0xf0] }
  0xc6   :  { %v378_v39 = vpop.f32.mrf.mxu0 }
  0xc7   :  { %v467_v40 = vpop.f32.mrf.mxu1  ;;  %v379_v41 = vadd.f32 %v7279_v4, %v378_v39 }
  0xc9   :  { %v7321_v42 = vadd.f32 %v467_v40, %v379_v41 }
  0xce   :  { %v381_v49 = vpop.f32.mrf.mxu0 }
  0xcf   :  { %v470_v50 = vpop.f32.mrf.mxu1  ;;  %v382_v51 = vadd.f32 %v7279_v4, %v381_v49 }
  0xd1   :  { %v7336_v52 = vadd.f32 %v470_v50, %v382_v51  ;;  %420 = vmatmul.bf16.gmra.mxu0 %v4337_v47  ;;  %v4373_v47 = vor.u32 %v6574_v45, %v4370_v38  ;;  %v4508_v45 = vld [vmem:[%s10253_s3 + $0xe8] sm:$0xf0] }
  0xd2   :  { %509 = vmatmul.bf16.gmra.mxu1 %v4341_v48  ;;  %v4511_v38 = vor.u32 %v6620_v43, %v4508_v45  ;;  %v4484_v45 = vld [vmem:[%s10253_s3 + $0xb8] sm:$0xf0] }
  0xd6   :  { %v383_v53 = vpop.f32.mrf.mxu0 }
  0xd7   :  { %v472_v54 = vpop.f32.mrf.mxu1  ;;  %v384_v55 = vadd.f32 %v7279_v4, %v383_v53  ;;  %v541_v53 = vmax.f32 %v7336_v52, 0.0 }
  0xd9   :  { %v7339_v56 = vadd.f32 %v472_v54, %v384_v55 }
  0xde   :  { %v386_v63 = vpop.f32.mrf.mxu0 }
  0xdf   :  { %v475_v0 = vpop.f32.mrf.mxu1  ;;  %v387_v1 = vadd.f32 %v7279_v4, %v386_v63 }
  0xe1   :  { %v476_v2 = vadd.f32 %v475_v0, %v387_v1  ;;  %425 = vmatmul.bf16.gmra.mxu0 %v4345_v61 }
  0xe2   :  { %514 = vmatmul.bf16.gmra.mxu1 %v4349_v62 }
  0xe3   :  { %v543_v5 = vmax.f32 %v476_v2, 0.0 }
  0xe5   :  { %v567_v6 = vmax.f32 %v535_v3, %v543_v5 }
  0xe6   :  { %v7355_v7 = vpop.f32.mrf.mxu0 }
  0xe7   :  { %v7357_v8 = vpop.f32.mrf.mxu1 }
  0xee   :  { %v391_v16 = vpop.f32.mrf.mxu0 }
  0xef   :  { %v480_v17 = vpop.f32.mrf.mxu1  ;;  %v392_v18 = vadd.f32 %v7279_v4, %v391_v16 }
  0xf1   :  { %v481_v19 = vadd.f32 %v480_v17, %v392_v18  ;;  %430 = vmatmul.bf16.gmra.mxu0 %v4353_v13 }
  0xf2   :  { %519 = vmatmul.bf16.gmra.mxu1 %v4357_v15 }
  0xf3   :  { %v545_v21 = vmax.f32 %v481_v19, 0.0  ;;  %v4514_v19 = vld [vmem:[%s10253_s3 + $0xf0] sm:$0xf] }
  0xf5   :  { %v573_v22 = vmax.f32 %v537_v20, %v545_v21  ;;  %v6623_v20 = vld [vmem:[%s10253_s3 + $0xf4] sm:$0xf0] }
  0xf6   :  { %v7373_v23 = vpop.f32.mrf.mxu0  ;;  %v4515_v21 = vor.u32 %v6623_v20, %v4514_v19  ;;  %v6616_v19 = vld [vmem:[%s10253_s3 + $0xc4] sm:$0xf] }
  0xf7   :  { %v7375_v25 = vpop.f32.mrf.mxu1 }
  0xf8   :  { %735 = vmatpush.bf16.msra.mxu2 %v4515_v21  ;;  %v4492_v21 = vld [vmem:[%s10253_s3 + $0xc8] sm:$0xf0] }
  0xfe   :  { %v396_v32 = vpop.f32.mrf.mxu0 }
  0xff   :  { %v485_v33 = vpop.f32.mrf.mxu1  ;;  %v397_v34 = vadd.f32 %v7279_v4, %v396_v32 }
 0x101   :  { %v486_v35 = vadd.f32 %v485_v33, %v397_v34  ;;  %435 = vmatmul.bf16.gmra.mxu0 %v4361_v30  ;;  %v6735_v30 = vld [vmem:[%s10253_s3 + $0x474] sm:$0xf0] }
 0x102   :  { %524 = vmatmul.bf16.gmra.mxu1 %v4365_v31  ;;  %v6734_v31 = vld [vmem:[%s10253_s3 + $0x474] sm:$0xf]  ;;  %v5147_v34 = vor.u32 %v6735_v30, %v5146_v24  ;;  %v6729_v24 = vld [vmem:[%s10253_s3 + $0x444] sm:$0xf0]  ;;  %v6728_v30 = vld [vmem:[%s10253_s3 + $0x444] sm:$0xf] }
 0x103   :  { %v547_v37 = vmax.f32 %v486_v35, 0.0  ;;  %v5148_v35 = vld [vmem:[%s10253_s3 + $0x478] sm:$0xf0] }
 0x104   :  { %1792 = vmatpush.bf16.msrb.mxu0 %v5147_v34  ;;  %v5124_v34 = vld [vmem:[%s10253_s3 + $0x448] sm:$0xf0] }
 0x105   :  { %v579_v39 = vmax.f32 %v539_v36, %v547_v37  ;;  %v5151_v36 = vor.u32 %v6734_v31, %v5148_v35  ;;  %v4506_v37 = vld [vmem:[%s10253_s3 + $0xe0] sm:$0xf] }
 0x106   :  { %v7391_v40 = vpop.f32.mrf.mxu0 }
 0x107   :  { %v7393_v41 = vpop.f32.mrf.mxu1  ;;  %1805 = vmatpush.bf16.msrb.mxu1 %v5151_v36  ;;  %v5127_v36 = vor.u32 %v6728_v30, %v5124_v34  ;;  %v5100_v34 = vld [vmem:[%s10253_s3 + $0x418] sm:$0xf0] }
 0x10e   :  { %v401_v48 = vpop.f32.mrf.mxu0 }
 0x10f   :  { %v490_v49 = vpop.f32.mrf.mxu1  ;;  %v402_v50 = vadd.f32 %v7279_v4, %v401_v48  ;;  %v6732_v48 = vld [vmem:[%s10253_s3 + $0x464] sm:$0xf] }
 0x111   :  { %v491_v51 = vadd.f32 %v490_v49, %v402_v50  ;;  %440 = vmatmul.bf16.gmra.mxu0 %v4369_v46  ;;  %v5138_v46 = vld [vmem:[%s10253_s3 + $0x460] sm:$0xf]  ;;  %v5140_v50 = vld [vmem:[%s10253_s3 + $0x468] sm:$0xf0] }
 0x112   :  { %529 = vmatmul.bf16.gmra.mxu1 %v4373_v47  ;;  %v6733_v47 = vld [vmem:[%s10253_s3 + $0x464] sm:$0xf0] }
 0x113   :  { %v549_v54 = vmax.f32 %v491_v51, 0.0  ;;  %v5139_v49 = vor.u32 %v6733_v47, %v5138_v46  ;;  %v5143_v51 = vor.u32 %v6732_v48, %v5140_v50  ;;  %v5114_v47 = vld [vmem:[%s10253_s3 + $0x430] sm:$0xf]  ;;  %v6727_v48 = vld [vmem:[%s10253_s3 + $0x434] sm:$0xf0] }
 0x115   :  { %v7409_v55 = vmax.f32 %v541_v53, %v549_v54  ;;  %v4498_v53 = vld [vmem:[%s10253_s3 + $0xd0] sm:$0xf]  ;;  %v6619_v54 = vld [vmem:[%s10253_s3 + $0xd4] sm:$0xf0]  ;;  %1793 = vmatpush.bf16.msrb.mxu0 %v5139_v49  ;;  %1806 = vmatpush.bf16.msrb.mxu1 %v5143_v51  ;;  %v6726_v49 = vld [vmem:[%s10253_s3 + $0x434] sm:$0xf] }
 0x116   :  { %v7411_v57 = vpop.f32.mrf.mxu0 }
 0x117   :  { %v7413_v58 = vpop.f32.mrf.mxu1 }
 0x11e   :  { %v406_v59 = vpop.f32.mrf.mxu0 }
 0x11f   :  { %v495_v60 = vpop.f32.mrf.mxu1  ;;  %v407_v61 = vadd.f32 %v7279_v4, %v406_v59  ;;  %v4499_v59 = vor.u32 %v6619_v54, %v4498_v53  ;;  %v5116_v53 = vld [vmem:[%s10253_s3 + $0x438] sm:$0xf0] }
 0x120   :  { %v5119_v54 = vor.u32 %v6726_v49, %v5116_v53  ;;  %v4580_v53 = vld [vmem:[%s10253_s3 + $0x78] sm:$0xf0] }
 0x121   :  { %v496_v62 = vadd.f32 %v495_v60, %v407_v61  ;;  %v6618_v60 = vld [vmem:[%s10253_s3 + $0xd4] sm:$0xf]  ;;  %v4500_v61 = vld [vmem:[%s10253_s3 + $0xd8] sm:$0xf0] }
 0x123   :  { %v551_v63 = vmax.f32 %v496_v62, 0.0  ;;  %v4503_v62 = vor.u32 %v6618_v60, %v4500_v61  ;;  %v6613_v60 = vld [vmem:[%s10253_s3 + $0xa4] sm:$0xf0]  ;;  %v6612_v61 = vld [vmem:[%s10253_s3 + $0xa4] sm:$0xf] }
 0x125   :  { %v7416_v0 = vmax.f32 %v567_v6, %v551_v63  ;;  %v5130_v63 = vld [vmem:[%s10253_s3 + $0x450] sm:$0xf] }
 0x126   :  { %v7418_v1 = vpop.f32.mrf.mxu0 }
 0x127   :  { %v7420_v2 = vpop.f32.mrf.mxu1 }
 0x12e   :  { %v411_v52 = vpop.f32.mrf.mxu0 }
 0x12f   :  { %v500_v3 = vpop.f32.mrf.mxu1  ;;  %v412_v5 = vadd.f32 %v7279_v4, %v411_v52  ;;  %v6731_v52 = vld [vmem:[%s10253_s3 + $0x454] sm:$0xf0] }
 0x131   :  { %v501_v9 = vadd.f32 %v500_v3, %v412_v5  ;;  %v6730_v3 = vld [vmem:[%s10253_s3 + $0x454] sm:$0xf] }
 0x133   :  { %v553_v11 = vmax.f32 %v501_v9, 0.0 }
 0x135   :  { %v7423_v12 = vmax.f32 %v573_v22, %v553_v11  ;;  %v6622_v22 = vld [vmem:[%s10253_s3 + $0xf4] sm:$0xf]  ;;  %v5131_v11 = vor.u32 %v6731_v52, %v5130_v63  ;;  %v4476_v63 = vld [vmem:[%s10253_s3 + $0xa8] sm:$0xf0] }
 0x136   :  { %v7425_v10 = vpop.f32.mrf.mxu0  ;;  %v4519_v29 = vor.u32 %v6622_v22, %v4516_v26  ;;  %v4495_v26 = vor.u32 %v6616_v19, %v4492_v21  ;;  %v4479_v52 = vor.u32 %v6612_v61, %v4476_v63  ;;  %v6720_v61 = vld [vmem:[%s10253_s3 + $0x404] sm:$0xf] }
 0x137   :  { %v7427_v13 = vpop.f32.mrf.mxu1  ;;  %1794 = vmatpush.bf16.msrb.mxu0 %v5131_v11 }
 0x138   :  { %748 = vmatpush.bf16.msra.mxu3 %v4519_v29  ;;  %v5122_v29 = vld [vmem:[%s10253_s3 + $0x440] sm:$0xf] }
 0x139   :  { %v5123_v31 = vor.u32 %v6729_v24, %v5122_v29  ;;  %v6722_v29 = vld [vmem:[%s10253_s3 + $0x414] sm:$0xf] }
 0x13b   :  { %1795 = vmatpush.bf16.msrb.mxu0 %v5123_v31 }
 0x13c   :  { %749 = vmatpush.bf16.msra.mxu3 %v4511_v38 }
 0x13e   :  { %v416_v15 = vpop.f32.mrf.mxu0 }
 0x13f   :  { %v505_v16 = vpop.f32.mrf.mxu1  ;;  %v417_v6 = vadd.f32 %v7279_v4, %v416_v15  ;;  %v5132_v15 = vld [vmem:[%s10253_s3 + $0x458] sm:$0xf0] }
 0x140   :  { %750 = vmatpush.bf16.msra.mxu3 %v4503_v62 }
 0x141   :  { %v506_v17 = vadd.f32 %v505_v16, %v417_v6  ;;  %v5135_v6 = vor.u32 %v6730_v3, %v5132_v15  ;;  %v5106_v3 = vld [vmem:[%s10253_s3 + $0x420] sm:$0xf]  ;;  %v5108_v15 = vld [vmem:[%s10253_s3 + $0x428] sm:$0xf0] }
 0x143   :  { %v555_v18 = vmax.f32 %v506_v17, 0.0  ;;  %v4490_v17 = vld [vmem:[%s10253_s3 + $0xc0] sm:$0xf]  ;;  %1807 = vmatpush.bf16.msrb.mxu1 %v5135_v6 }
 0x144   :  { %751 = vmatpush.bf16.msra.mxu3 %v4495_v26  ;;  %v6723_v26 = vld [vmem:[%s10253_s3 + $0x414] sm:$0xf0] }
 0x145   :  { %v7442_v27 = vmax.f32 %v579_v39, %v555_v18  ;;  %v6621_v39 = vld [vmem:[%s10253_s3 + $0xe4] sm:$0xf0] }
 0x146   :  { %v7453_v32 = vpop.f32.mrf.mxu0  ;;  %v4507_v44 = vor.u32 %v6621_v39, %v4506_v37  ;;  %v6617_v18 = vld [vmem:[%s10253_s3 + $0xc4] sm:$0xf0]  ;;  %v4482_v37 = vld [vmem:[%s10253_s3 + $0xb0] sm:$0xf]  ;;  %v6615_v39 = vld [vmem:[%s10253_s3 + $0xb4] sm:$0xf0] }
 0x147   :  { %v7455_v33 = vpop.f32.mrf.mxu1  ;;  %v4491_v20 = vor.u32 %v6617_v18, %v4490_v17  ;;  %v4483_v43 = vor.u32 %v6615_v39, %v4482_v37  ;;  %1808 = vmatpush.bf16.msrb.mxu1 %v5127_v36  ;;  %v4466_v17 = vld [vmem:[%s10253_s3 + $0x90] sm:$0xf]  ;;  %v6611_v18 = vld [vmem:[%s10253_s3 + $0x94] sm:$0xf0]  ;;  %v409_v36 = vadd.f32 %v7279_v4, %v7418_v1  ;;  %v5103_v37 = vor.u32 %v6722_v29, %v5100_v34  ;;  %v4458_v39 = vld [vmem:[%s10253_s3 + $0x80] sm:$0xf] }
 0x148   :  { %736 = vmatpush.bf16.msra.mxu2 %v4507_v44  ;;  %v6614_v44 = vld [vmem:[%s10253_s3 + $0xb4] sm:$0xf]  ;;  %v4467_v19 = vor.u32 %v6611_v18, %v4466_v17  ;;  %v4460_v1 = vld [vmem:[%s10253_s3 + $0x88] sm:$0xf0]  ;;  %v536_v34 = vmax.f32 %v7285_v14, 0.0 }
 0x149   :  { %v4487_v46 = vor.u32 %v6614_v44, %v4484_v45  ;;  %v6608_v44 = vld [vmem:[%s10253_s3 + $0x84] sm:$0xf]  ;;  %v4578_v45 = vld [vmem:[%s10253_s3 + $0x70] sm:$0xf]  ;;  %v6603_v14 = vld [vmem:[%s10253_s3 + $0x54] sm:$0xf0] }
 0x14b   :  { %752 = vmatpush.bf16.msra.mxu3 %v4487_v46  ;;  %1809 = vmatpush.bf16.msrb.mxu1 %v5119_v54  ;;  %v6607_v46 = vld [vmem:[%s10253_s3 + $0x74] sm:$0xf0]  ;;  %v5090_v54 = vld [vmem:[%s10253_s3 + $0x400] sm:$0xf] }
 0x14c   :  { %737 = vmatpush.bf16.msra.mxu2 %v4499_v59  ;;  %v4474_v59 = vld [vmem:[%s10253_s3 + $0xa0] sm:$0xf]  ;;  %v4579_v49 = vor.u32 %v6607_v46, %v4578_v45 }
 0x14d   :  { %v4475_v62 = vor.u32 %v6613_v60, %v4474_v59  ;;  %v6721_v60 = vld [vmem:[%s10253_s3 + $0x404] sm:$0xf0] }
 0x14e   :  { %v421_v5 = vpop.f32.mrf.mxu0 }
 0x14f   :  { %v510_v9 = vpop.f32.mrf.mxu1  ;;  %v422_v16 = vadd.f32 %v7279_v4, %v421_v5  ;;  %v6725_v5 = vld [vmem:[%s10253_s3 + $0x424] sm:$0xf0]  ;;  %753 = vmatpush.bf16.msra.mxu3 %v4479_v52  ;;  %v498_v52 = vadd.f32 %v7420_v2, %v409_v36  ;;  %v5310_v2 = vld [vmem:[%s10253_s3 + $0x578] sm:$0xf0] }
 0x150   :  { %738 = vmatpush.bf16.msra.mxu2 %v4491_v20  ;;  %v5107_v11 = vor.u32 %v6725_v5, %v5106_v3  ;;  %v6610_v20 = vld [vmem:[%s10253_s3 + $0x94] sm:$0xf]  ;;  %v5091_v3 = vor.u32 %v6721_v60, %v5090_v54 }
 0x151   :  { %v511_v22 = vadd.f32 %v510_v9, %v422_v16  ;;  %v6724_v9 = vld [vmem:[%s10253_s3 + $0x424] sm:$0xf]  ;;  %v389_v16 = vadd.f32 %v7279_v4, %v7355_v7  ;;  %v4468_v7 = vld [vmem:[%s10253_s3 + $0x98] sm:$0xf0]  ;;  %v6762_v54 = vld [vmem:[%s10253_s3 + $0x554] sm:$0xf] }
 0x152   :  { %v5111_v6 = vor.u32 %v6724_v9, %v5108_v15  ;;  %v4471_v21 = vor.u32 %v6610_v20, %v4468_v7  ;;  %v5308_v9 = vld [vmem:[%s10253_s3 + $0x570] sm:$0xf]  ;;  %v6604_v20 = vld [vmem:[%s10253_s3 + $0x64] sm:$0xf]  ;;  %v4572_v7 = vld [vmem:[%s10253_s3 + $0x68] sm:$0xf0] }
 0x153   :  { %v557_v35 = vmax.f32 %v511_v22, 0.0  ;;  %v5098_v22 = vld [vmem:[%s10253_s3 + $0x410] sm:$0xf]  ;;  %v4575_v29 = vor.u32 %v6604_v20, %v4572_v7  ;;  %v414_v20 = vadd.f32 %v7279_v4, %v7425_v10  ;;  %v6598_v10 = vld [vmem:[%s10253_s3 + $0x34] sm:$0xf] }
 0x154   :  { %739 = vmatpush.bf16.msra.mxu2 %v4483_v43  ;;  %1810 = vmatpush.bf16.msrb.mxu1 %v5111_v6  ;;  %v5099_v31 = vor.u32 %v6723_v26, %v5098_v22  ;;  %v6609_v43 = vld [vmem:[%s10253_s3 + $0x84] sm:$0xf0]  ;;  %v4570_v6 = vld [vmem:[%s10253_s3 + $0x60] sm:$0xf] }
 0x155   :  { %v7546_v38 = vmax.f32 %v7409_v55, %v557_v35  ;;  %v5115_v55 = vor.u32 %v6727_v48, %v5114_v47  ;;  %v7615_v35 = vadd.f32 %v7357_v8, %v389_v16  ;;  %754 = vmatpush.bf16.msra.mxu3 %v4471_v21  ;;  %v4459_v8 = vor.u32 %v6609_v43, %v4458_v39  ;;  %v6766_v16 = vld [vmem:[%s10253_s3 + $0x574] sm:$0xf]  ;;  %v5302_v39 = vld [vmem:[%s10253_s3 + $0x568] sm:$0xf0] }
 0x156   :  { %v7557_v50 = vpop.f32.mrf.mxu0  ;;  %v4463_v48 = vor.u32 %v6608_v44, %v4460_v1  ;;  %v5313_v18 = vor.u32 %v6766_v16, %v5310_v2  ;;  %v4562_v44 = vld [vmem:[%s10253_s3 + $0x50] sm:$0xf]  ;;  %v4556_v2 = vld [vmem:[%s10253_s3 + $0x48] sm:$0xf0] }
 0x157   :  { %v7559_v51 = vpop.f32.mrf.mxu1  ;;  %1796 = vmatpush.bf16.msrb.mxu0 %v5115_v55  ;;  %v6606_v55 = vld [vmem:[%s10253_s3 + $0x74] sm:$0xf]  ;;  %v544_v63 = vmax.f32 %v7615_v35, 0.0  ;;  %v552_v35 = vmax.f32 %v498_v52, 0.0  ;;  %v4554_v52 = vld [vmem:[%s10253_s3 + $0x40] sm:$0xf] }
 0x158   :  { %740 = vmatpush.bf16.msra.mxu2 %v4475_v62  ;;  %1811 = vmatpush.bf16.msrb.mxu1 %v5103_v37  ;;  %v4583_v59 = vor.u32 %v6606_v55, %v4580_v53  ;;  %v5092_v62 = vld [vmem:[%s10253_s3 + $0x408] sm:$0xf0]  ;;  %v5292_v55 = vld [vmem:[%s10253_s3 + $0x550] sm:$0xf]  ;;  %v6763_v53 = vld [vmem:[%s10253_s3 + $0x554] sm:$0xf0] }
 0x159   :  { %755 = vmatpush.bf16.msra.mxu3 %v4463_v48  ;;  %v5095_v5 = vor.u32 %v6720_v61, %v5092_v62  ;;  %v570_v1 = vmax.f32 %v536_v34, %v544_v63  ;;  %v4564_v48 = vld [vmem:[%s10253_s3 + $0x58] sm:$0xf0]  ;;  %v5293_v61 = vor.u32 %v6763_v53, %v5292_v55 }
 0x15a   :  { %v5294_v62 = vld [vmem:[%s10253_s3 + $0x558] sm:$0xf0] }
 0x15b   :  { %1797 = vmatpush.bf16.msrb.mxu0 %v5107_v11  ;;  %v6767_v11 = vld [vmem:[%s10253_s3 + $0x574] sm:$0xf0]  ;;  %v5297_v63 = vor.u32 %v6762_v54, %v5294_v62  ;;  %v538_v62 = vmax.f32 %v7303_v28, 0.0 }
 0x15c   :  { %741 = vmatpush.bf16.msra.mxu2 %v4467_v19  ;;  %v5309_v15 = vor.u32 %v6767_v11, %v5308_v9  ;;  %1812 = vmatpush.bf16.msrb.mxu1 %v5095_v5  ;;  %v6605_v19 = vld [vmem:[%s10253_s3 + $0x64] sm:$0xf0]  ;;  %v6600_v5 = vld [vmem:[%s10253_s3 + $0x44] sm:$0xf]  ;;  %v394_v9 = vadd.f32 %v7279_v4, %v7373_v23  ;;  %v6595_v28 = vld [vmem:[%s10253_s3 + $0x14] sm:$0xf0] }
 0x15d   :  { %858 = vmatpush.bf16.msrb.mxu3 %v4583_v59  ;;  %v4571_v26 = vor.u32 %v6605_v19, %v4570_v6  ;;  %v571_v59 = vmax.f32 %v570_v1, %v552_v35  ;;  %v5284_v19 = vld [vmem:[%s10253_s3 + $0x540] sm:$0xf]  ;;  %v6761_v23 = vld [vmem:[%s10253_s3 + $0x544] sm:$0xf0]  ;;  %v4548_v35 = vld [vmem:[%s10253_s3 + $0x38] sm:$0xf0] }
 0x15e   :  { %v426_v24 = vpop.f32.mrf.mxu0  ;;  %v4538_v1 = vld [vmem:[%s10253_s3 + $0x20] sm:$0xf] }
 0x15f   :  { %v515_v30 = vpop.f32.mrf.mxu1  ;;  %1798 = vmatpush.bf16.msrb.mxu0 %v5099_v31  ;;  %v427_v47 = vadd.f32 %v7279_v4, %v426_v24  ;;  %v5300_v24 = vld [vmem:[%s10253_s3 + $0x560] sm:$0xf]  ;;  %v6764_v31 = vld [vmem:[%s10253_s3 + $0x564] sm:$0xf] }
 0x160   :  { %742 = vmatpush.bf16.msra.mxu2 %v4459_v8  ;;  %2074 = vmatpush.bf16.msra.mxu1 %v5313_v18  ;;  %v5305_v43 = vor.u32 %v6764_v31, %v5302_v39  ;;  %v6602_v8 = vld [vmem:[%s10253_s3 + $0x54] sm:$0xf]  ;;  %v4559_v18 = vor.u32 %v6600_v5, %v4556_v2  ;;  %v6759_v39 = vld [vmem:[%s10253_s3 + $0x534] sm:$0xf0]  ;;  %v5270_v5 = vld [vmem:[%s10253_s3 + $0x528] sm:$0xf0] }
 0x161   :  { %v516_v17 = vadd.f32 %v515_v30, %v427_v47  ;;  %v6765_v30 = vld [vmem:[%s10253_s3 + $0x564] sm:$0xf0]  ;;  %859 = vmatpush.bf16.msrb.mxu3 %v4575_v29  ;;  %v4563_v47 = vor.u32 %v6603_v14, %v4562_v44  ;;  %v4546_v29 = vld [vmem:[%s10253_s3 + $0x30] sm:$0xf]  ;;  %v5278_v14 = vld [vmem:[%s10253_s3 + $0x538] sm:$0xf0] }
 0x162   :  { %v5301_v37 = vor.u32 %v6765_v30, %v5300_v24  ;;  %v6599_v24 = vld [vmem:[%s10253_s3 + $0x34] sm:$0xf0]  ;;  %v483_v30 = vadd.f32 %v7375_v25, %v394_v9  ;;  %v6758_v25 = vld [vmem:[%s10253_s3 + $0x534] sm:$0xf] }
 0x163   :  { %1799 = vmatpush.bf16.msrb.mxu0 %v5091_v3  ;;  %v559_v45 = vmax.f32 %v516_v17, 0.0  ;;  %v6601_v3 = vld [vmem:[%s10253_s3 + $0x44] sm:$0xf0]  ;;  %v4547_v34 = vor.u32 %v6599_v24, %v4546_v29  ;;  %v4522_v24 = vld [vmem:[%s10253_s3] sm:$0xf] }
 0x164   :  { %845 = vmatpush.bf16.msrb.mxu2 %v4579_v49  ;;  %v4567_v49 = vor.u32 %v6602_v8, %v4564_v48  ;;  %2075 = vmatpush.bf16.msra.mxu1 %v5305_v43  ;;  %v4555_v16 = vor.u32 %v6601_v3, %v4554_v52  ;;  %v503_v43 = vadd.f32 %v7427_v13, %v414_v20  ;;  %v6596_v13 = vld [vmem:[%s10253_s3 + $0x24] sm:$0xf]  ;;  %v6754_v20 = vld [vmem:[%s10253_s3 + $0x514] sm:$0xf] }
 0x165   :  { %v569_v11 = vmax.f32 %v7416_v0, %v559_v45  ;;  %v6760_v0 = vld [vmem:[%s10253_s3 + $0x544] sm:$0xf]  ;;  %v5281_v8 = vor.u32 %v6758_v25, %v5278_v14  ;;  %v6597_v45 = vld [vmem:[%s10253_s3 + $0x24] sm:$0xf0] }
 0x166   :  { %v428_v21 = vpop.f32.mrf.mxu0  ;;  %860 = vmatpush.bf16.msrb.mxu3 %v4567_v49  ;;  %v4539_v48 = vor.u32 %v6597_v45, %v4538_v1  ;;  %v4540_v49 = vld [vmem:[%s10253_s3 + $0x28] sm:$0xf0] }
 0x167   :  { %v517_v22 = vpop.f32.mrf.mxu1  ;;  %2061 = vmatpush.bf16.msra.mxu0 %v5309_v15  ;;  %v429_v36 = vadd.f32 %v7279_v4, %v428_v21  ;;  %v5285_v21 = vor.u32 %v6761_v23, %v5284_v19  ;;  %v4543_v54 = vor.u32 %v6596_v13, %v4540_v49  ;;  %v5260_v23 = vld [vmem:[%s10253_s3 + $0x510] sm:$0xf] }
 0x168   :  { %846 = vmatpush.bf16.msrb.mxu2 %v4571_v26  ;;  %2076 = vmatpush.bf16.msra.mxu1 %v5297_v63  ;;  %v554_v63 = vmax.f32 %v503_v43, 0.0 }
 0x169   :  { %v518_v46 = vadd.f32 %v517_v22, %v429_v36  ;;  %v5286_v22 = vld [vmem:[%s10253_s3 + $0x548] sm:$0xf0]  ;;  %v4551_v36 = vor.u32 %v6598_v10, %v4548_v35  ;;  %v6593_v10 = vld [vmem:[%s10253_s3 + $0x4] sm:$0xf0] }
 0x16a   :  { %861 = vmatpush.bf16.msrb.mxu3 %v4559_v18  ;;  %v5289_v26 = vor.u32 %v6760_v0, %v5286_v22  ;;  %v4532_v18 = vld [vmem:[%s10253_s3 + $0x18] sm:$0xf0]  ;;  %v6755_v0 = vld [vmem:[%s10253_s3 + $0x514] sm:$0xf0] }
 0x16b   :  { %2062 = vmatpush.bf16.msra.mxu0 %v5301_v37  ;;  %v560_v60 = vmax.f32 %v518_v46, 0.0  ;;  %v5276_v37 = vld [vmem:[%s10253_s3 + $0x530] sm:$0xf]  ;;  %v546_v46 = vmax.f32 %v483_v30, 0.0  ;;  %v5261_v22 = vor.u32 %v6755_v0, %v5260_v23  ;;  %v6592_v30 = vld [vmem:[%s10253_s3 + $0x4] sm:$0xf] }
 0x16c   :  { %847 = vmatpush.bf16.msrb.mxu2 %v4563_v47  ;;  %2077 = vmatpush.bf16.msra.mxu1 %v5289_v26  ;;  %v5277_v44 = vor.u32 %v6759_v39, %v5276_v37  ;;  %v5262_v26 = vld [vmem:[%s10253_s3 + $0x518] sm:$0xf0]  ;;  %v4524_v37 = vld [vmem:[%s10253_s3 + $0x8] sm:$0xf0] }
 0x16d   :  { %v572_v15 = vmax.f32 %v571_v59, %v560_v60  ;;  %v5268_v59 = vld [vmem:[%s10253_s3 + $0x520] sm:$0xf]  ;;  %v6757_v60 = vld [vmem:[%s10253_s3 + $0x524] sm:$0xf0]  ;;  %v5265_v29 = vor.u32 %v6754_v20, %v5262_v26  ;;  %v4527_v43 = vor.u32 %v6592_v30, %v4524_v37  ;;  %v4662_v30 = vld [vmem:[%s10253_s3 + $0x178] sm:$0xf0] }
 0x16e   :  { %v431_v6 = vpop.f32.mrf.mxu0  ;;  %862 = vmatpush.bf16.msrb.mxu3 %v4551_v36  ;;  %v5269_v3 = vor.u32 %v6757_v60, %v5268_v59  ;;  %v4523_v36 = vor.u32 %v6593_v10, %v4522_v24 }
 0x16f   :  { %v520_v17 = vpop.f32.mrf.mxu1  ;;  %2063 = vmatpush.bf16.msra.mxu0 %v5293_v61  ;;  %v7019_v7 = vpack.c.bf16 %v572_v15, %v569_v11  ;;  %v432_v31 = vadd.f32 %v7279_v4, %v431_v6  ;;  %v6756_v61 = vld [vmem:[%s10253_s3 + $0x524] sm:$0xf]  ;;  %v4530_v11 = vld [vmem:[%s10253_s3 + $0x10] sm:$0xf]  ;;  %v6594_v15 = vld [vmem:[%s10253_s3 + $0x14] sm:$0xf] }
 0x170   :  { %848 = vmatpush.bf16.msrb.mxu2 %v4555_v16  ;;  %2078 = vmatpush.bf16.msra.mxu1 %v5281_v8  ;;  %v5273_v9 = vor.u32 %v6756_v61, %v5270_v5  ;;  %v576_v16 = vmax.f32 %v538_v62, %v546_v46  ;;  %v4535_v19 = vor.u32 %v6594_v15, %v4532_v18  ;;  %v6752_v8 = vld [vmem:[%s10253_s3 + $0x504] sm:$0xf] }
 0x171   :  { %7020 = vst [vmem:[#allocation2] sm:$0xff] %v7019_v7   ;;  %v521_v47 = vadd.f32 %v520_v17, %v432_v31  ;;  %v4531_v17 = vor.u32 %v6595_v28, %v4530_v11  ;;  %v399_v31 = vadd.f32 %v7279_v4, %v7391_v40  ;;  %v5252_v40 = vld [vmem:[%s10253_s3 + $0x500] sm:$0xf] }
 0x172   :  { %863 = vmatpush.bf16.msrb.mxu3 %v4543_v54  ;;  %v577_v7 = vmax.f32 %v576_v16, %v554_v63  ;;  %v540_v54 = vmax.f32 %v7321_v42, 0.0 }
 0x173   :  { %2064 = vmatpush.bf16.msra.mxu0 %v5285_v21  ;;  %v561_v2 = vmax.f32 %v521_v47, 0.0  ;;  %v488_v1 = vadd.f32 %v7393_v41, %v399_v31 }
 0x174   :  { %849 = vmatpush.bf16.msrb.mxu2 %v4547_v34  ;;  %2079 = vmatpush.bf16.msra.mxu1 %v5273_v9  ;;  %v424_v9 = vadd.f32 %v7279_v4, %v7557_v50 }
 0x175   :  { %v575_v34 = vmax.f32 %v7423_v12, %v561_v2  ;;  %v6753_v12 = vld [vmem:[%s10253_s3 + $0x504] sm:$0xf0] }
 0x176   :  { %v433_v55 = vpop.f32.mrf.mxu0  ;;  %864 = vmatpush.bf16.msrb.mxu3 %v4535_v19  ;;  %v5253_v13 = vor.u32 %v6753_v12, %v5252_v40  ;;  %v6799_v40 = vld [vmem:[%s10253_s3 + $0x674] sm:$0xf0]  ;;  %v6798_v12 = vld [vmem:[%s10253_s3 + $0x674] sm:$0xf] }
 0x177   :  { %v522_v53 = vpop.f32.mrf.mxu1  ;;  %2065 = vmatpush.bf16.msra.mxu0 %v5277_v44  ;;  %v434_v52 = vadd.f32 %v7279_v4, %v433_v55  ;;  %v419_v44 = vadd.f32 %v7279_v4, %v7453_v32  ;;  %v5254_v32 = vld [vmem:[%s10253_s3 + $0x508] sm:$0xf0] }
 0x178   :  { %850 = vmatpush.bf16.msrb.mxu2 %v4539_v48  ;;  %2080 = vmatpush.bf16.msra.mxu1 %v5265_v29  ;;  %v5257_v46 = vor.u32 %v6752_v8, %v5254_v32  ;;  %v548_v48 = vmax.f32 %v488_v1, 0.0  ;;  %v607_v16 = vld [vmem:[#allocation2] sm:$0x1]  ;;  %v1681_v19 = vld [vmem:[#allocation2 + $0x4] sm:$0x1] }
 0x179   :  { %v523_v6 = vadd.f32 %v522_v53, %v434_v52  ;;  %v508_v47 = vadd.f32 %v7455_v33, %v419_v44  ;;  %v1702_v29 = vunpack.c.l.b16 %v1681_v19  ;;  %v5472_v8 = vld [vmem:[%s10253_s3 + $0x678] sm:$0xf0]  ;;  %v6795_v19 = vld [vmem:[%s10253_s3 + $0x654] sm:$0xf0] }
 0x17a   :  { %865 = vmatpush.bf16.msrb.mxu3 %v4527_v43  ;;  %v582_v61 = vmax.f32 %v540_v54, %v548_v48 }
 0x17b   :  { %2066 = vmatpush.bf16.msra.mxu0 %v5269_v3  ;;  %v562_v21 = vmax.f32 %v523_v6, 0.0  ;;  %v556_v59 = vmax.f32 %v508_v47, 0.0  ;;  %v404_v3 = vadd.f32 %v7279_v4, %v7411_v57  ;;  %v513_v6 = vadd.f32 %v7559_v51, %v424_v9  ;;  %v6639_v51 = vld [vmem:[%s10253_s3 + $0x174] sm:$0xf0]  ;;  %v6637_v47 = vld [vmem:[%s10253_s3 + $0x164] sm:$0xf0] }
 0x17c   :  { %851 = vmatpush.bf16.msrb.mxu2 %v4531_v17  ;;  %2081 = vmatpush.bf16.msra.mxu1 %v5257_v46  ;;  %v644_v17 = vunpack.c.l.b16 %v607_v16  ;;  %v4652_v46 = vld [vmem:[%s10253_s3 + $0x160] sm:$0xf]  ;;  %v4644_v9 = vld [vmem:[%s10253_s3 + $0x150] sm:$0xf]  ;;  %v4646_v16 = vld [vmem:[%s10253_s3 + $0x158] sm:$0xf0] }
 0x17d   :  { %v578_v35 = vmax.f32 %v577_v7, %v562_v21  ;;  %v583_v63 = vmax.f32 %v582_v61, %v556_v59  ;;  %v493_v15 = vadd.f32 %v7413_v58, %v404_v3  ;;  %v558_v23 = vmax.f32 %v513_v6, 0.0  ;;  %v4660_v58 = vld [vmem:[%s10253_s3 + $0x170] sm:$0xf]  ;;  %v5462_v61 = vld [vmem:[%s10253_s3 + $0x660] sm:$0xf] }
 0x17e   :  { %v436_v39 = vpop.f32.mrf.mxu0  ;;  %v7870_v7 = vunpack.i.l.s16 %v644_v17  ;;  %v4661_v43 = vor.u32 %v6639_v51, %v4660_v58  ;;  %v5464_v3 = vld [vmem:[%s10253_s3 + $0x668] sm:$0xf0]  ;;  %v5454_v17 = vld [vmem:[%s10253_s3 + $0x650] sm:$0xf]  ;;  %v6633_v51 = vld [vmem:[%s10253_s3 + $0x144] sm:$0xf0] }
 0x17f   :  { %v525_v25 = vpop.f32.mrf.mxu1  ;;  %2067 = vmatpush.bf16.msra.mxu0 %v5261_v22  ;;  %v7024_v14 = vpack.c.bf16 %v578_v35, %v575_v34  ;;  %v437_v45 = vadd.f32 %v7279_v4, %v436_v39  ;;  %v550_v18 = vmax.f32 %v493_v15, 0.0  ;;  %v6634_v15 = vld [vmem:[%s10253_s3 + $0x154] sm:$0xf] }
 0x180   :  { %852 = vmatpush.bf16.msrb.mxu2 %v4523_v36  ;;  %v650_v37 = vrot.slane %v7870_v7, 1 }
 0x181   :  { %7036 = vst [vmem:[#allocation2 + $0x8] sm:$0xff] %v7024_v14   ;;  %v526_v49 = vadd.f32 %v525_v25, %v437_v45  ;;  %v5470_v25 = vld [vmem:[%s10253_s3 + $0x670] sm:$0xf]  ;;  %v5086_v14 = vunpack.i.l.s16 %v1702_v29  ;;  %v4638_v29 = vld [vmem:[%s10253_s3 + $0x148] sm:$0xf0] }
 0x182   :  { %v5471_v59 = vor.u32 %v6799_v40, %v5470_v25  ;;  %v6630_v40 = vld [vmem:[%s10253_s3 + $0x134] sm:$0xf] }
 0x183   :  { %2068 = vmatpush.bf16.msra.mxu0 %v5253_v13  ;;  %v563_v41 = vmax.f32 %v526_v49, 0.0  ;;  %v6636_v49 = vld [vmem:[%s10253_s3 + $0x164] sm:$0xf] }
 0x185   :  { %v581_v33 = vmax.f32 %v7442_v27, %v563_v41  ;;  %v542_v27 = vmax.f32 %v7339_v56, 0.0  ;;  %v1949_v41 = vld [vmem:[#allocation2 + $0x4] sm:$0x2] }
 0x186   :  { %v438_v55 = vpop.f32.mrf.mxu0 }
 0x187   :  { %v527_v53 = vpop.f32.mrf.mxu1  ;;  %v439_v60 = vadd.f32 %v7279_v4, %v438_v55  ;;  %v588_v21 = vmax.f32 %v542_v27, %v550_v18  ;;  %v1970_v18 = vunpack.c.l.b16 %v1949_v41  ;;  %v6794_v27 = vld [vmem:[%s10253_s3 + $0x654] sm:$0xf] }
 0x189   :  { %v528_v62 = vadd.f32 %v527_v53, %v439_v60  ;;  %v589_v34 = vmax.f32 %v588_v21, %v558_v23  ;;  %v5475_v60 = vor.u32 %v6798_v12, %v5472_v8  ;;  %v5456_v23 = vld [vmem:[%s10253_s3 + $0x658] sm:$0xf0]  ;;  %v871_v21 = vld [vmem:[#allocation2] sm:$0x2] }
 0x18a   :  { %v4630_v12 = vld [vmem:[%s10253_s3 + $0x138] sm:$0xf0] }
 0x18b   :  { %v564_v52 = vmax.f32 %v528_v62, 0.0 }
 0x18d   :  { %v584_v5 = vmax.f32 %v583_v63, %v564_v52  ;;  %v6797_v63 = vld [vmem:[%s10253_s3 + $0x664] sm:$0xf0]  ;;  %v6796_v52 = vld [vmem:[%s10253_s3 + $0x664] sm:$0xf] }
 0x18e   :  { %v441_v11 = vpop.f32.mrf.mxu0  ;;  %v5467_v6 = vor.u32 %v6796_v52, %v5464_v3 }
 0x18f   :  { %v530_v28 = vpop.f32.mrf.mxu1  ;;  %v7029_v42 = vpack.c.bf16 %v584_v5, %v581_v33  ;;  %v442_v2 = vadd.f32 %v7279_v4, %v441_v11  ;;  %v4653_v33 = vor.u32 %v6637_v47, %v4652_v46  ;;  %v6791_v47 = vld [vmem:[%s10253_s3 + $0x634] sm:$0xf0] }
 0x191   :  { %7037 = vst [vmem:[#allocation2 + $0x10] sm:$0xff] %v7029_v42   ;;  %v531_v57 = vadd.f32 %v530_v28, %v442_v2  ;;  %v1837_v28 = vrot.slane %v5086_v14, 1  ;;  %v6635_v42 = vld [vmem:[%s10253_s3 + $0x154] sm:$0xf0]  ;;  %v5463_v2 = vor.u32 %v6797_v63, %v5462_v61  ;;  %v4622_v63 = vld [vmem:[%s10253_s3 + $0x128] sm:$0xf0] }
 0x193   :  { %v565_v56 = vmax.f32 %v531_v57, 0.0 }
 0x195   :  { %v587_v32 = vmax.f32 %v7546_v38, %v565_v56  ;;  %v4654_v38 = vld [vmem:[%s10253_s3 + $0x168] sm:$0xf0] }
 0x196   :  { %v443_v0 = vpop.f32.mrf.mxu0  ;;  %v4657_v5 = vor.u32 %v6636_v49, %v4654_v38  ;;  %v5440_v49 = vld [vmem:[%s10253_s3 + $0x638] sm:$0xf0] }
 0x197   :  { %v532_v50 = vpop.f32.mrf.mxu1  ;;  %v444_v20 = vadd.f32 %v7279_v4, %v443_v0  ;;  %v6638_v4 = vld [vmem:[%s10253_s3 + $0x174] sm:$0xf]  ;;  %v4645_v0 = vor.u32 %v6635_v42, %v4644_v9  ;;  %v5430_v9 = vld [vmem:[%s10253_s3 + $0x620] sm:$0xf] }
 0x198   :  { %v608_v22 = vld [vmem:[#allocation2 + $0x10] sm:$0x1]  ;;  %v1682_v26 = vld [vmem:[#allocation2 + $0x14] sm:$0x1]  ;;  %v4665_v44 = vor.u32 %v6638_v4, %v4662_v30  ;;  %v1950_v55 = vld [vmem:[#allocation2 + $0x14] sm:$0x2]  ;;  %v7972_v30 = vunpack.i.l.s16 %v1970_v18 }
 0x199   :  { %v533_v24 = vadd.f32 %v532_v50, %v444_v20  ;;  %v645_v10 = vunpack.c.l.b16 %v608_v22  ;;  %v1703_v31 = vunpack.c.l.b16 %v1682_v26  ;;  %v1971_v11 = vunpack.c.l.b16 %v1950_v55  ;;  %v4636_v20 = vld [vmem:[%s10253_s3 + $0x140] sm:$0xf]  ;;  %v2759_v22 = vld [vmem:[#allocation2 + $0x8] sm:$0x1]  ;;  %v6632_v26 = vld [vmem:[%s10253_s3 + $0x144] sm:$0xf] }
 0x19a   :  { %v4649_v50 = vor.u32 %v6634_v15, %v4646_v16  ;;  %v5446_v4 = vld [vmem:[%s10253_s3 + $0x640] sm:$0xf]  ;;  %v4641_v25 = vor.u32 %v6632_v26, %v4638_v29  ;;  %v872_v61 = vld [vmem:[#allocation2 + $0x10] sm:$0x2]  ;;  %v2220_v52 = vld [vmem:[#allocation2 + $0x14] sm:$0x4] }
 0x19b   :  { %v566_v35 = vmax.f32 %v533_v24, 0.0  ;;  %v7884_v36 = vunpack.i.l.s16 %v645_v10  ;;  %v5087_v39 = vunpack.i.l.s16 %v1703_v31  ;;  %v7957_v58 = vunpack.i.l.s16 %v1971_v11  ;;  %v6793_v31 = vld [vmem:[%s10253_s3 + $0x644] sm:$0xf0]  ;;  %v6788_v15 = vld [vmem:[%s10253_s3 + $0x624] sm:$0xf] }
 0x19c   :  { %v5455_v24 = vor.u32 %v6795_v19, %v5454_v17  ;;  %v5459_v10 = vor.u32 %v6794_v27, %v5456_v23  ;;  %v5447_v8 = vor.u32 %v6793_v31, %v5446_v4  ;;  %v6789_v11 = vld [vmem:[%s10253_s3 + $0x624] sm:$0xf0]  ;;  %v5432_v16 = vld [vmem:[%s10253_s3 + $0x628] sm:$0xf0]  ;;  %v4612_v27 = vld [vmem:[%s10253_s3 + $0x110] sm:$0xf] }
 0x19d   :  { %v590_v1 = vmax.f32 %v589_v34, %v566_v35  ;;  %v652_v45 = vsel %vm651_vm0, %v7884_v36, %v650_v37  ;;  %v1708_v13 = vrot.slane %v5087_v39, 7  ;;  %v7943_v57 = vsel %vm651_vm0, %v5087_v39, %v1837_v28  ;;  %v6792_v34 = vld [vmem:[%s10253_s3 + $0x644] sm:$0xf]  ;;  %v5448_v35 = vld [vmem:[%s10253_s3 + $0x648] sm:$0xf0] }
 0x19e   :  { %v653_v48 = vpack.c.b16 %v652_v45, %v652_v45  ;;  %v761_v56 = vrot.slane %v7884_v36, 7  ;;  %v892_v36 = vunpack.c.l.b16 %v871_v21  ;;  %v2780_v37 = vunpack.c.l.b16 %v2759_v22  ;;  %v2219_v28 = vld [vmem:[#allocation2 + $0x4] sm:$0x4]  ;;  %v6627_v23 = vld [vmem:[%s10253_s3 + $0x114] sm:$0xf0] }
 0x19f   :  { %v7034_v53 = vpack.c.bf16 %v590_v1, %v587_v32  ;;  %v1709_v54 = vsel %vm651_vm0, %v1708_v13, %v5086_v14  ;;  %v4637_v39 = vor.u32 %v6633_v51, %v4636_v20  ;;  %v6631_v14 = vld [vmem:[%s10253_s3 + $0x134] sm:$0xf0]  ;;  %v5451_v32 = vor.u32 %v6792_v34, %v5448_v35  ;;  %v5438_v13 = vld [vmem:[%s10253_s3 + $0x630] sm:$0xf]  ;;  %v4614_v20 = vld [vmem:[%s10253_s3 + $0x118] sm:$0xf0] }
 0x1a0   :  { %743 = vmatmul.bf16.vlgmr.msra.gmra.mxu2 %v653_v48  ;;  %756 = vmatmul.bf16.vlgmr.msra.gmra.mxu3 %v653_v48  ;;  %v1710_v62 = vpack.c.b16 %v1709_v54, %v1709_v54  ;;  %v762_v1 = vsel %vm651_vm0, %v761_v56, %v7870_v7  ;;  %v1976_v45 = vrot.slane %v7972_v30, 2  ;;  %v6790_v48 = vld [vmem:[%s10253_s3 + $0x634] sm:$0xf]  ;;  %v8011_v7 = vunpack.i.l.s16 %v892_v36  ;;  %v5422_v21 = vld [vmem:[%s10253_s3 + $0x610] sm:$0xf] }
 0x1a1   :  { %7038 = vst [vmem:[#allocation2 + $0x18] sm:$0xff] %v7034_v53   ;;  %983 = vmatpush.bf16.msra.mxu2 %v4661_v43  ;;  %996 = vmatpush.bf16.msra.mxu3 %v4665_v44  ;;  %v4628_v43 = vld [vmem:[%s10253_s3 + $0x130] sm:$0xf]  ;;  %v1977_v44 = vrot.slane %v7957_v58, 1  ;;  %v8013_v38 = vunpack.i.l.s16 %v2780_v37  ;;  %v4633_v53 = vor.u32 %v6630_v40, %v4630_v12  ;;  %v763_v41 = vpack.c.b16 %v762_v1, %v762_v1  ;;  %v6787_v22 = vld [vmem:[%s10253_s3 + $0x614] sm:$0xf0] }
 0x1a2   :  { %1800 = vmatmul.bf16.vlgmr.msrb.gmra.mxu0 %v1710_v62  ;;  %1813 = vmatmul.bf16.vlgmr.msrb.gmra.mxu1 %v1710_v62  ;;  %v4629_v55 = vor.u32 %v6631_v14, %v4628_v43  ;;  %v6628_v62 = vld [vmem:[%s10253_s3 + $0x124] sm:$0xf]  ;;  %v2240_v51 = vunpack.c.l.b16 %v2219_v28  ;;  %v5431_v56 = vor.u32 %v6789_v11, %v5430_v9  ;;  %v5424_v4 = vld [vmem:[%s10253_s3 + $0x618] sm:$0xf0]  ;;  %v8073_v31 = vld [vmem:[%s10253_s3 + $0x100] sm:$0xf] }
 0x1a3   :  { %2331 = vmatpush.bf16.msrb.mxu0 %v5471_v59  ;;  %2344 = vmatpush.bf16.msrb.mxu1 %v5475_v60  ;;  %v1978_v54 = vsel %vm651_vm0, %v1977_v44, %v1976_v45  ;;  %v4620_v59 = vld [vmem:[%s10253_s3 + $0x120] sm:$0xf]  ;;  %v6629_v60 = vld [vmem:[%s10253_s3 + $0x124] sm:$0xf0]  ;;  %v2915_v17 = vrot.slane %v8013_v38, 1  ;;  %v4625_v19 = vor.u32 %v6628_v62, %v4622_v63  ;;  %v2107_v28 = vrot.slane %v7957_v58, 2 }
 0x1a4   :  { %v1979_v42 = vpack.c.b16 %v1978_v54, %v1978_v54  ;;  %v4621_v18 = vor.u32 %v6629_v60, %v4620_v59  ;;  %v8060_v26 = vld [vmem:[#allocation2 + $0x4] sm:$0x8]  ;;  %v6625_v34 = vld [vmem:[%s10253_s3 + $0x104] sm:$0xf0]  ;;  %v4606_v36 = vld [vmem:[%s10253_s3 + $0x108] sm:$0xf0]  ;;  %v8109_v1 = vunpack.i.l.s16 %v2240_v51 }
 0x1a5   :  { %984 = vmatpush.bf16.msra.mxu2 %v4653_v33  ;;  %997 = vmatpush.bf16.msra.mxu3 %v4657_v5  ;;  %v5439_v33 = vor.u32 %v6791_v47, %v5438_v13  ;;  %v5443_v5 = vor.u32 %v6790_v48, %v5440_v49  ;;  %v6624_v35 = vld [vmem:[%s10253_s3 + $0x104] sm:$0xf]  ;;  %v8089_v43 = vld [vmem:[%s10253_s3 + $0x1f0] sm:$0xf]  ;;  %v6655_v44 = vld [vmem:[%s10253_s3 + $0x1f4] sm:$0xf0]  ;;  %v5423_v48 = vor.u32 %v6787_v22, %v5422_v21  ;;  %v2510_v59 = vunpack.c.l.b16 %v8060_v26 }
 0x1a6   :  { %v6654_v14 = vld [vmem:[%s10253_s3 + $0x1f4] sm:$0xf]  ;;  %v4742_v40 = vld [vmem:[%s10253_s3 + $0x1f8] sm:$0xf0]  ;;  %v5416_v54 = vld [vmem:[%s10253_s3 + $0x608] sm:$0xf0]  ;;  %v4605_v60 = vor.u32 %v6625_v34, %v8073_v31 }
 0x1a7   :  { %2332 = vmatpush.bf16.msrb.mxu0 %v5463_v2  ;;  %2345 = vmatpush.bf16.msrb.mxu1 %v5467_v6  ;;  %v893_v2 = vunpack.c.l.b16 %v872_v61  ;;  %v898_v6 = vrot.slane %v8011_v7, 2  ;;  %v2490_v45 = vld [vmem:[#allocation2 + $0x14] sm:$0x8]  ;;  %v4609_v61 = vor.u32 %v6624_v35, %v4606_v36  ;;  %v6831_v62 = vld [vmem:[%s10253_s3 + $0x774] sm:$0xf0] }
 0x1a8   :  { %v2760_v46 = vld [vmem:[#allocation2 + $0x18] sm:$0x1]  ;;  %v3028_v13 = vld [vmem:[#allocation2 + $0x18] sm:$0x2]  ;;  %v2511_v9 = vunpack.c.l.b16 %v2490_v45  ;;  %v6653_v58 = vld [vmem:[%s10253_s3 + $0x1e4] sm:$0xf0] }
 0x1a9   :  { %985 = vmatpush.bf16.msra.mxu2 %v4645_v0  ;;  %998 = vmatpush.bf16.msra.mxu3 %v4649_v50  ;;  %v2781_v3 = vunpack.c.l.b16 %v2760_v46  ;;  %v6626_v0 = vld [vmem:[%s10253_s3 + $0x114] sm:$0xf]  ;;  %v2241_v50 = vunpack.c.l.b16 %v2220_v52  ;;  %v8084_v37 = vunpack.i.l.s16 %v893_v2  ;;  %v8111_v46 = vld [vmem:[#allocation2 + $0x8] sm:$0x4]  ;;  %v2106_v52 = vrot.slane %v7972_v30, 3 }
 0x1aa   :  { %v3049_v11 = vunpack.c.l.b16 %v3028_v13  ;;  %v4732_v30 = vld [vmem:[%s10253_s3 + $0x1e0] sm:$0xf]  ;;  %v3567_v26 = vld [vmem:[#allocation2 + $0x8] sm:$0x8] }
 0x1ab   :  { %2333 = vmatpush.bf16.msrb.mxu0 %v5455_v24  ;;  %2346 = vmatpush.bf16.msrb.mxu1 %v5459_v10  ;;  %v8062_v29 = vunpack.i.l.s16 %v2781_v3  ;;  %v5435_v24 = vor.u32 %v6788_v15, %v5432_v16  ;;  %v6786_v10 = vld [vmem:[%s10253_s3 + $0x614] sm:$0xf]  ;;  %v8100_v12 = vunpack.i.l.s16 %v2241_v50  ;;  %v899_v63 = vrot.slane %v8084_v37, 1  ;;  %v5624_v51 = vld [vmem:[%s10253_s3 + $0x760] sm:$0xf] }
 0x1ac   :  { %v5427_v49 = vor.u32 %v6786_v10, %v5424_v4  ;;  %v6830_v3 = vld [vmem:[%s10253_s3 + $0x774] sm:$0xf]  ;;  %v4745_v15 = vor.u32 %v6654_v14, %v4742_v40  ;;  %v2246_v16 = vrot.slane %v8109_v1, 4  ;;  %v8162_v50 = vsel %vm651_vm0, %v2107_v28, %v2106_v52  ;;  %v6828_v10 = vld [vmem:[%s10253_s3 + $0x764] sm:$0xf] }
 0x1ad   :  { %986 = vmatpush.bf16.msra.mxu2 %v4637_v39  ;;  %999 = vmatpush.bf16.msra.mxu3 %v4641_v25  ;;  %v4613_v39 = vor.u32 %v6627_v23, %v4612_v27  ;;  %v4617_v25 = vor.u32 %v6626_v0, %v4614_v20  ;;  %v8115_v47 = vsel %vm651_vm0, %v8062_v29, %v2915_v17  ;;  %v3298_v17 = vld [vmem:[#allocation2 + $0x18] sm:$0x4]  ;;  %v6652_v27 = vld [vmem:[%s10253_s3 + $0x1e4] sm:$0xf]  ;;  %v4734_v23 = vld [vmem:[%s10253_s3 + $0x1e8] sm:$0xf0]  ;;  %v3318_v0 = vunpack.c.l.b16 %v8111_v46 }
 0x1ae   :  { %v900_v22 = vsel %vm651_vm0, %v899_v63, %v898_v6  ;;  %v5626_v6 = vld [vmem:[%s10253_s3 + $0x768] sm:$0xf0]  ;;  %v8180_v4 = vunpack.i.l.s16 %v2511_v9  ;;  %v8182_v31 = vunpack.i.l.s16 %v3049_v11  ;;  %v3319_v34 = vunpack.c.l.b16 %v3298_v17  ;;  %v6651_v40 = vld [vmem:[%s10253_s3 + $0x1d4] sm:$0xf0]  ;;  %v6648_v11 = vld [vmem:[%s10253_s3 + $0x1c4] sm:$0xf] }
 0x1af   :  { %2334 = vmatpush.bf16.msrb.mxu0 %v5447_v8  ;;  %2347 = vmatpush.bf16.msrb.mxu1 %v5451_v32  ;;  %v8102_v8 = vld [vmem:[#allocation2 + $0x8] sm:$0x2]  ;;  %v8107_v32 = vld [vmem:[%s10253_s3 + $0x600] sm:$0xf]  ;;  %v4733_v35 = vor.u32 %v6653_v58, %v4732_v30  ;;  %v4737_v36 = vor.u32 %v6652_v27, %v4734_v23  ;;  %v901_v14 = vpack.c.b16 %v900_v22, %v900_v22  ;;  %v8201_v13 = vunpack.i.l.s16 %v3318_v0  ;;  %v4718_v28 = vld [vmem:[%s10253_s3 + $0x1c8] sm:$0xf0] }
 0x1b0   :  { %853 = vmatmul.bf16.vlgmr.msrb.gmra.mxu2 %v763_v41  ;;  %866 = vmatmul.bf16.vlgmr.msrb.gmra.mxu3 %v763_v41  ;;  %v5632_v41 = vld [vmem:[%s10253_s3 + $0x770] sm:$0xf]  ;;  %v3048_v2 = vunpack.c.l.b16 %v8102_v8  ;;  %v6650_v8 = vld [vmem:[%s10253_s3 + $0x1d4] sm:$0xf]  ;;  %v3185_v63 = vrot.slane %v8182_v31, 2  ;;  %v4721_v22 = vor.u32 %v6648_v11, %v4718_v28 }
 0x1b1   :  { %987 = vmatpush.bf16.msra.mxu2 %v4629_v55  ;;  %1000 = vmatpush.bf16.msra.mxu3 %v4633_v53  ;;  %v6785_v55 = vld [vmem:[%s10253_s3 + $0x604] sm:$0xf0]  ;;  %v6784_v53 = vld [vmem:[%s10253_s3 + $0x604] sm:$0xf]  ;;  %v5633_v20 = vor.u32 %v6831_v62, %v5632_v41  ;;  %v2647_v62 = vrot.slane %v8180_v4, 6  ;;  %v3454_v0 = vrot.slane %v8201_v13, 5 }
 0x1b2   :  { %2069 = vmatmul.bf16.vlgmr.msra.gmra.mxu0 %v1979_v42  ;;  %2082 = vmatmul.bf16.vlgmr.msra.gmra.mxu1 %v1979_v42  ;;  %v4741_v42 = vor.u32 %v6655_v44, %v8089_v43  ;;  %v3568_v43 = vld [vmem:[#allocation2 + $0x18] sm:$0x8]  ;;  %v2376_v44 = vrot.slane %v8109_v1, 5  ;;  %v8199_v45 = vunpack.i.l.s16 %v3048_v2  ;;  %v3588_v1 = vunpack.c.l.b16 %v3567_v26  ;;  %v6825_v2 = vld [vmem:[%s10253_s3 + $0x744] sm:$0xf0] }
 0x1b3   :  { %2335 = vmatpush.bf16.msrb.mxu0 %v5439_v33  ;;  %2348 = vmatpush.bf16.msrb.mxu1 %v5443_v5  ;;  %v5634_v33 = vld [vmem:[%s10253_s3 + $0x778] sm:$0xf0]  ;;  %v2247_v5 = vrot.slane %v8100_v12, 3  ;;  %v3589_v41 = vunpack.c.l.b16 %v3568_v43  ;;  %v5610_v58 = vld [vmem:[%s10253_s3 + $0x748] sm:$0xf0] }
 0x1b4   :  { %v5637_v21 = vor.u32 %v6830_v3, %v5634_v33  ;;  %v4716_v3 = vld [vmem:[%s10253_s3 + $0x1c0] sm:$0xf]  ;;  %v6649_v33 = vld [vmem:[%s10253_s3 + $0x1c4] sm:$0xf0]  ;;  %v8243_v17 = vunpack.i.l.s16 %v3588_v1  ;;  %v6647_v26 = vld [vmem:[%s10253_s3 + $0x1b4] sm:$0xf0] }
 0x1b5   :  { %988 = vmatpush.bf16.msra.mxu2 %v4621_v18  ;;  %1001 = vmatpush.bf16.msra.mxu3 %v4625_v19  ;;  %v5415_v18 = vor.u32 %v6785_v55, %v8107_v32  ;;  %v5419_v19 = vor.u32 %v6784_v53, %v5416_v54  ;;  %v4726_v32 = vld [vmem:[%s10253_s3 + $0x1d8] sm:$0xf0]  ;;  %v5616_v55 = vld [vmem:[%s10253_s3 + $0x750] sm:$0xf]  ;;  %v6827_v53 = vld [vmem:[%s10253_s3 + $0x754] sm:$0xf0]  ;;  %v8254_v27 = vunpack.i.l.s16 %v3589_v41 }
 0x1b6   :  { %v2377_v54 = vrot.slane %v8100_v12, 4  ;;  %v4729_v52 = vor.u32 %v6650_v8, %v4726_v32  ;;  %v5602_v43 = vld [vmem:[%s10253_s3 + $0x738] sm:$0xf0]  ;;  %v4700_v32 = vld [vmem:[%s10253_s3 + $0x1a0] sm:$0xf] }
 0x1b7   :  { %2336 = vmatpush.bf16.msrb.mxu0 %v5431_v56  ;;  %2349 = vmatpush.bf16.msrb.mxu1 %v5435_v24  ;;  %v2248_v56 = vsel %vm651_vm0, %v2247_v5, %v2246_v16  ;;  %v6829_v24 = vld [vmem:[%s10253_s3 + $0x764] sm:$0xf0]  ;;  %v5608_v16 = vld [vmem:[%s10253_s3 + $0x740] sm:$0xf]  ;;  %v5594_v41 = vld [vmem:[%s10253_s3 + $0x728] sm:$0xf0] }
 0x1b8   :  { %v2249_v46 = vpack.c.b16 %v2248_v56, %v2248_v56  ;;  %v8227_v5 = vsel %vm651_vm0, %v2377_v54, %v2376_v44  ;;  %v6646_v56 = vld [vmem:[%s10253_s3 + $0x1b4] sm:$0xf]  ;;  %v3724_v44 = vrot.slane %v8243_v17, 7  ;;  %v6645_v1 = vld [vmem:[%s10253_s3 + $0x1a4] sm:$0xf0] }
 0x1b9   :  { %989 = vmatpush.bf16.msra.mxu2 %v4613_v39  ;;  %1002 = vmatpush.bf16.msra.mxu3 %v4617_v25  ;;  %v4724_v39 = vld [vmem:[%s10253_s3 + $0x1d0] sm:$0xf]  ;;  %v8187_v25 = vunpack.i.l.s16 %v2510_v59  ;;  %v6826_v59 = vld [vmem:[%s10253_s3 + $0x754] sm:$0xf]  ;;  %v5592_v54 = vld [vmem:[%s10253_s3 + $0x720] sm:$0xf] }
 0x1ba   :  { %v4725_v12 = vor.u32 %v6651_v40, %v4724_v39  ;;  %v6822_v39 = vld [vmem:[%s10253_s3 + $0x734] sm:$0xf]  ;;  %v5584_v28 = vld [vmem:[%s10253_s3 + $0x710] sm:$0xf] }
 0x1bb   :  { %2337 = vmatpush.bf16.msrb.mxu0 %v5423_v48  ;;  %2350 = vmatpush.bf16.msrb.mxu1 %v5427_v49  ;;  %v5625_v48 = vor.u32 %v6829_v24, %v5624_v51  ;;  %v5629_v49 = vor.u32 %v6828_v10, %v5626_v6  ;;  %v2646_v9 = vrot.slane %v8187_v25, 7  ;;  %v4708_v51 = vld [vmem:[%s10253_s3 + $0x1b0] sm:$0xf]  ;;  %v4710_v24 = vld [vmem:[%s10253_s3 + $0x1b8] sm:$0xf0]  ;;  %v5609_v6 = vor.u32 %v6825_v2, %v5608_v16 }
 0x1bc   :  { %v4709_v40 = vor.u32 %v6647_v26, %v4708_v51  ;;  %v4713_v8 = vor.u32 %v6646_v56, %v4710_v24  ;;  %v6818_v16 = vld [vmem:[%s10253_s3 + $0x714] sm:$0xf]  ;;  %v5586_v2 = vld [vmem:[%s10253_s3 + $0x718] sm:$0xf0] }
 0x1bd   :  { %990 = vmatpush.bf16.msra.mxu2 %v4605_v60  ;;  %1003 = vmatpush.bf16.msra.mxu3 %v4609_v61  ;;  %v5618_v60 = vld [vmem:[%s10253_s3 + $0x758] sm:$0xf0]  ;;  %v8216_v61 = vunpack.i.l.s16 %v3319_v34  ;;  %v5589_v26 = vor.u32 %v6818_v16, %v5586_v2  ;;  %v6670_v56 = vld [vmem:[%s10253_s3 + $0x274] sm:$0xf] }
 0x1be   :  { %v5621_v30 = vor.u32 %v6826_v59, %v5618_v60  ;;  %v6821_v59 = vld [vmem:[%s10253_s3 + $0x724] sm:$0xf0]  ;;  %v6820_v60 = vld [vmem:[%s10253_s3 + $0x724] sm:$0xf]  ;;  %v4824_v24 = vld [vmem:[%s10253_s3 + $0x278] sm:$0xf0] }
 0x1bf   :  { %2338 = vmatpush.bf16.msrb.mxu0 %v5415_v18  ;;  %2351 = vmatpush.bf16.msrb.mxu1 %v5419_v19  ;;  %v8246_v18 = vsel %vm651_vm0, %v2647_v62, %v2646_v9  ;;  %v6824_v19 = vld [vmem:[%s10253_s3 + $0x744] sm:$0xf]  ;;  %v4701_v62 = vor.u32 %v6645_v1, %v4700_v32  ;;  %v5593_v9 = vor.u32 %v6821_v59, %v5592_v54  ;;  %v6669_v54 = vld [vmem:[%s10253_s3 + $0x264] sm:$0xf0]  ;;  %v4808_v16 = vld [vmem:[%s10253_s3 + $0x258] sm:$0xf0] }
 0x1c0   :  { %991 = vmatmul.bf16.vlgmr.msra.gmra.mxu2 %v901_v14  ;;  %1004 = vmatmul.bf16.vlgmr.msra.gmra.mxu3 %v901_v14  ;;  %v5613_v34 = vor.u32 %v6824_v19, %v5610_v58  ;;  %v3725_v14 = vrot.slane %v8254_v27, 6  ;;  %v5597_v11 = vor.u32 %v6820_v60, %v5594_v41  ;;  %v4827_v32 = vor.u32 %v6670_v56, %v4824_v24  ;;  %v6668_v59 = vld [vmem:[%s10253_s3 + $0x264] sm:$0xf]  ;;  %v4816_v60 = vld [vmem:[%s10253_s3 + $0x268] sm:$0xf0] }
 0x1c1   :  { %1113 = vmatpush.bf16.msrb.mxu2 %v4741_v42  ;;  %1126 = vmatpush.bf16.msrb.mxu3 %v4745_v15  ;;  %v3184_v42 = vrot.slane %v8199_v45, 3  ;;  %v5617_v15 = vor.u32 %v6827_v53, %v5616_v55  ;;  %v5605_v53 = vor.u32 %v6822_v39, %v5602_v43  ;;  %v2516_v41 = vrot.slane %v8187_v25, 6  ;;  %v6860_v25 = vld [vmem:[%s10253_s3 + $0x864] sm:$0xf]  ;;  %v4800_v24 = vld [vmem:[%s10253_s3 + $0x248] sm:$0xf0] }
 0x1c2   :  { %2339 = vmatmul.bf16.vlgmr.msrb.gmra.mxu0 %v2249_v46  ;;  %2352 = vmatmul.bf16.vlgmr.msrb.gmra.mxu1 %v2249_v46  ;;  %v6644_v46 = vld [vmem:[%s10253_s3 + $0x1a4] sm:$0xf] }
 0x1c3   :  { %2601 = vmatpush.bf16.msra.mxu0 %v5633_v20  ;;  %2614 = vmatpush.bf16.msra.mxu1 %v5637_v21  ;;  %v8257_v23 = vsel %vm651_vm0, %v3185_v63, %v3184_v42  ;;  %v3455_v20 = vrot.slane %v8216_v61, 4  ;;  %v4717_v21 = vor.u32 %v6649_v33, %v4716_v3  ;;  %v6642_v3 = vld [vmem:[%s10253_s3 + $0x194] sm:$0xf]  ;;  %v4694_v33 = vld [vmem:[%s10253_s3 + $0x198] sm:$0xf0]  ;;  %v1028_v42 = vrot.slane %v8011_v7, 3 }
 0x1c4   :  { %v4697_v58 = vor.u32 %v6642_v3, %v4694_v33  ;;  %v4684_v7 = vld [vmem:[%s10253_s3 + $0x180] sm:$0xf]  ;;  %v6861_v3 = vld [vmem:[%s10253_s3 + $0x864] sm:$0xf0]  ;;  %v6664_v56 = vld [vmem:[%s10253_s3 + $0x244] sm:$0xf] }
 0x1c5   :  { %1114 = vmatpush.bf16.msrb.mxu2 %v4733_v35  ;;  %1127 = vmatpush.bf16.msrb.mxu3 %v4737_v36  ;;  %v8274_v10 = vsel %vm651_vm0, %v3455_v20, %v3454_v0  ;;  %v5600_v35 = vld [vmem:[%s10253_s3 + $0x730] sm:$0xf]  ;;  %v6823_v36 = vld [vmem:[%s10253_s3 + $0x734] sm:$0xf0]  ;;  %v6640_v0 = vld [vmem:[%s10253_s3 + $0x184] sm:$0xf] }
 0x1c6   :  { %v5601_v55 = vor.u32 %v6823_v36, %v5600_v35  ;;  %v4686_v20 = vld [vmem:[%s10253_s3 + $0x188] sm:$0xf0]  ;;  %v6816_v35 = vld [vmem:[%s10253_s3 + $0x704] sm:$0xf] }
 0x1c7   :  { %2602 = vmatpush.bf16.msra.mxu0 %v5625_v48  ;;  %2615 = vmatpush.bf16.msra.mxu1 %v5629_v49  ;;  %v4702_v48 = vld [vmem:[%s10253_s3 + $0x1a8] sm:$0xf0]  ;;  %v8303_v49 = vsel %vm651_vm0, %v3725_v14, %v3724_v44  ;;  %v4689_v43 = vor.u32 %v6640_v0, %v4686_v20  ;;  %v5794_v44 = vld [vmem:[%s10253_s3 + $0x870] sm:$0xf]  ;;  %v6863_v14 = vld [vmem:[%s10253_s3 + $0x874] sm:$0xf0] }
 0x1c8   :  { %v4705_v63 = vor.u32 %v6644_v46, %v4702_v48  ;;  %v5578_v36 = vld [vmem:[%s10253_s3 + $0x708] sm:$0xf0]  ;;  %v6862_v46 = vld [vmem:[%s10253_s3 + $0x874] sm:$0xf]  ;;  %v5796_v48 = vld [vmem:[%s10253_s3 + $0x878] sm:$0xf0] }
 0x1c9   :  { %1115 = vmatpush.bf16.msrb.mxu2 %v4725_v12  ;;  %1128 = vmatpush.bf16.msrb.mxu3 %v4729_v52  ;;  %v4692_v12 = vld [vmem:[%s10253_s3 + $0x190] sm:$0xf]  ;;  %v6643_v52 = vld [vmem:[%s10253_s3 + $0x194] sm:$0xf0] }
 0x1ca   :  { %v4693_v19 = vor.u32 %v6643_v52, %v4692_v12  ;;  %v5799_v12 = vor.u32 %v6862_v46, %v5796_v48  ;;  %v5786_v52 = vld [vmem:[%s10253_s3 + $0x860] sm:$0xf] }
 0x1cb   :  { %2603 = vmatpush.bf16.msra.mxu0 %v5617_v15  ;;  %2616 = vmatpush.bf16.msra.mxu1 %v5621_v30  ;;  %v1029_v15 = vrot.slane %v8084_v37, 2  ;;  %v6819_v30 = vld [vmem:[%s10253_s3 + $0x714] sm:$0xf0]  ;;  %v6641_v37 = vld [vmem:[%s10253_s3 + $0x184] sm:$0xf0] }
 0x1cc   :  { %v5585_v51 = vor.u32 %v6819_v30, %v5584_v28  ;;  %v4685_v39 = vor.u32 %v6641_v37, %v4684_v7  ;;  %v5788_v28 = vld [vmem:[%s10253_s3 + $0x868] sm:$0xf0]  ;;  %v6666_v30 = vld [vmem:[%s10253_s3 + $0x254] sm:$0xf]  ;;  %v5778_v7 = vld [vmem:[%s10253_s3 + $0x850] sm:$0xf] }
 0x1cd   :  { %1116 = vmatpush.bf16.msrb.mxu2 %v4717_v21  ;;  %1129 = vmatpush.bf16.msrb.mxu3 %v4721_v22  ;;  %v4822_v21 = vld [vmem:[%s10253_s3 + $0x270] sm:$0xf]  ;;  %v6671_v22 = vld [vmem:[%s10253_s3 + $0x274] sm:$0xf0]  ;;  %v1030_v1 = vsel %vm651_vm0, %v1029_v15, %v1028_v42  ;;  %v4811_v20 = vor.u32 %v6666_v30, %v4808_v16  ;;  %v6852_v30 = vld [vmem:[%s10253_s3 + $0x824] sm:$0xf] }
 0x1ce   :  { %v4806_v42 = vld [vmem:[%s10253_s3 + $0x250] sm:$0xf]  ;;  %v6667_v15 = vld [vmem:[%s10253_s3 + $0x254] sm:$0xf0]  ;;  %v5756_v16 = vld [vmem:[%s10253_s3 + $0x828] sm:$0xf0] }
 0x1cf   :  { %2604 = vmatpush.bf16.msra.mxu0 %v5609_v6  ;;  %2617 = vmatpush.bf16.msra.mxu1 %v5613_v34  ;;  %v5576_v6 = vld [vmem:[%s10253_s3 + $0x700] sm:$0xf]  ;;  %v6817_v34 = vld [vmem:[%s10253_s3 + $0x704] sm:$0xf0]  ;;  %v6859_v37 = vld [vmem:[%s10253_s3 + $0x854] sm:$0xf0]  ;;  %v4807_v0 = vor.u32 %v6667_v15, %v4806_v42 }
 0x1d1   :  { %1117 = vmatpush.bf16.msrb.mxu2 %v4709_v40  ;;  %1130 = vmatpush.bf16.msrb.mxu3 %v4713_v8  ;;  %v2517_v40 = vrot.slane %v8180_v4, 5  ;;  %v4823_v8 = vor.u32 %v6671_v22, %v4822_v21  ;;  %v5581_v4 = vor.u32 %v6816_v35, %v5578_v36  ;;  %v6858_v21 = vld [vmem:[%s10253_s3 + $0x854] sm:$0xf]  ;;  %v5780_v22 = vld [vmem:[%s10253_s3 + $0x858] sm:$0xf0] }
 0x1d2   :  { %v5770_v35 = vld [vmem:[%s10253_s3 + $0x840] sm:$0xf]  ;;  %v6857_v36 = vld [vmem:[%s10253_s3 + $0x844] sm:$0xf0] }
 0x1d3   :  { %2605 = vmatpush.bf16.msra.mxu0 %v5601_v55  ;;  %2618 = vmatpush.bf16.msra.mxu1 %v5605_v53  ;;  %v4814_v55 = vld [vmem:[%s10253_s3 + $0x260] sm:$0xf]  ;;  %v5577_v53 = vor.u32 %v6817_v34, %v5576_v6  ;;  %v5779_v6 = vor.u32 %v6859_v37, %v5778_v7  ;;  %v5783_v34 = vor.u32 %v6858_v21, %v5780_v22  ;;  %v4776_v7 = vld [vmem:[%s10253_s3 + $0x218] sm:$0xf0]  ;;  %v5746_v21 = vld [vmem:[%s10253_s3 + $0x810] sm:$0xf] }
 0x1d4   :  { %v4815_v33 = vor.u32 %v6669_v54, %v4814_v55  ;;  %v5771_v46 = vor.u32 %v6857_v36, %v5770_v35  ;;  %v5762_v55 = vld [vmem:[%s10253_s3 + $0x830] sm:$0xf]  ;;  %v6851_v22 = vld [vmem:[%s10253_s3 + $0x814] sm:$0xf0]  ;;  %v6657_v35 = vld [vmem:[%s10253_s3 + $0x204] sm:$0xf0] }
 0x1d5   :  { %1118 = vmatpush.bf16.msrb.mxu2 %v4701_v62  ;;  %1131 = vmatpush.bf16.msrb.mxu3 %v4705_v63  ;;  %v1031_v62 = vpack.c.b16 %v1030_v1, %v1030_v1  ;;  %v5795_v63 = vor.u32 %v6863_v14, %v5794_v44  ;;  %v6856_v44 = vld [vmem:[%s10253_s3 + $0x844] sm:$0xf]  ;;  %v5772_v14 = vld [vmem:[%s10253_s3 + $0x848] sm:$0xf0]  ;;  %v4792_v1 = vld [vmem:[%s10253_s3 + $0x238] sm:$0xf0] }
 0x1d6   :  { %v5775_v48 = vor.u32 %v6856_v44, %v5772_v14  ;;  %v6656_v36 = vld [vmem:[%s10253_s3 + $0x204] sm:$0xf]  ;;  %v6687_v14 = vld [vmem:[%s10253_s3 + $0x2f4] sm:$0xf0] }
 0x1d7   :  { %2606 = vmatpush.bf16.msra.mxu0 %v5593_v9  ;;  %2619 = vmatpush.bf16.msra.mxu1 %v5597_v11  ;;  %v4819_v9 = vor.u32 %v6668_v59, %v4816_v60  ;;  %v2518_v11 = vsel %vm651_vm0, %v2517_v40, %v2516_v41  ;;  %v4790_v40 = vld [vmem:[%s10253_s3 + $0x230] sm:$0xf]  ;;  %v6854_v60 = vld [vmem:[%s10253_s3 + $0x834] sm:$0xf]  ;;  %v5764_v41 = vld [vmem:[%s10253_s3 + $0x838] sm:$0xf0] }
 0x1d8   :  { %v2519_v2 = vpack.c.b16 %v2518_v11, %v2518_v11  ;;  %v5754_v11 = vld [vmem:[%s10253_s3 + $0x820] sm:$0xf] }
 0x1d9   :  { %1119 = vmatpush.bf16.msrb.mxu2 %v4693_v19  ;;  %1132 = vmatpush.bf16.msrb.mxu3 %v4697_v58  ;;  %v5787_v19 = vor.u32 %v6861_v3, %v5786_v52  ;;  %v5791_v58 = vor.u32 %v6860_v25, %v5788_v28  ;;  %v4784_v52 = vld [vmem:[%s10253_s3 + $0x228] sm:$0xf0]  ;;  %v1141_v3 = vld [vmem:[#allocation2] sm:$0x4]  ;;  %v6853_v25 = vld [vmem:[%s10253_s3 + $0x824] sm:$0xf0] }
 0x1da   :  { %v1162_v37 = vunpack.c.l.b16 %v1141_v3  ;;  %v6894_v3 = vld [vmem:[%s10253_s3 + $0x974] sm:$0xf] }
 0x1db   :  { %2607 = vmatpush.bf16.msra.mxu0 %v5585_v51  ;;  %2620 = vmatpush.bf16.msra.mxu1 %v5589_v26  ;;  %v4798_v51 = vld [vmem:[%s10253_s3 + $0x240] sm:$0xf]  ;;  %v6665_v26 = vld [vmem:[%s10253_s3 + $0x244] sm:$0xf0] }
 0x1dc   :  { %v8556_v44 = vunpack.i.l.s16 %v1162_v37 }
 0x1dd   :  { %1120 = vmatpush.bf16.msrb.mxu2 %v4685_v39  ;;  %1133 = vmatpush.bf16.msrb.mxu3 %v4689_v43  ;;  %v4799_v39 = vor.u32 %v6665_v26, %v4798_v51  ;;  %v4803_v43 = vor.u32 %v6664_v56, %v4800_v24  ;;  %v6850_v51 = vld [vmem:[%s10253_s3 + $0x814] sm:$0xf] }
 0x1df   :  { %2608 = vmatpush.bf16.msra.mxu0 %v5577_v53  ;;  %2621 = vmatpush.bf16.msra.mxu1 %v5581_v4  ;;  %v6855_v53 = vld [vmem:[%s10253_s3 + $0x834] sm:$0xf0]  ;;  %v1142_v4 = vld [vmem:[#allocation2 + $0x10] sm:$0x4] }
 0x1e0   :  { %1121 = vmatmul.bf16.vlgmr.msrb.gmra.mxu2 %v1031_v62  ;;  %1134 = vmatmul.bf16.vlgmr.msrb.gmra.mxu3 %v1031_v62  ;;  %v4782_v62 = vld [vmem:[%s10253_s3 + $0x220] sm:$0xf]  ;;  %v1163_v28 = vunpack.c.l.b16 %v1142_v4  ;;  %v6849_v4 = vld [vmem:[%s10253_s3 + $0x804] sm:$0xf0] }
 0x1e1   :  { %1253 = vmatpush.bf16.msra.mxu2 %v4823_v8  ;;  %1266 = vmatpush.bf16.msra.mxu3 %v4827_v32  ;;  %v6663_v8 = vld [vmem:[%s10253_s3 + $0x234] sm:$0xf0]  ;;  %v6662_v32 = vld [vmem:[%s10253_s3 + $0x234] sm:$0xf] }
 0x1e2   :  { %2609 = vmatmul.bf16.vlgmr.msra.gmra.mxu0 %v2519_v2  ;;  %2622 = vmatmul.bf16.vlgmr.msra.gmra.mxu1 %v2519_v2  ;;  %v4791_v54 = vor.u32 %v6663_v8, %v4790_v40  ;;  %v4795_v59 = vor.u32 %v6662_v32, %v4792_v1  ;;  %v4774_v2 = vld [vmem:[%s10253_s3 + $0x210] sm:$0xf]  ;;  %v8536_v26 = vunpack.i.l.s16 %v1163_v28  ;;  %v6686_v40 = vld [vmem:[%s10253_s3 + $0x2f4] sm:$0xf]  ;;  %v4904_v8 = vld [vmem:[%s10253_s3 + $0x2f8] sm:$0xf0]  ;;  %v5747_v32 = vor.u32 %v6851_v22, %v5746_v21 }
 0x1e3   :  { %2870 = vmatpush.bf16.msrb.mxu0 %v5795_v63  ;;  %2883 = vmatpush.bf16.msrb.mxu1 %v5799_v12  ;;  %v6661_v63 = vld [vmem:[%s10253_s3 + $0x224] sm:$0xf0]  ;;  %v6660_v12 = vld [vmem:[%s10253_s3 + $0x224] sm:$0xf]  ;;  %v5950_v21 = vld [vmem:[%s10253_s3 + $0x968] sm:$0xf0] }
 0x1e4   :  { %v4783_v42 = vor.u32 %v6661_v63, %v4782_v62  ;;  %v4787_v15 = vor.u32 %v6660_v12, %v4784_v52  ;;  %v1168_v62 = vrot.slane %v8556_v44, 4  ;;  %v5956_v63 = vld [vmem:[%s10253_s3 + $0x970] sm:$0xf]  ;;  %v6895_v12 = vld [vmem:[%s10253_s3 + $0x974] sm:$0xf0]  ;;  %v2786_v52 = vrot.slane %v8062_v29, 7 }
 0x1e5   :  { %1254 = vmatpush.bf16.msra.mxu2 %v4815_v33  ;;  %1267 = vmatpush.bf16.msra.mxu3 %v4819_v9  ;;  %v5763_v33 = vor.u32 %v6855_v53, %v5762_v55  ;;  %v5767_v9 = vor.u32 %v6854_v60, %v5764_v41  ;;  %v4907_v41 = vor.u32 %v6686_v40, %v4904_v8  ;;  %v6685_v29 = vld [vmem:[%s10253_s3 + $0x2e4] sm:$0xf0]  ;;  %v4886_v22 = vld [vmem:[%s10253_s3 + $0x2d0] sm:$0xf]  ;;  %v5942_v40 = vld [vmem:[%s10253_s3 + $0x958] sm:$0xf0] }
 0x1e6   :  { %v4878_v8 = vld [vmem:[%s10253_s3 + $0x2c0] sm:$0xf] }
 0x1e7   :  { %2871 = vmatpush.bf16.msrb.mxu0 %v5787_v19  ;;  %2884 = vmatpush.bf16.msrb.mxu1 %v5791_v58  ;;  %v6659_v19 = vld [vmem:[%s10253_s3 + $0x214] sm:$0xf0]  ;;  %v6658_v58 = vld [vmem:[%s10253_s3 + $0x214] sm:$0xf] }
 0x1e8   :  { %v4775_v56 = vor.u32 %v6659_v19, %v4774_v2  ;;  %v4779_v24 = vor.u32 %v6658_v58, %v4776_v7  ;;  %v5948_v2 = vld [vmem:[%s10253_s3 + $0x960] sm:$0xf]  ;;  %v6893_v19 = vld [vmem:[%s10253_s3 + $0x964] sm:$0xf0] }
 0x1e9   :  { %1255 = vmatpush.bf16.msra.mxu2 %v4807_v0  ;;  %1268 = vmatpush.bf16.msra.mxu3 %v4811_v20  ;;  %v5755_v0 = vor.u32 %v6853_v25, %v5754_v11  ;;  %v5759_v20 = vor.u32 %v6852_v30, %v5756_v16  ;;  %v5957_v30 = vor.u32 %v6895_v12, %v5956_v63  ;;  %v6679_v63 = vld [vmem:[%s10253_s3 + $0x2b4] sm:$0xf0]  ;;  %v6678_v12 = vld [vmem:[%s10253_s3 + $0x2b4] sm:$0xf] }
 0x1eb   :  { %2872 = vmatpush.bf16.msrb.mxu0 %v5779_v6  ;;  %2885 = vmatpush.bf16.msrb.mxu1 %v5783_v34  ;;  %v5748_v6 = vld [vmem:[%s10253_s3 + $0x818] sm:$0xf0]  ;;  %v4766_v34 = vld [vmem:[%s10253_s3 + $0x200] sm:$0xf] }
 0x1ec   :  { %v5751_v1 = vor.u32 %v6850_v51, %v5748_v6  ;;  %v4767_v55 = vor.u32 %v6657_v35, %v4766_v34  ;;  %v6683_v51 = vld [vmem:[%s10253_s3 + $0x2d4] sm:$0xf0]  ;;  %v5949_v6 = vor.u32 %v6893_v19, %v5948_v2  ;;  %v5940_v35 = vld [vmem:[%s10253_s3 + $0x950] sm:$0xf]  ;;  %v4864_v2 = vld [vmem:[%s10253_s3 + $0x2a8] sm:$0xf0] }
 0x1ed   :  { %1256 = vmatpush.bf16.msra.mxu2 %v4799_v39  ;;  %1269 = vmatpush.bf16.msra.mxu3 %v4803_v43  ;;  %v4768_v39 = vld [vmem:[%s10253_s3 + $0x208] sm:$0xf0]  ;;  %v4902_v43 = vld [vmem:[%s10253_s3 + $0x2f0] sm:$0xf] }
 0x1ee   :  { %v4771_v53 = vor.u32 %v6656_v36, %v4768_v39  ;;  %v4903_v60 = vor.u32 %v6687_v14, %v4902_v43  ;;  %v6891_v36 = vld [vmem:[%s10253_s3 + $0x954] sm:$0xf0]  ;;  %v4887_v39 = vor.u32 %v6683_v51, %v4886_v22  ;;  %v6890_v14 = vld [vmem:[%s10253_s3 + $0x954] sm:$0xf]  ;;  %v5918_v22 = vld [vmem:[%s10253_s3 + $0x928] sm:$0xf0] }
 0x1ef   :  { %2873 = vmatpush.bf16.msrb.mxu0 %v5771_v46  ;;  %2886 = vmatpush.bf16.msrb.mxu1 %v5775_v48  ;;  %v5738_v46 = vld [vmem:[%s10253_s3 + $0x800] sm:$0xf]  ;;  %v1169_v48 = vrot.slane %v8536_v26, 3  ;;  %v4854_v51 = vld [vmem:[%s10253_s3 + $0x290] sm:$0xf] }
 0x1f0   :  { %v5739_v11 = vor.u32 %v6849_v4, %v5738_v46  ;;  %v4880_v46 = vld [vmem:[%s10253_s3 + $0x2c8] sm:$0xf0]  ;;  %v6889_v4 = vld [vmem:[%s10253_s3 + $0x944] sm:$0xf0] }
 0x1f1   :  { %1257 = vmatpush.bf16.msra.mxu2 %v4791_v54  ;;  %1270 = vmatpush.bf16.msra.mxu3 %v4795_v59  ;;  %v6848_v54 = vld [vmem:[%s10253_s3 + $0x804] sm:$0xf]  ;;  %v5740_v59 = vld [vmem:[%s10253_s3 + $0x808] sm:$0xf0]  ;;  %v1170_v28 = vsel %vm651_vm0, %v1169_v48, %v1168_v62  ;;  %v5941_v48 = vor.u32 %v6891_v36, %v5940_v35  ;;  %v4870_v62 = vld [vmem:[%s10253_s3 + $0x2b0] sm:$0xf] }
 0x1f2   :  { %v5743_v25 = vor.u32 %v6848_v54, %v5740_v59  ;;  %v1171_v58 = vpack.c.b16 %v1170_v28, %v1170_v28  ;;  %v5908_v35 = vld [vmem:[%s10253_s3 + $0x910] sm:$0xf]  ;;  %v6883_v36 = vld [vmem:[%s10253_s3 + $0x914] sm:$0xf0] }
 0x1f3   :  { %2874 = vmatpush.bf16.msrb.mxu0 %v5763_v33  ;;  %2887 = vmatpush.bf16.msrb.mxu1 %v5767_v9  ;;  %v5958_v33 = vld [vmem:[%s10253_s3 + $0x978] sm:$0xf0]  ;;  %v4894_v9 = vld [vmem:[%s10253_s3 + $0x2e0] sm:$0xf] }
 0x1f4   :  { %v5961_v16 = vor.u32 %v6894_v3, %v5958_v33  ;;  %v4895_v7 = vor.u32 %v6685_v29, %v4894_v9  ;;  %v5924_v9 = vld [vmem:[%s10253_s3 + $0x930] sm:$0xf]  ;;  %v6886_v29 = vld [vmem:[%s10253_s3 + $0x934] sm:$0xf] }
 0x1f5   :  { %1258 = vmatpush.bf16.msra.mxu2 %v4783_v42  ;;  %1271 = vmatpush.bf16.msra.mxu3 %v4787_v15  ;;  %v6684_v42 = vld [vmem:[%s10253_s3 + $0x2e4] sm:$0xf]  ;;  %v4896_v15 = vld [vmem:[%s10253_s3 + $0x2e8] sm:$0xf0] }
 0x1f6   :  { %v4899_v37 = vor.u32 %v6684_v42, %v4896_v15  ;;  %v5926_v42 = vld [vmem:[%s10253_s3 + $0x938] sm:$0xf0]  ;;  %v4862_v15 = vld [vmem:[%s10253_s3 + $0x2a0] sm:$0xf] }
 0x1f7   :  { %2875 = vmatpush.bf16.msrb.mxu0 %v5755_v0  ;;  %2888 = vmatpush.bf16.msrb.mxu1 %v5759_v20  ;;  %v2787_v0 = vsel %vm651_vm0, %v2786_v52, %v8013_v38  ;;  %v6892_v20 = vld [vmem:[%s10253_s3 + $0x964] sm:$0xf]  ;;  %v6682_v38 = vld [vmem:[%s10253_s3 + $0x2d4] sm:$0xf]  ;;  %v4872_v52 = vld [vmem:[%s10253_s3 + $0x2b8] sm:$0xf0] }
 0x1f8   :  { %v5953_v34 = vor.u32 %v6892_v20, %v5950_v21  ;;  %v4875_v28 = vor.u32 %v6678_v12, %v4872_v52  ;;  %v6884_v21 = vld [vmem:[%s10253_s3 + $0x924] sm:$0xf]  ;;  %v6881_v12 = vld [vmem:[%s10253_s3 + $0x904] sm:$0xf0] }
 0x1f9   :  { %1259 = vmatpush.bf16.msra.mxu2 %v4775_v56  ;;  %1272 = vmatpush.bf16.msra.mxu3 %v4779_v24  ;;  %v4888_v56 = vld [vmem:[%s10253_s3 + $0x2d8] sm:$0xf0]  ;;  %v2788_v24 = vpack.c.b16 %v2787_v0, %v2787_v0  ;;  %v6880_v52 = vld [vmem:[%s10253_s3 + $0x904] sm:$0xf] }
 0x1fa   :  { %v4891_v43 = vor.u32 %v6682_v38, %v4888_v56  ;;  %v6675_v38 = vld [vmem:[%s10253_s3 + $0x294] sm:$0xf0]  ;;  %v6674_v56 = vld [vmem:[%s10253_s3 + $0x294] sm:$0xf] }
 0x1fb   :  { %2876 = vmatpush.bf16.msrb.mxu0 %v5747_v32  ;;  %2889 = vmatpush.bf16.msrb.mxu1 %v5751_v1  ;;  %v6681_v32 = vld [vmem:[%s10253_s3 + $0x2c4] sm:$0xf0]  ;;  %v6680_v1 = vld [vmem:[%s10253_s3 + $0x2c4] sm:$0xf] }
 0x1fc   :  { %v4879_v54 = vor.u32 %v6681_v32, %v4878_v8  ;;  %v4883_v59 = vor.u32 %v6680_v1, %v4880_v46  ;;  %v4846_v8 = vld [vmem:[%s10253_s3 + $0x280] sm:$0xf]  ;;  %v6673_v32 = vld [vmem:[%s10253_s3 + $0x284] sm:$0xf0]  ;;  %v6672_v1 = vld [vmem:[%s10253_s3 + $0x284] sm:$0xf] }
 0x1fd   :  { %1260 = vmatpush.bf16.msra.mxu2 %v4767_v55  ;;  %1273 = vmatpush.bf16.msra.mxu3 %v4771_v53  ;;  %v5945_v55 = vor.u32 %v6890_v14, %v5942_v40  ;;  %v5932_v53 = vld [vmem:[%s10253_s3 + $0x940] sm:$0xf]  ;;  %v5910_v40 = vld [vmem:[%s10253_s3 + $0x918] sm:$0xf0]  ;;  %v4848_v46 = vld [vmem:[%s10253_s3 + $0x288] sm:$0xf0] }
 0x1fe   :  { %v5933_v3 = vor.u32 %v6889_v4, %v5932_v53  ;;  %v6702_v53 = vld [vmem:[%s10253_s3 + $0x374] sm:$0xf]  ;;  %v4986_v4 = vld [vmem:[%s10253_s3 + $0x378] sm:$0xf0] }
 0x1ff   :  { %2877 = vmatpush.bf16.msrb.mxu0 %v5739_v11  ;;  %2890 = vmatpush.bf16.msrb.mxu1 %v5743_v25  ;;  %v6887_v11 = vld [vmem:[%s10253_s3 + $0x934] sm:$0xf0]  ;;  %v4871_v25 = vor.u32 %v6679_v63, %v4870_v62  ;;  %v4847_v62 = vor.u32 %v6673_v32, %v4846_v8  ;;  %v4851_v63 = vor.u32 %v6672_v1, %v4848_v46  ;;  %v6922_v1 = vld [vmem:[%s10253_s3 + $0xa54] sm:$0xf]  ;;  %v6104_v46 = vld [vmem:[%s10253_s3 + $0xa58] sm:$0xf0] }
 0x200   :  { %1261 = vmatmul.bf16.vlgmr.msra.gmra.mxu2 %v1171_v58  ;;  %1274 = vmatmul.bf16.vlgmr.msra.gmra.mxu3 %v1171_v58  ;;  %v5925_v19 = vor.u32 %v6887_v11, %v5924_v9  ;;  %v5929_v58 = vor.u32 %v6886_v29, %v5926_v42  ;;  %v4989_v9 = vor.u32 %v6702_v53, %v4986_v4  ;;  %v6118_v11 = vld [vmem:[%s10253_s3 + $0xa70] sm:$0xf]  ;;  %v6926_v29 = vld [vmem:[%s10253_s3 + $0xa74] sm:$0xf]  ;;  %v6120_v42 = vld [vmem:[%s10253_s3 + $0xa78] sm:$0xf0] }
 0x201   :  { %1383 = vmatpush.bf16.msrb.mxu2 %v4903_v60  ;;  %1396 = vmatpush.bf16.msrb.mxu3 %v4907_v41  ;;  %v6888_v60 = vld [vmem:[%s10253_s3 + $0x944] sm:$0xf]  ;;  %v5934_v41 = vld [vmem:[%s10253_s3 + $0x948] sm:$0xf0] }
 0x202   :  { %2878 = vmatmul.bf16.vlgmr.msrb.gmra.mxu0 %v2788_v24  ;;  %2891 = vmatmul.bf16.vlgmr.msrb.gmra.mxu1 %v2788_v24  ;;  %v5937_v33 = vor.u32 %v6888_v60, %v5934_v41  ;;  %v4856_v24 = vld [vmem:[%s10253_s3 + $0x298] sm:$0xf0]  ;;  %v5900_v60 = vld [vmem:[%s10253_s3 + $0x900] sm:$0xf]  ;;  %v1299_v41 = vrot.slane %v8536_v26, 4  ;;  %v1298_v26 = vrot.slane %v8556_v44, 5 }
 0x203   :  { %3139 = vmatpush.bf16.msra.mxu0 %v5957_v30  ;;  %3152 = vmatpush.bf16.msra.mxu1 %v5961_v16  ;;  %v6677_v30 = vld [vmem:[%s10253_s3 + $0x2a4] sm:$0xf0]  ;;  %v6676_v16 = vld [vmem:[%s10253_s3 + $0x2a4] sm:$0xf]  ;;  %v4859_v14 = vor.u32 %v6674_v56, %v4856_v24  ;;  %v4976_v44 = vld [vmem:[%s10253_s3 + $0x360] sm:$0xf] }
 0x204   :  { %v4863_v0 = vor.u32 %v6677_v30, %v4862_v15  ;;  %v4867_v20 = vor.u32 %v6676_v16, %v4864_v2  ;;  %v5901_v15 = vor.u32 %v6881_v12, %v5900_v60  ;;  %v1300_v16 = vsel %vm651_vm0, %v1299_v41, %v1298_v26  ;;  %v6700_v2 = vld [vmem:[%s10253_s3 + $0x364] sm:$0xf]  ;;  %v6112_v56 = vld [vmem:[%s10253_s3 + $0xa68] sm:$0xf0]  ;;  %v4968_v24 = vld [vmem:[%s10253_s3 + $0x350] sm:$0xf] }
 0x205   :  { %1384 = vmatpush.bf16.msrb.mxu2 %v4895_v7  ;;  %1397 = vmatpush.bf16.msrb.mxu3 %v4899_v37  ;;  %v5916_v7 = vld [vmem:[%s10253_s3 + $0x920] sm:$0xf]  ;;  %v6885_v37 = vld [vmem:[%s10253_s3 + $0x924] sm:$0xf0]  ;;  %v6696_v53 = vld [vmem:[%s10253_s3 + $0x344] sm:$0xf] }
 0x206   :  { %v4962_v4 = vld [vmem:[%s10253_s3 + $0x348] sm:$0xf0]  ;;  %v6094_v60 = vld [vmem:[%s10253_s3 + $0xa40] sm:$0xf]  ;;  %v6921_v41 = vld [vmem:[%s10253_s3 + $0xa44] sm:$0xf0] }
 0x207   :  { %3140 = vmatpush.bf16.msra.mxu0 %v5949_v6  ;;  %3153 = vmatpush.bf16.msra.mxu1 %v5953_v34  ;;  %v5917_v6 = vor.u32 %v6885_v37, %v5916_v7  ;;  %v5921_v34 = vor.u32 %v6884_v21, %v5918_v22  ;;  %v6123_v37 = vor.u32 %v6926_v29, %v6120_v42  ;;  %v6695_v26 = vld [vmem:[%s10253_s3 + $0x334] sm:$0xf0]  ;;  %v6086_v42 = vld [vmem:[%s10253_s3 + $0xa30] sm:$0xf] }
 0x208   :  { %v1301_v21 = vpack.c.b16 %v1300_v16, %v1300_v16 }
 0x209   :  { %1385 = vmatpush.bf16.msrb.mxu2 %v4887_v39  ;;  %1398 = vmatpush.bf16.msrb.mxu3 %v4891_v43  ;;  %v6882_v39 = vld [vmem:[%s10253_s3 + $0x914] sm:$0xf]  ;;  %v4855_v43 = vor.u32 %v6675_v38, %v4854_v51 }
 0x20b   :  { %3141 = vmatpush.bf16.msra.mxu0 %v5941_v48  ;;  %3154 = vmatpush.bf16.msra.mxu1 %v5945_v55  ;;  %v4984_v48 = vld [vmem:[%s10253_s3 + $0x370] sm:$0xf]  ;;  %v6703_v55 = vld [vmem:[%s10253_s3 + $0x374] sm:$0xf0] }
 0x20d   :  { %1386 = vmatpush.bf16.msrb.mxu2 %v4879_v54  ;;  %1399 = vmatpush.bf16.msrb.mxu3 %v4883_v59  ;;  %v5909_v54 = vor.u32 %v6883_v36, %v5908_v35  ;;  %v5913_v59 = vor.u32 %v6882_v39, %v5910_v40  ;;  %v4970_v35 = vld [vmem:[%s10253_s3 + $0x358] sm:$0xf0]  ;;  %v6923_v40 = vld [vmem:[%s10253_s3 + $0xa54] sm:$0xf0] }
 0x20f   :  { %3142 = vmatpush.bf16.msra.mxu0 %v5933_v3  ;;  %3155 = vmatpush.bf16.msra.mxu1 %v5937_v33  ;;  %v5902_v3 = vld [vmem:[%s10253_s3 + $0x908] sm:$0xf0]  ;;  %v4985_v33 = vor.u32 %v6703_v55, %v4984_v48  ;;  %v4960_v48 = vld [vmem:[%s10253_s3 + $0x340] sm:$0xf]  ;;  %v6697_v55 = vld [vmem:[%s10253_s3 + $0x344] sm:$0xf0] }
 0x210   :  { %v5905_v30 = vor.u32 %v6880_v52, %v5902_v3  ;;  %v4961_v12 = vor.u32 %v6697_v55, %v4960_v48  ;;  %v4965_v52 = vor.u32 %v6696_v53, %v4962_v4  ;;  %v6920_v3 = vld [vmem:[%s10253_s3 + $0xa44] sm:$0xf]  ;;  %v6070_v48 = vld [vmem:[%s10253_s3 + $0xa10] sm:$0xf]  ;;  %v6915_v55 = vld [vmem:[%s10253_s3 + $0xa14] sm:$0xf0] }
 0x211   :  { %1387 = vmatpush.bf16.msrb.mxu2 %v4871_v25  ;;  %1400 = vmatpush.bf16.msrb.mxu3 %v4875_v28  ;;  %v6927_v25 = vld [vmem:[%s10253_s3 + $0xa74] sm:$0xf0]  ;;  %v3055_v28 = vrot.slane %v8182_v31, 1  ;;  %v6701_v31 = vld [vmem:[%s10253_s3 + $0x364] sm:$0xf0] }
 0x212   :  { %v6119_v7 = vor.u32 %v6927_v25, %v6118_v11  ;;  %v4977_v22 = vor.u32 %v6701_v31, %v4976_v44  ;;  %v6694_v11 = vld [vmem:[%s10253_s3 + $0x334] sm:$0xf]  ;;  %v4954_v25 = vld [vmem:[%s10253_s3 + $0x338] sm:$0xf0]  ;;  %v6919_v44 = vld [vmem:[%s10253_s3 + $0xa34] sm:$0xf0] }
 0x213   :  { %3143 = vmatpush.bf16.msra.mxu0 %v5925_v19  ;;  %3156 = vmatpush.bf16.msra.mxu1 %v5929_v58  ;;  %v4978_v19 = vld [vmem:[%s10253_s3 + $0x368] sm:$0xf0]  ;;  %v3054_v58 = vrot.slane %v8199_v45, 2  ;;  %v6924_v45 = vld [vmem:[%s10253_s3 + $0xa64] sm:$0xf] }
 0x214   :  { %v4981_v51 = vor.u32 %v6700_v2, %v4978_v19  ;;  %v4957_v2 = vor.u32 %v6694_v11, %v4954_v25  ;;  %v6918_v19 = vld [vmem:[%s10253_s3 + $0xa34] sm:$0xf]  ;;  %v6719_v25 = vld [vmem:[%s10253_s3 + $0x3f4] sm:$0xf0] }
 0x215   :  { %1388 = vmatpush.bf16.msrb.mxu2 %v4863_v0  ;;  %1401 = vmatpush.bf16.msrb.mxu3 %v4867_v20  ;;  %v6110_v0 = vld [vmem:[%s10253_s3 + $0xa60] sm:$0xf]  ;;  %v6925_v20 = vld [vmem:[%s10253_s3 + $0xa64] sm:$0xf0]  ;;  %v3056_v38 = vsel %vm651_vm0, %v3055_v28, %v3054_v58  ;;  %v6095_v28 = vor.u32 %v6921_v41, %v6094_v60  ;;  %v6088_v58 = vld [vmem:[%s10253_s3 + $0xa38] sm:$0xf0] }
 0x216   :  { %v3057_v36 = vpack.c.b16 %v3056_v38, %v3056_v38  ;;  %v6111_v39 = vor.u32 %v6925_v20, %v6110_v0  ;;  %v6692_v0 = vld [vmem:[%s10253_s3 + $0x324] sm:$0xf]  ;;  %v4946_v20 = vld [vmem:[%s10253_s3 + $0x328] sm:$0xf0]  ;;  %v6078_v38 = vld [vmem:[%s10253_s3 + $0xa20] sm:$0xf] }
 0x217   :  { %3144 = vmatpush.bf16.msra.mxu0 %v5917_v6  ;;  %3157 = vmatpush.bf16.msra.mxu1 %v5921_v34  ;;  %v6699_v6 = vld [vmem:[%s10253_s3 + $0x354] sm:$0xf0]  ;;  %v6698_v34 = vld [vmem:[%s10253_s3 + $0x354] sm:$0xf] }
 0x218   :  { %v4969_v8 = vor.u32 %v6699_v6, %v4968_v24  ;;  %v4973_v32 = vor.u32 %v6698_v34, %v4970_v35  ;;  %v4949_v35 = vor.u32 %v6692_v0, %v4946_v20  ;;  %v6914_v53 = vld [vmem:[%s10253_s3 + $0xa14] sm:$0xf]  ;;  %v6912_v0 = vld [vmem:[%s10253_s3 + $0xa04] sm:$0xf]  ;;  %v6064_v20 = vld [vmem:[%s10253_s3 + $0xa08] sm:$0xf0] }
 0x219   :  { %1389 = vmatpush.bf16.msrb.mxu2 %v4855_v43  ;;  %1402 = vmatpush.bf16.msrb.mxu3 %v4859_v14  ;;  %v6115_v43 = vor.u32 %v6924_v45, %v6112_v56  ;;  %v6102_v14 = vld [vmem:[%s10253_s3 + $0xa50] sm:$0xf]  ;;  %v6917_v45 = vld [vmem:[%s10253_s3 + $0xa24] sm:$0xf0] }
 0x21b   :  { %3145 = vmatpush.bf16.msra.mxu0 %v5909_v54  ;;  %3158 = vmatpush.bf16.msra.mxu1 %v5913_v59  ;;  %v6103_v54 = vor.u32 %v6923_v40, %v6102_v14  ;;  %v6107_v59 = vor.u32 %v6922_v1, %v6104_v46  ;;  %v6691_v14 = vld [vmem:[%s10253_s3 + $0x314] sm:$0xf0]  ;;  %v6690_v40 = vld [vmem:[%s10253_s3 + $0x314] sm:$0xf]  ;;  %v6079_v1 = vor.u32 %v6917_v45, %v6078_v38  ;;  %v6280_v38 = vld [vmem:[%s10253_s3 + $0xb70] sm:$0xf] }
 0x21c   :  { %v6959_v45 = vld [vmem:[%s10253_s3 + $0xb74] sm:$0xf0] }
 0x21d   :  { %1390 = vmatpush.bf16.msrb.mxu2 %v4847_v62  ;;  %1403 = vmatpush.bf16.msrb.mxu3 %v4851_v63 }
 0x21f   :  { %3146 = vmatpush.bf16.msra.mxu0 %v5901_v15  ;;  %3159 = vmatpush.bf16.msra.mxu1 %v5905_v30  ;;  %v8861_v62 = vpop.f32.mrf.mxu0  ;;  %v8863_v63 = vpop.f32.mrf.mxu1  ;;  %v1412_v15 = vld [vmem:[#allocation2 + $0x10] sm:$0x8] }
 0x220   :  { %1391 = vmatmul.bf16.vlgmr.msrb.gmra.mxu2 %v1301_v21  ;;  %1404 = vmatmul.bf16.vlgmr.msrb.gmra.mxu3 %v1301_v21  ;;  %v1411_v21 = vld [vmem:[#allocation2] sm:$0x8]  ;;  %v1433_v56 = vunpack.c.l.b16 %v1412_v15 }
 0x221   :  { %1523 = vmatpush.bf16.msra.mxu2 %v4985_v33  ;;  %1536 = vmatpush.bf16.msra.mxu3 %v4989_v9  ;;  %v6096_v33 = vld [vmem:[%s10253_s3 + $0xa48] sm:$0xf0]  ;;  %v4952_v9 = vld [vmem:[%s10253_s3 + $0x330] sm:$0xf]  ;;  %v6062_v15 = vld [vmem:[%s10253_s3 + $0xa00] sm:$0xf] }
 0x222   :  { %3147 = vmatmul.bf16.vlgmr.msra.gmra.mxu0 %v3057_v36  ;;  %3160 = vmatmul.bf16.vlgmr.msra.gmra.mxu1 %v3057_v36  ;;  %v6099_v29 = vor.u32 %v6920_v3, %v6096_v33  ;;  %v4953_v31 = vor.u32 %v6695_v26, %v4952_v9  ;;  %v6916_v36 = vld [vmem:[%s10253_s3 + $0xa24] sm:$0xf]  ;;  %v8944_v4 = vunpack.i.l.s16 %v1433_v56  ;;  %v6689_v3 = vld [vmem:[%s10253_s3 + $0x304] sm:$0xf0]  ;;  %v4930_v9 = vld [vmem:[%s10253_s3 + $0x308] sm:$0xf0] }
 0x223   :  { %3409 = vmatpush.bf16.msrb.mxu0 %v6119_v7  ;;  %3422 = vmatpush.bf16.msrb.mxu1 %v6123_v37  ;;  %v8889_v30 = vpop.f32.mrf.mxu2  ;;  %v8891_v16 = vpop.f32.mrf.mxu3  ;;  %v4944_v7 = vld [vmem:[%s10253_s3 + $0x320] sm:$0xf]  ;;  %v6693_v37 = vld [vmem:[%s10253_s3 + $0x324] sm:$0xf0]  ;;  %v6688_v33 = vld [vmem:[%s10253_s3 + $0x304] sm:$0xf] }
 0x224   :  { %v4945_v34 = vor.u32 %v6693_v37, %v4944_v7  ;;  %v5064_v26 = vld [vmem:[%s10253_s3 + $0x3f0] sm:$0xf]  ;;  %v4933_v7 = vor.u32 %v6688_v33, %v4930_v9  ;;  %v6913_v37 = vld [vmem:[%s10253_s3 + $0xa04] sm:$0xf0]  ;;  %v3325_v56 = vrot.slane %v8216_v61, 3 }
 0x225   :  { %1524 = vmatpush.bf16.msra.mxu2 %v4977_v22  ;;  %1537 = vmatpush.bf16.msra.mxu3 %v4981_v51  ;;  %v6087_v22 = vor.u32 %v6919_v44, %v6086_v42  ;;  %v6091_v51 = vor.u32 %v6918_v19, %v6088_v58  ;;  %v6071_v42 = vor.u32 %v6915_v55, %v6070_v48  ;;  %v6717_v61 = vld [vmem:[%s10253_s3 + $0x3e4] sm:$0xf0]  ;;  %v5050_v33 = vld [vmem:[%s10253_s3 + $0x3d8] sm:$0xf0] }
 0x227   :  { %3410 = vmatpush.bf16.msrb.mxu0 %v6111_v39  ;;  %3423 = vmatpush.bf16.msrb.mxu1 %v6115_v43  ;;  %v1803_v24 = vpop.f32.mrf.mxu0  ;;  %v1816_v6 = vpop.f32.mrf.mxu1  ;;  %v6080_v39 = vld [vmem:[%s10253_s3 + $0xa28] sm:$0xf0]  ;;  %v4936_v43 = vld [vmem:[%s10253_s3 + $0x310] sm:$0xf] }
 0x228   :  { %v6083_v46 = vor.u32 %v6916_v36, %v6080_v39  ;;  %v4937_v60 = vor.u32 %v6691_v14, %v4936_v43  ;;  %v6958_v24 = vld [vmem:[%s10253_s3 + $0xb74] sm:$0xf]  ;;  %v6282_v6 = vld [vmem:[%s10253_s3 + $0xb78] sm:$0xf0]  ;;  %v6067_v36 = vor.u32 %v6912_v0, %v6064_v20  ;;  %v6716_v43 = vld [vmem:[%s10253_s3 + $0x3e4] sm:$0xf] }
 0x229   :  { %1525 = vmatpush.bf16.msra.mxu2 %v4969_v8  ;;  %1538 = vmatpush.bf16.msra.mxu3 %v4973_v32  ;;  %v4938_v8 = vld [vmem:[%s10253_s3 + $0x318] sm:$0xf0]  ;;  %v1432_v32 = vunpack.c.l.b16 %v1411_v21  ;;  %v5065_v21 = vor.u32 %v6719_v25, %v5064_v26  ;;  %v5058_v14 = vld [vmem:[%s10253_s3 + $0x3e8] sm:$0xf0]  ;;  %v6285_v55 = vor.u32 %v6958_v24, %v6282_v6  ;;  %v6713_v0 = vld [vmem:[%s10253_s3 + $0x3c4] sm:$0xf0] }
 0x22a   :  { %v4941_v41 = vor.u32 %v6690_v40, %v4938_v8  ;;  %v6712_v20 = vld [vmem:[%s10253_s3 + $0x3c4] sm:$0xf]  ;;  %v6953_v24 = vld [vmem:[%s10253_s3 + $0xb44] sm:$0xf0] }
 0x22b   :  { %3411 = vmatpush.bf16.msrb.mxu0 %v6103_v54  ;;  %3424 = vmatpush.bf16.msrb.mxu1 %v6107_v59  ;;  %v746_v54 = vpop.f32.mrf.mxu2  ;;  %v759_v59 = vpop.f32.mrf.mxu3  ;;  %v8964_v11 = vunpack.i.l.s16 %v1432_v32  ;;  %v6281_v32 = vor.u32 %v6959_v45, %v6280_v38 }
 0x22c   :  { %v6957_v54 = vld [vmem:[%s10253_s3 + $0xb64] sm:$0xf0] }
 0x22d   :  { %1526 = vmatpush.bf16.msra.mxu2 %v4961_v12  ;;  %1539 = vmatpush.bf16.msra.mxu3 %v4965_v52  ;;  %v6072_v12 = vld [vmem:[%s10253_s3 + $0xa18] sm:$0xf0]  ;;  %v4928_v52 = vld [vmem:[%s10253_s3 + $0x300] sm:$0xf] }
 0x22e   :  { %v6075_v44 = vor.u32 %v6914_v53, %v6072_v12  ;;  %v4929_v58 = vor.u32 %v6689_v3, %v4928_v52  ;;  %v6272_v53 = vld [vmem:[%s10253_s3 + $0xb60] sm:$0xf]  ;;  %v5048_v12 = vld [vmem:[%s10253_s3 + $0x3d0] sm:$0xf]  ;;  %v6715_v52 = vld [vmem:[%s10253_s3 + $0x3d4] sm:$0xf0] }
 0x22f   :  { %3412 = vmatpush.bf16.msrb.mxu0 %v6095_v28  ;;  %3425 = vmatpush.bf16.msrb.mxu1 %v6099_v29  ;;  %v6718_v28 = vld [vmem:[%s10253_s3 + $0x3f4] sm:$0xf]  ;;  %v5066_v29 = vld [vmem:[%s10253_s3 + $0x3f8] sm:$0xf0]  ;;  %v8981_v19 = vpop.f32.mrf.mxu1 }
 0x230   :  { %v6714_v3 = vld [vmem:[%s10253_s3 + $0x3d4] sm:$0xf] }
 0x231   :  { %1527 = vmatpush.bf16.msra.mxu2 %v4953_v31  ;;  %1540 = vmatpush.bf16.msra.mxu3 %v4957_v2  ;;  %v1439_v31 = vrot.slane %v8944_v4, 5  ;;  %v8979_v2 = vpop.f32.mrf.mxu0 }
 0x233   :  { %3413 = vmatpush.bf16.msrb.mxu0 %v6087_v22  ;;  %3426 = vmatpush.bf16.msrb.mxu1 %v6091_v51  ;;  %v5069_v22 = vor.u32 %v6718_v28, %v5066_v29  ;;  %v1438_v51 = vrot.slane %v8964_v11, 6  ;;  %v854_v40 = vpop.f32.mrf.mxu2  ;;  %v867_v8 = vpop.f32.mrf.mxu3  ;;  %v6273_v28 = vor.u32 %v6957_v54, %v6272_v53  ;;  %v6951_v53 = vld [vmem:[%s10253_s3 + $0xb34] sm:$0xf0]  ;;  %v6950_v54 = vld [vmem:[%s10253_s3 + $0xb34] sm:$0xf] }
 0x234   :  { %v9024_v48 = vadd.f32 %v867_v8, %v8891_v16  ;;  %v6274_v16 = vld [vmem:[%s10253_s3 + $0xb68] sm:$0xf0] }
 0x235   :  { %1528 = vmatpush.bf16.msra.mxu2 %v4945_v34  ;;  %1541 = vmatpush.bf16.msra.mxu3 %v4949_v35  ;;  %v5056_v34 = vld [vmem:[%s10253_s3 + $0x3e0] sm:$0xf]  ;;  %v6063_v35 = vor.u32 %v6913_v37, %v6062_v15  ;;  %v1440_v39 = vsel %vm651_vm0, %v1439_v31, %v1438_v51  ;;  %v5049_v15 = vor.u32 %v6715_v52, %v5048_v12  ;;  %v5026_v12 = vld [vmem:[%s10253_s3 + $0x3a8] sm:$0xf0] }
 0x236   :  { %v1441_v59 = vpack.c.b16 %v1440_v39, %v1440_v39  ;;  %v5053_v31 = vor.u32 %v6714_v3, %v5050_v33  ;;  %v5040_v37 = vld [vmem:[%s10253_s3 + $0x3c0] sm:$0xf]  ;;  %v5032_v39 = vld [vmem:[%s10253_s3 + $0x3b0] sm:$0xf] }
 0x237   :  { %3414 = vmatpush.bf16.msrb.mxu0 %v6079_v1  ;;  %3427 = vmatpush.bf16.msrb.mxu1 %v6083_v46  ;;  %v3324_v1 = vrot.slane %v8201_v13, 4  ;;  %v9021_v46 = vadd.f32 %v854_v40, %v8889_v30  ;;  %v5061_v13 = vor.u32 %v6716_v43, %v5058_v14  ;;  %v6956_v30 = vld [vmem:[%s10253_s3 + $0xb64] sm:$0xf]  ;;  %v2085_v26 = vpop.f32.mrf.mxu1  ;;  %v5041_v6 = vor.u32 %v6713_v0, %v5040_v37  ;;  %v6710_v43 = vld [vmem:[%s10253_s3 + $0x3b4] sm:$0xf] }
 0x238   :  { %v6277_v29 = vor.u32 %v6956_v30, %v6274_v16  ;;  %v5034_v14 = vld [vmem:[%s10253_s3 + $0x3b8] sm:$0xf0]  ;;  %v6709_v30 = vld [vmem:[%s10253_s3 + $0x3a4] sm:$0xf0]  ;;  %v6708_v16 = vld [vmem:[%s10253_s3 + $0x3a4] sm:$0xf] }
 0x239   :  { %1529 = vmatpush.bf16.msra.mxu2 %v4937_v60  ;;  %1542 = vmatpush.bf16.msra.mxu3 %v4941_v41  ;;  %v5057_v60 = vor.u32 %v6717_v61, %v5056_v34  ;;  %v3326_v41 = vsel %vm651_vm0, %v3325_v56, %v3324_v1  ;;  %v2072_v9 = vpop.f32.mrf.mxu0  ;;  %v6256_v56 = vld [vmem:[%s10253_s3 + $0xb40] sm:$0xf]  ;;  %v6711_v61 = vld [vmem:[%s10253_s3 + $0x3b4] sm:$0xf0] }
 0x23a   :  { %v3327_v25 = vpack.c.b16 %v3326_v41, %v3326_v41  ;;  %v5024_v41 = vld [vmem:[%s10253_s3 + $0x3a0] sm:$0xf] }
 0x23b   :  { %3415 = vmatpush.bf16.msrb.mxu0 %v6071_v42  ;;  %3428 = vmatpush.bf16.msrb.mxu1 %v6075_v44  ;;  %v6264_v42 = vld [vmem:[%s10253_s3 + $0xb50] sm:$0xf]  ;;  %v6955_v44 = vld [vmem:[%s10253_s3 + $0xb54] sm:$0xf0]  ;;  %v869_v51 = vpop.f32.mrf.mxu3  ;;  %v5025_v26 = vor.u32 %v6709_v30, %v5024_v41  ;;  %v6945_v41 = vld [vmem:[%s10253_s3 + $0xb04] sm:$0xf0] }
 0x23c   :  { %v6265_v38 = vor.u32 %v6955_v44, %v6264_v42  ;;  %v5029_v44 = vor.u32 %v6708_v16, %v5026_v12  ;;  %v6947_v51 = vld [vmem:[%s10253_s3 + $0xb14] sm:$0xf0]  ;;  %v6944_v30 = vld [vmem:[%s10253_s3 + $0xb04] sm:$0xf]  ;;  %v6226_v16 = vld [vmem:[%s10253_s3 + $0xb08] sm:$0xf0] }
 0x23d   :  { %1530 = vmatpush.bf16.msra.mxu2 %v4929_v58  ;;  %1543 = vmatpush.bf16.msra.mxu3 %v4933_v7  ;;  %v6954_v58 = vld [vmem:[%s10253_s3 + $0xb54] sm:$0xf]  ;;  %v6266_v7 = vld [vmem:[%s10253_s3 + $0xb58] sm:$0xf0] }
 0x23e   :  { %v6269_v45 = vor.u32 %v6954_v58, %v6266_v7  ;;  %v5016_v58 = vld [vmem:[%s10253_s3 + $0x390] sm:$0xf]  ;;  %v5018_v7 = vld [vmem:[%s10253_s3 + $0x398] sm:$0xf0] }
 0x23f   :  { %3416 = vmatpush.bf16.msrb.mxu0 %v6063_v35  ;;  %3429 = vmatpush.bf16.msrb.mxu1 %v6067_v36  ;;  %v6952_v35 = vld [vmem:[%s10253_s3 + $0xb44] sm:$0xf]  ;;  %v6258_v36 = vld [vmem:[%s10253_s3 + $0xb48] sm:$0xf0]  ;;  %v9101_v8 = vpop.f32.mrf.mxu1 }
 0x240   :  { %1531 = vmatmul.bf16.vlgmr.msra.gmra.mxu2 %v1441_v59  ;;  %1544 = vmatmul.bf16.vlgmr.msra.gmra.mxu3 %v1441_v59  ;;  %v6261_v1 = vor.u32 %v6952_v35, %v6258_v36  ;;  %v5033_v59 = vor.u32 %v6711_v61, %v5032_v39  ;;  %v6704_v35 = vld [vmem:[%s10253_s3 + $0x384] sm:$0xf]  ;;  %v5010_v36 = vld [vmem:[%s10253_s3 + $0x388] sm:$0xf0]  ;;  %v5226_v39 = vld [vmem:[%s10253_s3 + $0x4f0] sm:$0xf] }
 0x241   :  { %1653 = vmatpush.bf16.msrb.mxu2 %v5065_v21  ;;  %1666 = vmatpush.bf16.msrb.mxu3 %v5069_v22  ;;  %v5042_v21 = vld [vmem:[%s10253_s3 + $0x3c8] sm:$0xf0]  ;;  %v856_v22 = vpop.f32.mrf.mxu2  ;;  %v9099_v40 = vpop.f32.mrf.mxu0  ;;  %v6751_v61 = vld [vmem:[%s10253_s3 + $0x4f4] sm:$0xf0] }
 0x242   :  { %3417 = vmatmul.bf16.vlgmr.msrb.gmra.mxu0 %v3327_v25  ;;  %3430 = vmatmul.bf16.vlgmr.msrb.gmra.mxu1 %v3327_v25  ;;  %v5045_v34 = vor.u32 %v6712_v20, %v5042_v21  ;;  %v6240_v25 = vld [vmem:[%s10253_s3 + $0xb20] sm:$0xf]  ;;  %v6232_v22 = vld [vmem:[%s10253_s3 + $0xb10] sm:$0xf]  ;;  %v5227_v12 = vor.u32 %v6751_v61, %v5226_v39  ;;  %v6987_v61 = vld [vmem:[%s10253_s3 + $0xc54] sm:$0xf0] }
 0x243   :  { %3679 = vmatpush.bf16.msra.mxu0 %v6281_v32  ;;  %3692 = vmatpush.bf16.msra.mxu1 %v6285_v55  ;;  %v6257_v32 = vor.u32 %v6953_v24, %v6256_v56  ;;  %v6248_v55 = vld [vmem:[%s10253_s3 + $0xb30] sm:$0xf]  ;;  %v1005_v3 = vpop.f32.mrf.mxu3  ;;  %v6234_v24 = vld [vmem:[%s10253_s3 + $0xb18] sm:$0xf0] }
 0x244   :  { %v6249_v33 = vor.u32 %v6951_v53, %v6248_v55  ;;  %v9137_v42 = vadd.f32 %v1005_v3, %v9024_v48  ;;  %v6706_v48 = vld [vmem:[%s10253_s3 + $0x394] sm:$0xf]  ;;  %v6233_v55 = vor.u32 %v6947_v51, %v6232_v22  ;;  %v6442_v3 = vld [vmem:[%s10253_s3 + $0xc70] sm:$0xf] }
 0x245   :  { %1654 = vmatpush.bf16.msrb.mxu2 %v5057_v60  ;;  %1667 = vmatpush.bf16.msrb.mxu3 %v5061_v13  ;;  %v5037_v60 = vor.u32 %v6710_v43, %v5034_v14  ;;  %v6250_v13 = vld [vmem:[%s10253_s3 + $0xb38] sm:$0xf0]  ;;  %v5021_v56 = vor.u32 %v6706_v48, %v5018_v7  ;;  %v6750_v43 = vld [vmem:[%s10253_s3 + $0x4f4] sm:$0xf]  ;;  %v6426_v39 = vld [vmem:[%s10253_s3 + $0xc50] sm:$0xf] }
 0x246   :  { %v6253_v9 = vor.u32 %v6950_v54, %v6250_v13  ;;  %v5228_v14 = vld [vmem:[%s10253_s3 + $0x4f8] sm:$0xf0]  ;;  %v6224_v54 = vld [vmem:[%s10253_s3 + $0xb00] sm:$0xf]  ;;  %v5013_v13 = vor.u32 %v6704_v35, %v5010_v36 }
 0x247   :  { %3680 = vmatpush.bf16.msra.mxu0 %v6273_v28  ;;  %3693 = vmatpush.bf16.msra.mxu1 %v6277_v29  ;;  %v6949_v28 = vld [vmem:[%s10253_s3 + $0xb24] sm:$0xf0]  ;;  %v2355_v0 = vpop.f32.mrf.mxu1 }
 0x248   :  { %v6241_v20 = vor.u32 %v6949_v28, %v6240_v25  ;;  %v6444_v25 = vld [vmem:[%s10253_s3 + $0xc78] sm:$0xf0]  ;;  %v6225_v28 = vor.u32 %v6945_v41, %v6224_v54  ;;  %v6989_v0 = vld [vmem:[%s10253_s3 + $0xc64] sm:$0xf0]  ;;  %v6744_v54 = vld [vmem:[%s10253_s3 + $0x4c4] sm:$0xf] }
 0x249   :  { %1655 = vmatpush.bf16.msrb.mxu2 %v5049_v15  ;;  %1668 = vmatpush.bf16.msrb.mxu3 %v5053_v31  ;;  %v992_v52 = vpop.f32.mrf.mxu2  ;;  %v6948_v15 = vld [vmem:[%s10253_s3 + $0xb24] sm:$0xf]  ;;  %v6242_v31 = vld [vmem:[%s10253_s3 + $0xb28] sm:$0xf0]  ;;  %v2342_v37 = vpop.f32.mrf.mxu0  ;;  %v6418_v41 = vld [vmem:[%s10253_s3 + $0xc40] sm:$0xf] }
 0x24a   :  { %v9134_v29 = vadd.f32 %v992_v52, %v9021_v46  ;;  %v6707_v46 = vld [vmem:[%s10253_s3 + $0x394] sm:$0xf0]  ;;  %v6245_v21 = vor.u32 %v6948_v15, %v6242_v31  ;;  %v5231_v52 = vor.u32 %v6750_v43, %v5228_v14  ;;  %v6748_v31 = vld [vmem:[%s10253_s3 + $0x4e4] sm:$0xf]  ;;  %v6434_v37 = vld [vmem:[%s10253_s3 + $0xc60] sm:$0xf] }
 0x24b   :  { %3681 = vmatpush.bf16.msra.mxu0 %v6265_v38  ;;  %3694 = vmatpush.bf16.msra.mxu1 %v6269_v45  ;;  %v6946_v38 = vld [vmem:[%s10253_s3 + $0xb14] sm:$0xf]  ;;  %v5017_v45 = vor.u32 %v6707_v46, %v5016_v58  ;;  %v5220_v58 = vld [vmem:[%s10253_s3 + $0x4e8] sm:$0xf0]  ;;  %v3594_v46 = vrot.slane %v8243_v17, 6  ;;  %v6435_v35 = vor.u32 %v6989_v0, %v6434_v37 }
 0x24c   :  { %v6237_v53 = vor.u32 %v6946_v38, %v6234_v24  ;;  %v5223_v22 = vor.u32 %v6748_v31, %v5220_v58  ;;  %v6988_v17 = vld [vmem:[%s10253_s3 + $0xc64] sm:$0xf]  ;;  %v6436_v38 = vld [vmem:[%s10253_s3 + $0xc68] sm:$0xf0]  ;;  %v6746_v24 = vld [vmem:[%s10253_s3 + $0x4d4] sm:$0xf] }
 0x24d   :  { %1656 = vmatpush.bf16.msrb.mxu2 %v5041_v6  ;;  %1669 = vmatpush.bf16.msrb.mxu3 %v5045_v34  ;;  %v5008_v6 = vld [vmem:[%s10253_s3 + $0x380] sm:$0xf]  ;;  %v6705_v34 = vld [vmem:[%s10253_s3 + $0x384] sm:$0xf0]  ;;  %v6439_v36 = vor.u32 %v6988_v17, %v6436_v38  ;;  %v3838_v38 = vld [vmem:[#allocation2 + $0x1c] sm:$0x1] }
 0x24f   :  { %3682 = vmatpush.bf16.msra.mxu0 %v6257_v32  ;;  %3695 = vmatpush.bf16.msra.mxu1 %v6261_v1  ;;  %v1007_v1 = vpop.f32.mrf.mxu3 }
 0x250   :  { %v6428_v1 = vld [vmem:[%s10253_s3 + $0xc58] sm:$0xf0] }
 0x251   :  { %1657 = vmatpush.bf16.msrb.mxu2 %v5033_v59  ;;  %1670 = vmatpush.bf16.msrb.mxu3 %v5037_v60  ;;  %v994_v32 = vpop.f32.mrf.mxu2  ;;  %v1569_v59 = vrot.slane %v8944_v4, 6  ;;  %v5009_v60 = vor.u32 %v6705_v34, %v5008_v6  ;;  %v1568_v4 = vrot.slane %v8964_v11, 7  ;;  %v5218_v11 = vld [vmem:[%s10253_s3 + $0x4e0] sm:$0xf]  ;;  %v5212_v6 = vld [vmem:[%s10253_s3 + $0x4d8] sm:$0xf0] }
 0x252   :  { %v5215_v14 = vor.u32 %v6746_v24, %v5212_v6  ;;  %v6986_v32 = vld [vmem:[%s10253_s3 + $0xc54] sm:$0xf]  ;;  %v6402_v24 = vld [vmem:[%s10253_s3 + $0xc20] sm:$0xf]  ;;  %v6981_v6 = vld [vmem:[%s10253_s3 + $0xc24] sm:$0xf0] }
 0x253   :  { %3683 = vmatpush.bf16.msra.mxu0 %v6249_v33  ;;  %3696 = vmatpush.bf16.msra.mxu1 %v6253_v9  ;;  %v6991_v33 = vld [vmem:[%s10253_s3 + $0xc74] sm:$0xf0]  ;;  %v3595_v9 = vrot.slane %v8254_v27, 5  ;;  %v1570_v15 = vsel %vm651_vm0, %v1569_v59, %v1568_v4  ;;  %v6749_v27 = vld [vmem:[%s10253_s3 + $0x4e4] sm:$0xf0] }
 0x254   :  { %v6443_v48 = vor.u32 %v6991_v33, %v6442_v3  ;;  %v5204_v59 = vld [vmem:[%s10253_s3 + $0x4c8] sm:$0xf0]  ;;  %v5194_v3 = vld [vmem:[%s10253_s3 + $0x4b0] sm:$0xf]  ;;  %v6743_v33 = vld [vmem:[%s10253_s3 + $0x4b4] sm:$0xf0] }
 0x255   :  { %1658 = vmatpush.bf16.msrb.mxu2 %v5025_v26  ;;  %1671 = vmatpush.bf16.msrb.mxu3 %v5029_v44  ;;  %v6990_v26 = vld [vmem:[%s10253_s3 + $0xc74] sm:$0xf]  ;;  %v6229_v44 = vor.u32 %v6944_v30, %v6226_v16  ;;  %v3596_v51 = vsel %vm651_vm0, %v3595_v9, %v3594_v46  ;;  %v6985_v30 = vld [vmem:[%s10253_s3 + $0xc44] sm:$0xf0]  ;;  %v6420_v4 = vld [vmem:[%s10253_s3 + $0xc48] sm:$0xf0]  ;;  %v5195_v31 = vor.u32 %v6743_v33, %v5194_v3 }
 0x256   :  { %v6447_v7 = vor.u32 %v6990_v26, %v6444_v25  ;;  %v3597_v34 = vpack.c.b16 %v3596_v51, %v3596_v51  ;;  %v6742_v9 = vld [vmem:[%s10253_s3 + $0x4b4] sm:$0xf]  ;;  %v5196_v26 = vld [vmem:[%s10253_s3 + $0x4b8] sm:$0xf0]  ;;  %v6736_v33 = vld [vmem:[%s10253_s3 + $0x484] sm:$0xf] }
 0x257   :  { %3684 = vmatpush.bf16.msra.mxu0 %v6241_v20  ;;  %3697 = vmatpush.bf16.msra.mxu1 %v6245_v21  ;;  %v1571_v20 = vpack.c.b16 %v1570_v15, %v1570_v15  ;;  %v5219_v21 = vor.u32 %v6749_v27, %v5218_v11  ;;  %v6410_v15 = vld [vmem:[%s10253_s3 + $0xc30] sm:$0xf]  ;;  %v6983_v27 = vld [vmem:[%s10253_s3 + $0xc34] sm:$0xf0]  ;;  %v5199_v58 = vor.u32 %v6742_v9, %v5196_v26  ;;  %v6982_v46 = vld [vmem:[%s10253_s3 + $0xc34] sm:$0xf] }
 0x258   :  { %v5172_v9 = vld [vmem:[%s10253_s3 + $0x488] sm:$0xf0]  ;;  %v5388_v26 = vld [vmem:[%s10253_s3 + $0x5f0] sm:$0xf] }
 0x259   :  { %1659 = vmatpush.bf16.msrb.mxu2 %v5017_v45  ;;  %1672 = vmatpush.bf16.msrb.mxu3 %v5021_v56  ;;  %v5210_v45 = vld [vmem:[%s10253_s3 + $0x4d0] sm:$0xf]  ;;  %v6747_v56 = vld [vmem:[%s10253_s3 + $0x4d4] sm:$0xf0] }
 0x25a   :  { %v5211_v43 = vor.u32 %v6747_v56, %v5210_v45  ;;  %v6411_v45 = vor.u32 %v6983_v27, %v6410_v15  ;;  %v6782_v15 = vld [vmem:[%s10253_s3 + $0x5f4] sm:$0xf]  ;;  %v5390_v27 = vld [vmem:[%s10253_s3 + $0x5f8] sm:$0xf0] }
 0x25b   :  { %3685 = vmatpush.bf16.msra.mxu0 %v6233_v55  ;;  %3698 = vmatpush.bf16.msra.mxu1 %v6237_v53  ;;  %v5202_v55 = vld [vmem:[%s10253_s3 + $0x4c0] sm:$0xf]  ;;  %v6745_v53 = vld [vmem:[%s10253_s3 + $0x4c4] sm:$0xf0] }
 0x25c   :  { %v5203_v16 = vor.u32 %v6745_v53, %v5202_v55  ;;  %v3837_v55 = vld [vmem:[#allocation2 + $0xc] sm:$0x1]  ;;  %v6403_v53 = vor.u32 %v6981_v6, %v6402_v24  ;;  %v6781_v24 = vld [vmem:[%s10253_s3 + $0x5e4] sm:$0xf0]  ;;  %v6780_v6 = vld [vmem:[%s10253_s3 + $0x5e4] sm:$0xf] }
 0x25d   :  { %1660 = vmatpush.bf16.msrb.mxu2 %v5009_v60  ;;  %1673 = vmatpush.bf16.msrb.mxu3 %v5013_v13  ;;  %v6427_v60 = vor.u32 %v6987_v61, %v6426_v39  ;;  %v6431_v13 = vor.u32 %v6986_v32, %v6428_v1  ;;  %v6739_v39 = vld [vmem:[%s10253_s3 + $0x494] sm:$0xf0]  ;;  %v6738_v61 = vld [vmem:[%s10253_s3 + $0x494] sm:$0xf] }
 0x25f   :  { %3686 = vmatpush.bf16.msra.mxu0 %v6225_v28  ;;  %3699 = vmatpush.bf16.msra.mxu1 %v6229_v44  ;;  %v9307_v25 = vpop.f32.mrf.mxu0  ;;  %v9309_v11 = vpop.f32.mrf.mxu1  ;;  %v6419_v28 = vor.u32 %v6985_v30, %v6418_v41 }
 0x260   :  { %1661 = vmatmul.bf16.vlgmr.msrb.gmra.mxu2 %v1571_v20  ;;  %1674 = vmatmul.bf16.vlgmr.msrb.gmra.mxu3 %v1571_v20  ;;  %v6741_v20 = vld [vmem:[%s10253_s3 + $0x4a4] sm:$0xf0] }
 0x261   :  { %1921 = vmatpush.bf16.msra.mxu2 %v5227_v12  ;;  %1934 = vmatpush.bf16.msra.mxu3 %v5231_v52  ;;  %v5207_v12 = vor.u32 %v6744_v54, %v5204_v59  ;;  %v6984_v52 = vld [vmem:[%s10253_s3 + $0xc44] sm:$0xf]  ;;  %v6394_v59 = vld [vmem:[%s10253_s3 + $0xc10] sm:$0xf] }
 0x262   :  { %3687 = vmatmul.bf16.vlgmr.msra.gmra.mxu0 %v3597_v34  ;;  %3700 = vmatmul.bf16.vlgmr.msra.gmra.mxu1 %v3597_v34  ;;  %v6423_v44 = vor.u32 %v6984_v52, %v6420_v4  ;;  %v6737_v52 = vld [vmem:[%s10253_s3 + $0x484] sm:$0xf0] }
 0x263   :  { %3948 = vmatpush.bf16.msrb.mxu0 %v6443_v48  ;;  %3961 = vmatpush.bf16.msrb.mxu1 %v6447_v7  ;;  %v6412_v48 = vld [vmem:[%s10253_s3 + $0xc38] sm:$0xf0]  ;;  %v5186_v7 = vld [vmem:[%s10253_s3 + $0x4a0] sm:$0xf]  ;;  %v1122_v37 = vpop.f32.mrf.mxu2  ;;  %v1135_v0 = vpop.f32.mrf.mxu3 }
 0x264   :  { %v9336_v51 = vadd.f32 %v1122_v37, %v9134_v29  ;;  %v9339_v17 = vadd.f32 %v1135_v0, %v9137_v42  ;;  %v6415_v56 = vor.u32 %v6982_v46, %v6412_v48  ;;  %v5187_v29 = vor.u32 %v6741_v20, %v5186_v7  ;;  %v6980_v42 = vld [vmem:[%s10253_s3 + $0xc24] sm:$0xf]  ;;  %v6386_v46 = vld [vmem:[%s10253_s3 + $0xc00] sm:$0xf]  ;;  %v6977_v0 = vld [vmem:[%s10253_s3 + $0xc04] sm:$0xf0] }
 0x265   :  { %1922 = vmatpush.bf16.msra.mxu2 %v5219_v21  ;;  %1935 = vmatpush.bf16.msra.mxu3 %v5223_v22  ;;  %v6740_v21 = vld [vmem:[%s10253_s3 + $0x4a4] sm:$0xf]  ;;  %v5188_v22 = vld [vmem:[%s10253_s3 + $0x4a8] sm:$0xf0]  ;;  %v3858_v48 = vunpack.c.l.b16 %v3837_v55  ;;  %v5175_v37 = vor.u32 %v6736_v33, %v5172_v9  ;;  %v5374_v55 = vld [vmem:[%s10253_s3 + $0x5d8] sm:$0xf0] }
 0x266   :  { %v5191_v34 = vor.u32 %v6740_v21, %v5188_v22  ;;  %v6976_v20 = vld [vmem:[%s10253_s3 + $0xc04] sm:$0xf]  ;;  %v6388_v21 = vld [vmem:[%s10253_s3 + $0xc08] sm:$0xf0] }
 0x267   :  { %3949 = vmatpush.bf16.msrb.mxu0 %v6435_v35  ;;  %3962 = vmatpush.bf16.msrb.mxu1 %v6439_v36  ;;  %v6404_v35 = vld [vmem:[%s10253_s3 + $0xc28] sm:$0xf0]  ;;  %v5178_v36 = vld [vmem:[%s10253_s3 + $0x490] sm:$0xf]  ;;  %v2612_v32 = vpop.f32.mrf.mxu0  ;;  %v2625_v1 = vpop.f32.mrf.mxu1 }
 0x268   :  { %v6407_v54 = vor.u32 %v6980_v42, %v6404_v35  ;;  %v5179_v41 = vor.u32 %v6739_v39, %v5178_v36  ;;  %v6391_v42 = vor.u32 %v6976_v20, %v6388_v21  ;;  %v6382_v35 = vunpack.i.l.s16 %v3858_v48  ;;  %v6779_v32 = vld [vmem:[%s10253_s3 + $0x5d4] sm:$0xf0]  ;;  %v6778_v1 = vld [vmem:[%s10253_s3 + $0x5d4] sm:$0xf]  ;;  %v5340_v20 = vld [vmem:[%s10253_s3 + $0x590] sm:$0xf] }
 0x269   :  { %1923 = vmatpush.bf16.msra.mxu2 %v5211_v43  ;;  %1936 = vmatpush.bf16.msra.mxu3 %v5215_v14  ;;  %v5180_v43 = vld [vmem:[%s10253_s3 + $0x498] sm:$0xf0]  ;;  %v3859_v14 = vunpack.c.l.b16 %v3838_v38  ;;  %v5393_v38 = vor.u32 %v6782_v15, %v5390_v27  ;;  %v6773_v15 = vld [vmem:[%s10253_s3 + $0x5a4] sm:$0xf0]  ;;  %v6772_v27 = vld [vmem:[%s10253_s3 + $0x5a4] sm:$0xf] }
 0x26a   :  { %v5183_v30 = vor.u32 %v6738_v61, %v5180_v43  ;;  %v5372_v43 = vld [vmem:[%s10253_s3 + $0x5d0] sm:$0xf]  ;;  %v6771_v21 = vld [vmem:[%s10253_s3 + $0x594] sm:$0xf0] }
 0x26b   :  { %3950 = vmatpush.bf16.msrb.mxu0 %v6427_v60  ;;  %3963 = vmatpush.bf16.msrb.mxu1 %v6431_v13  ;;  %v6979_v60 = vld [vmem:[%s10253_s3 + $0xc14] sm:$0xf0]  ;;  %v6978_v13 = vld [vmem:[%s10253_s3 + $0xc14] sm:$0xf]  ;;  %v1124_v4 = vpop.f32.mrf.mxu2  ;;  %v1137_v3 = vpop.f32.mrf.mxu3 }
 0x26c   :  { %v6774_v4 = vld [vmem:[%s10253_s3 + $0x5b4] sm:$0xf]  ;;  %v5358_v3 = vld [vmem:[%s10253_s3 + $0x5b8] sm:$0xf0] }
 0x26d   :  { %1924 = vmatpush.bf16.msra.mxu2 %v5203_v16  ;;  %1937 = vmatpush.bf16.msra.mxu3 %v5207_v12  ;;  %v6396_v16 = vld [vmem:[%s10253_s3 + $0xc18] sm:$0xf0]  ;;  %v5170_v12 = vld [vmem:[%s10253_s3 + $0x480] sm:$0xf] }
 0x26e   :  { %v5171_v7 = vor.u32 %v6737_v52, %v5170_v12  ;;  %v5356_v12 = vld [vmem:[%s10253_s3 + $0x5b0] sm:$0xf]  ;;  %v6775_v52 = vld [vmem:[%s10253_s3 + $0x5b4] sm:$0xf0] }
 0x26f   :  { %3951 = vmatpush.bf16.msrb.mxu0 %v6419_v28  ;;  %3964 = vmatpush.bf16.msrb.mxu1 %v6423_v44  ;;  %v6383_v28 = vunpack.i.l.s16 %v3859_v14  ;;  %v6783_v44 = vld [vmem:[%s10253_s3 + $0x5f4] sm:$0xf0]  ;;  %v1839_v14 = vpack.c.b16 %v7943_v57, %v7943_v57  ;;  %v5373_v57 = vor.u32 %v6779_v32, %v5372_v43  ;;  %v5552_v43 = vld [vmem:[%s10253_s3 + $0x6f8] sm:$0xf0] }
 0x270   :  { %v5389_v22 = vor.u32 %v6783_v44, %v5388_v26  ;;  %v5357_v26 = vor.u32 %v6775_v52, %v5356_v12  ;;  %v5348_v44 = vld [vmem:[%s10253_s3 + $0x5a0] sm:$0xf]  ;;  %v6810_v12 = vld [vmem:[%s10253_s3 + $0x6d4] sm:$0xf]  ;;  %v5536_v52 = vld [vmem:[%s10253_s3 + $0x6d8] sm:$0xf0] }
 0x271   :  { %1925 = vmatpush.bf16.msra.mxu2 %v5195_v31  ;;  %1938 = vmatpush.bf16.msra.mxu3 %v5199_v58  ;;  %v6395_v31 = vor.u32 %v6979_v60, %v6394_v59  ;;  %v6399_v58 = vor.u32 %v6978_v13, %v6396_v16  ;;  %v5364_v59 = vld [vmem:[%s10253_s3 + $0x5c0] sm:$0xf]  ;;  %v6777_v60 = vld [vmem:[%s10253_s3 + $0x5c4] sm:$0xf0]  ;;  %v6776_v13 = vld [vmem:[%s10253_s3 + $0x5c4] sm:$0xf] }
 0x273   :  { %3952 = vmatpush.bf16.msrb.mxu0 %v6411_v45  ;;  %3965 = vmatpush.bf16.msrb.mxu1 %v6415_v56  ;;  %v5380_v45 = vld [vmem:[%s10253_s3 + $0x5e0] sm:$0xf]  ;;  %v3864_v56 = vrot.slane %v6383_v28, 7  ;;  %v5361_v28 = vor.u32 %v6774_v4, %v5358_v3  ;;  %v5539_v4 = vor.u32 %v6810_v12, %v5536_v52 }
 0x274   :  { %v5381_v36 = vor.u32 %v6781_v24, %v5380_v45  ;;  %v5341_v45 = vor.u32 %v6771_v21, %v5340_v20  ;;  %v5332_v24 = vld [vmem:[%s10253_s3 + $0x580] sm:$0xf] }
 0x275   :  { %1926 = vmatpush.bf16.msra.mxu2 %v5187_v29  ;;  %1939 = vmatpush.bf16.msra.mxu3 %v5191_v34  ;;  %v5382_v29 = vld [vmem:[%s10253_s3 + $0x5e8] sm:$0xf0]  ;;  %v6387_v34 = vor.u32 %v6977_v0, %v6386_v46  ;;  %v3865_v61 = vsel %vm651_vm0, %v3864_v56, %v6382_v35  ;;  %v5526_v3 = vld [vmem:[%s10253_s3 + $0x6c0] sm:$0xf] }
 0x276   :  { %v5385_v39 = vor.u32 %v6780_v6, %v5382_v29  ;;  %v6769_v6 = vld [vmem:[%s10253_s3 + $0x584] sm:$0xf0]  ;;  %v6768_v29 = vld [vmem:[%s10253_s3 + $0x584] sm:$0xf] }
 0x277   :  { %3953 = vmatpush.bf16.msrb.mxu0 %v6403_v53  ;;  %3966 = vmatpush.bf16.msrb.mxu1 %v6407_v54  ;;  %v3866_v53 = vpack.c.b16 %v3865_v61, %v3865_v61  ;;  %v5377_v54 = vor.u32 %v6778_v1, %v5374_v55  ;;  %v6814_v61 = vld [vmem:[%s10253_s3 + $0x6f4] sm:$0xf] }
 0x278   :  { %v5555_v55 = vor.u32 %v6814_v61, %v5552_v43 }
 0x279   :  { %1927 = vmatpush.bf16.msra.mxu2 %v5179_v41  ;;  %1940 = vmatpush.bf16.msra.mxu3 %v5183_v30  ;;  %v5366_v41 = vld [vmem:[%s10253_s3 + $0x5c8] sm:$0xf0]  ;;  %v5365_v30 = vor.u32 %v6777_v60, %v5364_v59  ;;  %v2109_v60 = vpack.c.b16 %v8162_v50, %v8162_v50 }
 0x27a   :  { %v5369_v16 = vor.u32 %v6776_v13, %v5366_v41  ;;  %v5544_v59 = vld [vmem:[%s10253_s3 + $0x6e8] sm:$0xf0] }
 0x27b   :  { %3954 = vmatpush.bf16.msrb.mxu0 %v6395_v31  ;;  %3967 = vmatpush.bf16.msrb.mxu1 %v6399_v58  ;;  %v5350_v31 = vld [vmem:[%s10253_s3 + $0x5a8] sm:$0xf0] }
 0x27c   :  { %v5353_v0 = vor.u32 %v6772_v27, %v5350_v31  ;;  %v5518_v31 = vld [vmem:[%s10253_s3 + $0x6b0] sm:$0xf] }
 0x27d   :  { %1928 = vmatpush.bf16.msra.mxu2 %v5171_v7  ;;  %1941 = vmatpush.bf16.msra.mxu3 %v5175_v37  ;;  %v5349_v37 = vor.u32 %v6773_v15, %v5348_v44  ;;  %v5528_v44 = vld [vmem:[%s10253_s3 + $0x6c8] sm:$0xf0] }
 0x27f   :  { %3955 = vmatpush.bf16.msrb.mxu0 %v6387_v34  ;;  %3968 = vmatpush.bf16.msrb.mxu1 %v6391_v42  ;;  %v9464_v33 = vpop.f32.mrf.mxu0  ;;  %v9466_v9 = vpop.f32.mrf.mxu1  ;;  %v5334_v34 = vld [vmem:[%s10253_s3 + $0x588] sm:$0xf0]  ;;  %v5550_v42 = vld [vmem:[%s10253_s3 + $0x6f0] sm:$0xf] }
 0x280   :  { %1929 = vmatmul.bf16.vlgmr.msra.gmra.mxu2 %v1839_v14  ;;  %1942 = vmatmul.bf16.vlgmr.msra.gmra.mxu3 %v1839_v14  ;;  %v5333_v14 = vor.u32 %v6769_v6, %v5332_v24  ;;  %v5337_v32 = vor.u32 %v6768_v29, %v5334_v34 }
 0x281   :  { %2191 = vmatpush.bf16.msrb.mxu2 %v5389_v22  ;;  %2204 = vmatpush.bf16.msrb.mxu3 %v5393_v38 }
 0x282   :  { %3956 = vmatmul.bf16.vlgmr.msrb.gmra.mxu0 %v3866_v53  ;;  %3969 = vmatmul.bf16.vlgmr.msrb.gmra.mxu1 %v3866_v53  ;;  %v5542_v53 = vld [vmem:[%s10253_s3 + $0x6e0] sm:$0xf] }
 0x283   :  { %v1262_v58 = vpop.f32.mrf.mxu2  ;;  %v1275_v46 = vpop.f32.mrf.mxu3 }
 0x284   :  { %v9481_v48 = vadd.f32 %v1262_v58, %v9336_v51  ;;  %v9484_v7 = vadd.f32 %v1275_v46, %v9339_v17  ;;  %v6770_v51 = vld [vmem:[%s10253_s3 + $0x594] sm:$0xf]  ;;  %v5342_v17 = vld [vmem:[%s10253_s3 + $0x598] sm:$0xf0]  ;;  %v6807_v58 = vld [vmem:[%s10253_s3 + $0x6b4] sm:$0xf0] }
 0x285   :  { %2192 = vmatpush.bf16.msrb.mxu2 %v5381_v36  ;;  %2205 = vmatpush.bf16.msrb.mxu3 %v5385_v39  ;;  %v5345_v56 = vor.u32 %v6770_v51, %v5342_v17  ;;  %v6815_v39 = vld [vmem:[%s10253_s3 + $0x6f4] sm:$0xf0]  ;;  %v6806_v46 = vld [vmem:[%s10253_s3 + $0x6b4] sm:$0xf]  ;;  %v5519_v21 = vor.u32 %v6807_v58, %v5518_v31  ;;  %v5510_v17 = vld [vmem:[%s10253_s3 + $0x6a0] sm:$0xf] }
 0x286   :  { %v5551_v1 = vor.u32 %v6815_v39, %v5550_v42  ;;  %v6802_v39 = vld [vmem:[%s10253_s3 + $0x694] sm:$0xf]  ;;  %v6843_v31 = vld [vmem:[%s10253_s3 + $0x7d4] sm:$0xf0] }
 0x287   :  { %v2881_v22 = vpop.f32.mrf.mxu0  ;;  %v2894_v38 = vpop.f32.mrf.mxu1  ;;  %v6842_v58 = vld [vmem:[%s10253_s3 + $0x7d4] sm:$0xf] }
 0x288   :  { %v6805_v22 = vld [vmem:[%s10253_s3 + $0x6a4] sm:$0xf0]  ;;  %v6804_v38 = vld [vmem:[%s10253_s3 + $0x6a4] sm:$0xf] }
 0x289   :  { %2193 = vmatpush.bf16.msrb.mxu2 %v5373_v57  ;;  %2206 = vmatpush.bf16.msrb.mxu3 %v5377_v54  ;;  %v6813_v57 = vld [vmem:[%s10253_s3 + $0x6e4] sm:$0xf0]  ;;  %v6812_v54 = vld [vmem:[%s10253_s3 + $0x6e4] sm:$0xf]  ;;  %v5511_v6 = vor.u32 %v6805_v22, %v5510_v17  ;;  %v5690_v22 = vld [vmem:[%s10253_s3 + $0x7c8] sm:$0xf0] }
 0x28a   :  { %v5543_v13 = vor.u32 %v6813_v57, %v5542_v53  ;;  %v5547_v41 = vor.u32 %v6812_v54, %v5544_v59  ;;  %v5496_v53 = vld [vmem:[%s10253_s3 + $0x688] sm:$0xf0]  ;;  %v5712_v57 = vld [vmem:[%s10253_s3 + $0x7f0] sm:$0xf]  ;;  %v6847_v54 = vld [vmem:[%s10253_s3 + $0x7f4] sm:$0xf0] }
 0x28b   :  { %v1264_v35 = vpop.f32.mrf.mxu2  ;;  %v1277_v36 = vpop.f32.mrf.mxu3  ;;  %v6846_v59 = vld [vmem:[%s10253_s3 + $0x7f4] sm:$0xf]  ;;  %v5713_v12 = vor.u32 %v6847_v54, %v5712_v57  ;;  %v6840_v17 = vld [vmem:[%s10253_s3 + $0x7c4] sm:$0xf]  ;;  %v5664_v57 = vld [vmem:[%s10253_s3 + $0x790] sm:$0xf] }
 0x28c   :  { %v5502_v35 = vld [vmem:[%s10253_s3 + $0x690] sm:$0xf]  ;;  %v6803_v36 = vld [vmem:[%s10253_s3 + $0x694] sm:$0xf0] }
 0x28d   :  { %2194 = vmatpush.bf16.msrb.mxu2 %v5365_v30  ;;  %2207 = vmatpush.bf16.msrb.mxu3 %v5369_v16  ;;  %v5534_v30 = vld [vmem:[%s10253_s3 + $0x6d0] sm:$0xf]  ;;  %v6811_v16 = vld [vmem:[%s10253_s3 + $0x6d4] sm:$0xf0]  ;;  %v5503_v43 = vor.u32 %v6803_v36, %v5502_v35 }
 0x28e   :  { %v5535_v50 = vor.u32 %v6811_v16, %v5534_v30 }
 0x291   :  { %2195 = vmatpush.bf16.msrb.mxu2 %v5357_v26  ;;  %2208 = vmatpush.bf16.msrb.mxu3 %v5361_v28  ;;  %v6809_v26 = vld [vmem:[%s10253_s3 + $0x6c4] sm:$0xf0]  ;;  %v6808_v28 = vld [vmem:[%s10253_s3 + $0x6c4] sm:$0xf] }
 0x292   :  { %v5527_v15 = vor.u32 %v6809_v26, %v5526_v3  ;;  %v5531_v27 = vor.u32 %v6808_v28, %v5528_v44  ;;  %v6844_v3 = vld [vmem:[%s10253_s3 + $0x7e4] sm:$0xf]  ;;  %v5706_v26 = vld [vmem:[%s10253_s3 + $0x7e8] sm:$0xf0]  ;;  %v2379_v28 = vpack.c.b16 %v8227_v5, %v8227_v5 }
 0x295   :  { %2196 = vmatpush.bf16.msrb.mxu2 %v5349_v37  ;;  %2209 = vmatpush.bf16.msrb.mxu3 %v5353_v0  ;;  %v5520_v37 = vld [vmem:[%s10253_s3 + $0x6b8] sm:$0xf0] }
 0x296   :  { %v5523_v51 = vor.u32 %v6806_v46, %v5520_v37  ;;  %v5698_v46 = vld [vmem:[%s10253_s3 + $0x7d8] sm:$0xf0] }
 0x297   :  { %v5701_v37 = vor.u32 %v6842_v58, %v5698_v46 }
 0x299   :  { %2197 = vmatpush.bf16.msrb.mxu2 %v5341_v45  ;;  %2210 = vmatpush.bf16.msrb.mxu3 %v5345_v56  ;;  %v5512_v45 = vld [vmem:[%s10253_s3 + $0x6a8] sm:$0xf0] }
 0x29a   :  { %v5515_v42 = vor.u32 %v6804_v38, %v5512_v45  ;;  %v5693_v45 = vor.u32 %v6840_v17, %v5690_v22  ;;  %v5868_v17 = vld [vmem:[%s10253_s3 + $0x8e8] sm:$0xf0]  ;;  %v2649_v22 = vpack.c.b16 %v8246_v18, %v8246_v18 }
 0x29d   :  { %2198 = vmatpush.bf16.msrb.mxu2 %v5333_v14  ;;  %2211 = vmatpush.bf16.msrb.mxu3 %v5337_v32  ;;  %v5494_v32 = vld [vmem:[%s10253_s3 + $0x680] sm:$0xf] }
 0x29f   :  { %v9572_v0 = vpop.f32.mrf.mxu0  ;;  %v9574_v20 = vpop.f32.mrf.mxu1 }
 0x2a0   :  { %2199 = vmatmul.bf16.vlgmr.msrb.gmra.mxu2 %v2109_v60  ;;  %2212 = vmatmul.bf16.vlgmr.msrb.gmra.mxu3 %v2109_v60  ;;  %v5714_v60 = vld [vmem:[%s10253_s3 + $0x7f8] sm:$0xf0] }
 0x2a1   :  { %2461 = vmatpush.bf16.msra.mxu2 %v5551_v1  ;;  %2474 = vmatpush.bf16.msra.mxu3 %v5555_v55  ;;  %v6801_v1 = vld [vmem:[%s10253_s3 + $0x684] sm:$0xf0]  ;;  %v6800_v55 = vld [vmem:[%s10253_s3 + $0x684] sm:$0xf]  ;;  %v5717_v52 = vor.u32 %v6846_v59, %v5714_v60  ;;  %v6835_v60 = vld [vmem:[%s10253_s3 + $0x794] sm:$0xf0] }
 0x2a2   :  { %v5495_v30 = vor.u32 %v6801_v1, %v5494_v32  ;;  %v5499_v16 = vor.u32 %v6800_v55, %v5496_v53 }
 0x2a3   :  { %v1392_v56 = vpop.f32.mrf.mxu2  ;;  %v1405_v24 = vpop.f32.mrf.mxu3 }
 0x2a4   :  { %v9589_v29 = vadd.f32 %v1392_v56, %v9481_v48  ;;  %v9592_v34 = vadd.f32 %v1405_v24, %v9484_v7  ;;  %v5504_v48 = vld [vmem:[%s10253_s3 + $0x698] sm:$0xf0]  ;;  %v5680_v56 = vld [vmem:[%s10253_s3 + $0x7b0] sm:$0xf]  ;;  %v6839_v24 = vld [vmem:[%s10253_s3 + $0x7b4] sm:$0xf0] }
 0x2a5   :  { %2462 = vmatpush.bf16.msra.mxu2 %v5543_v13  ;;  %2475 = vmatpush.bf16.msra.mxu3 %v5547_v41  ;;  %v5507_v14 = vor.u32 %v6802_v39, %v5504_v48  ;;  %v5681_v35 = vor.u32 %v6839_v24, %v5680_v56  ;;  %v5672_v39 = vld [vmem:[%s10253_s3 + $0x7a0] sm:$0xf]  ;;  %v5858_v56 = vld [vmem:[%s10253_s3 + $0x8d0] sm:$0xf]  ;;  %v6875_v24 = vld [vmem:[%s10253_s3 + $0x8d4] sm:$0xf0] }
 0x2a6   :  { %v5859_v18 = vor.u32 %v6875_v24, %v5858_v56 }
 0x2a7   :  { %v3150_v7 = vpop.f32.mrf.mxu0  ;;  %v3163_v61 = vpop.f32.mrf.mxu1 }
 0x2a8   :  { %v6837_v61 = vld [vmem:[%s10253_s3 + $0x7a4] sm:$0xf0] }
 0x2a9   :  { %2463 = vmatpush.bf16.msra.mxu2 %v5535_v50  ;;  %2476 = vmatpush.bf16.msra.mxu3 %v5539_v4  ;;  %v5704_v50 = vld [vmem:[%s10253_s3 + $0x7e0] sm:$0xf]  ;;  %v6845_v4 = vld [vmem:[%s10253_s3 + $0x7e4] sm:$0xf0]  ;;  %v5673_v55 = vor.u32 %v6837_v61, %v5672_v39  ;;  %v6872_v61 = vld [vmem:[%s10253_s3 + $0x8c4] sm:$0xf] }
 0x2aa   :  { %v5705_v44 = vor.u32 %v6845_v4, %v5704_v50  ;;  %v6832_v50 = vld [vmem:[%s10253_s3 + $0x784] sm:$0xf]  ;;  %v5658_v4 = vld [vmem:[%s10253_s3 + $0x788] sm:$0xf0]  ;;  %v6873_v39 = vld [vmem:[%s10253_s3 + $0x8c4] sm:$0xf0] }
 0x2ab   :  { %v1394_v13 = vpop.f32.mrf.mxu2  ;;  %v1407_v41 = vpop.f32.mrf.mxu3  ;;  %v5661_v58 = vor.u32 %v6832_v50, %v5658_v4  ;;  %v5826_v4 = vld [vmem:[%s10253_s3 + $0x890] sm:$0xf] }
 0x2ac   :  { %v6834_v13 = vld [vmem:[%s10253_s3 + $0x794] sm:$0xf]  ;;  %v5666_v41 = vld [vmem:[%s10253_s3 + $0x798] sm:$0xf0] }
 0x2ad   :  { %2464 = vmatpush.bf16.msra.mxu2 %v5527_v15  ;;  %2477 = vmatpush.bf16.msra.mxu3 %v5531_v27  ;;  %v5709_v15 = vor.u32 %v6844_v3, %v5706_v26  ;;  %v5696_v27 = vld [vmem:[%s10253_s3 + $0x7d0] sm:$0xf]  ;;  %v6879_v26 = vld [vmem:[%s10253_s3 + $0x8f4] sm:$0xf0] }
 0x2ae   :  { %v5697_v5 = vor.u32 %v6843_v31, %v5696_v27  ;;  %v5874_v3 = vld [vmem:[%s10253_s3 + $0x8f0] sm:$0xf] }
 0x2af   :  { %v5875_v46 = vor.u32 %v6879_v26, %v5874_v3 }
 0x2b1   :  { %2465 = vmatpush.bf16.msra.mxu2 %v5519_v21  ;;  %2478 = vmatpush.bf16.msra.mxu3 %v5523_v51  ;;  %v5688_v21 = vld [vmem:[%s10253_s3 + $0x7c0] sm:$0xf]  ;;  %v6841_v51 = vld [vmem:[%s10253_s3 + $0x7c4] sm:$0xf0] }
 0x2b2   :  { %v5689_v38 = vor.u32 %v6841_v51, %v5688_v21  ;;  %v6877_v21 = vld [vmem:[%s10253_s3 + $0x8e4] sm:$0xf0]  ;;  %v6876_v51 = vld [vmem:[%s10253_s3 + $0x8e4] sm:$0xf] }
 0x2b5   :  { %2466 = vmatpush.bf16.msra.mxu2 %v5511_v6  ;;  %2479 = vmatpush.bf16.msra.mxu3 %v5515_v42  ;;  %v6838_v6 = vld [vmem:[%s10253_s3 + $0x7b4] sm:$0xf]  ;;  %v5682_v42 = vld [vmem:[%s10253_s3 + $0x7b8] sm:$0xf0] }
 0x2b6   :  { %v5685_v36 = vor.u32 %v6838_v6, %v5682_v42  ;;  %v6874_v6 = vld [vmem:[%s10253_s3 + $0x8d4] sm:$0xf]  ;;  %v5860_v42 = vld [vmem:[%s10253_s3 + $0x8d8] sm:$0xf0] }
 0x2b9   :  { %2467 = vmatpush.bf16.msra.mxu2 %v5503_v43  ;;  %2480 = vmatpush.bf16.msra.mxu3 %v5507_v14  ;;  %v6836_v43 = vld [vmem:[%s10253_s3 + $0x7a4] sm:$0xf]  ;;  %v5674_v14 = vld [vmem:[%s10253_s3 + $0x7a8] sm:$0xf0] }
 0x2ba   :  { %v5677_v53 = vor.u32 %v6836_v43, %v5674_v14  ;;  %v5852_v43 = vld [vmem:[%s10253_s3 + $0x8c8] sm:$0xf0] }
 0x2bd   :  { %2468 = vmatpush.bf16.msra.mxu2 %v5495_v30  ;;  %2481 = vmatpush.bf16.msra.mxu3 %v5499_v16  ;;  %v5665_v30 = vor.u32 %v6835_v60, %v5664_v57  ;;  %v6833_v16 = vld [vmem:[%s10253_s3 + $0x784] sm:$0xf0]  ;;  %v5844_v57 = vld [vmem:[%s10253_s3 + $0x8b8] sm:$0xf0] }
 0x2bf   :  { %v9683_v48 = vpop.f32.mrf.mxu0  ;;  %v9685_v7 = vpop.f32.mrf.mxu1 }
 0x2c0   :  { %2469 = vmatmul.bf16.vlgmr.msra.gmra.mxu2 %v2379_v28  ;;  %2482 = vmatmul.bf16.vlgmr.msra.gmra.mxu3 %v2379_v28  ;;  %v6878_v28 = vld [vmem:[%s10253_s3 + $0x8f4] sm:$0xf] }
 0x2c1   :  { %2731 = vmatpush.bf16.msrb.mxu2 %v5713_v12  ;;  %2744 = vmatpush.bf16.msrb.mxu3 %v5717_v52 }
 0x2c3   :  { %v1532_v32 = vpop.f32.mrf.mxu2  ;;  %v1545_v1 = vpop.f32.mrf.mxu3 }
 0x2c4   :  { %v9700_v54 = vadd.f32 %v1532_v32, %v9589_v29  ;;  %v9703_v59 = vadd.f32 %v1545_v1, %v9592_v34  ;;  %v5669_v29 = vor.u32 %v6834_v13, %v5666_v41  ;;  %v5656_v34 = vld [vmem:[%s10253_s3 + $0x780] sm:$0xf]  ;;  %v5855_v32 = vor.u32 %v6872_v61, %v5852_v43  ;;  %v5842_v1 = vld [vmem:[%s10253_s3 + $0x8b0] sm:$0xf]  ;;  %v6908_v61 = vld [vmem:[%s10253_s3 + $0x9e4] sm:$0xf] }
 0x2c5   :  { %2732 = vmatpush.bf16.msrb.mxu2 %v5705_v44  ;;  %2745 = vmatpush.bf16.msrb.mxu3 %v5709_v15  ;;  %v5876_v44 = vld [vmem:[%s10253_s3 + $0x8f8] sm:$0xf0]  ;;  %v5657_v31 = vor.u32 %v6833_v16, %v5656_v34  ;;  %v5834_v41 = vld [vmem:[%s10253_s3 + $0x8a0] sm:$0xf]  ;;  %v5836_v34 = vld [vmem:[%s10253_s3 + $0x8a8] sm:$0xf0] }
 0x2c6   :  { %v6030_v43 = vld [vmem:[%s10253_s3 + $0x9e8] sm:$0xf0] }
 0x2c7   :  { %v3420_v12 = vpop.f32.mrf.mxu0  ;;  %v3433_v52 = vpop.f32.mrf.mxu1 }
 0x2c9   :  { %2733 = vmatpush.bf16.msrb.mxu2 %v5697_v5  ;;  %2746 = vmatpush.bf16.msrb.mxu3 %v5701_v37  ;;  %v5879_v5 = vor.u32 %v6878_v28, %v5876_v44  ;;  %v5866_v37 = vld [vmem:[%s10253_s3 + $0x8e0] sm:$0xf]  ;;  %v6867_v28 = vld [vmem:[%s10253_s3 + $0x894] sm:$0xf0]  ;;  %v6866_v44 = vld [vmem:[%s10253_s3 + $0x894] sm:$0xf] }
 0x2cb   :  { %v1534_v15 = vpop.f32.mrf.mxu2  ;;  %v1547_v27 = vpop.f32.mrf.mxu3 }
 0x2cc   :  { %v5828_v15 = vld [vmem:[%s10253_s3 + $0x898] sm:$0xf0] }
 0x2cd   :  { %2734 = vmatpush.bf16.msrb.mxu2 %v5689_v38  ;;  %2747 = vmatpush.bf16.msrb.mxu3 %v5693_v45  ;;  %v5867_v38 = vor.u32 %v6877_v21, %v5866_v37  ;;  %v5871_v45 = vor.u32 %v6876_v51, %v5868_v17  ;;  %v6865_v37 = vld [vmem:[%s10253_s3 + $0x884] sm:$0xf0]  ;;  %v6036_v21 = vld [vmem:[%s10253_s3 + $0x9f0] sm:$0xf] }
 0x2d1   :  { %2735 = vmatpush.bf16.msrb.mxu2 %v5681_v35  ;;  %2748 = vmatpush.bf16.msrb.mxu3 %v5685_v36  ;;  %v5863_v35 = vor.u32 %v6874_v6, %v5860_v42  ;;  %v5850_v36 = vld [vmem:[%s10253_s3 + $0x8c0] sm:$0xf] }
 0x2d2   :  { %v5851_v14 = vor.u32 %v6873_v39, %v5850_v36  ;;  %v6028_v36 = vld [vmem:[%s10253_s3 + $0x9e0] sm:$0xf]  ;;  %v6909_v39 = vld [vmem:[%s10253_s3 + $0x9e4] sm:$0xf0] }
 0x2d5   :  { %2736 = vmatpush.bf16.msrb.mxu2 %v5673_v55  ;;  %2749 = vmatpush.bf16.msrb.mxu3 %v5677_v53  ;;  %v6871_v55 = vld [vmem:[%s10253_s3 + $0x8b4] sm:$0xf0]  ;;  %v6870_v53 = vld [vmem:[%s10253_s3 + $0x8b4] sm:$0xf] }
 0x2d6   :  { %v5843_v60 = vor.u32 %v6871_v55, %v5842_v1  ;;  %v5847_v13 = vor.u32 %v6870_v53, %v5844_v57  ;;  %v6033_v1 = vor.u32 %v6908_v61, %v6030_v43  ;;  %v6020_v55 = vld [vmem:[%s10253_s3 + $0x9d0] sm:$0xf]  ;;  %v6907_v53 = vld [vmem:[%s10253_s3 + $0x9d4] sm:$0xf0]  ;;  %v6906_v57 = vld [vmem:[%s10253_s3 + $0x9d4] sm:$0xf] }
 0x2d7   :  { %v6198_v61 = vld [vmem:[%s10253_s3 + $0xaf0] sm:$0xf] }
 0x2d9   :  { %2737 = vmatpush.bf16.msrb.mxu2 %v5665_v30  ;;  %2750 = vmatpush.bf16.msrb.mxu3 %v5669_v29  ;;  %v6869_v30 = vld [vmem:[%s10253_s3 + $0x8a4] sm:$0xf0]  ;;  %v6868_v29 = vld [vmem:[%s10253_s3 + $0x8a4] sm:$0xf] }
 0x2da   :  { %v5835_v52 = vor.u32 %v6869_v30, %v5834_v41  ;;  %v5839_v50 = vor.u32 %v6868_v29, %v5836_v34  ;;  %v6012_v41 = vld [vmem:[%s10253_s3 + $0x9c0] sm:$0xf]  ;;  %v6905_v30 = vld [vmem:[%s10253_s3 + $0x9c4] sm:$0xf0]  ;;  %v6904_v29 = vld [vmem:[%s10253_s3 + $0x9c4] sm:$0xf] }
 0x2db   :  { %v6014_v34 = vld [vmem:[%s10253_s3 + $0x9c8] sm:$0xf0] }
 0x2dd   :  { %2738 = vmatpush.bf16.msrb.mxu2 %v5657_v31  ;;  %2751 = vmatpush.bf16.msrb.mxu3 %v5661_v58  ;;  %v5827_v58 = vor.u32 %v6867_v28, %v5826_v4  ;;  %v6004_v4 = vld [vmem:[%s10253_s3 + $0x9b0] sm:$0xf]  ;;  %v6006_v28 = vld [vmem:[%s10253_s3 + $0x9b8] sm:$0xf0] }
 0x2df   :  { %v9800_v16 = vpop.f32.mrf.mxu0  ;;  %v9802_v12 = vpop.f32.mrf.mxu1 }
 0x2e0   :  { %2739 = vmatmul.bf16.vlgmr.msrb.gmra.mxu2 %v2649_v22  ;;  %2752 = vmatmul.bf16.vlgmr.msrb.gmra.mxu3 %v2649_v22  ;;  %v6911_v22 = vld [vmem:[%s10253_s3 + $0x9f4] sm:$0xf0] }
 0x2e1   :  { %2999 = vmatpush.bf16.msra.mxu2 %v5875_v46  ;;  %3012 = vmatpush.bf16.msra.mxu3 %v5879_v5  ;;  %v5831_v46 = vor.u32 %v6866_v44, %v5828_v15  ;;  %v5818_v5 = vld [vmem:[%s10253_s3 + $0x880] sm:$0xf] }
 0x2e2   :  { %v5819_v56 = vor.u32 %v6865_v37, %v5818_v5  ;;  %v6900_v5 = vld [vmem:[%s10253_s3 + $0x9a4] sm:$0xf]  ;;  %v5998_v37 = vld [vmem:[%s10253_s3 + $0x9a8] sm:$0xf0] }
 0x2e3   :  { %v1662_v3 = vpop.f32.mrf.mxu2  ;;  %v1675_v26 = vpop.f32.mrf.mxu3 }
 0x2e4   :  { %v9817_v27 = vadd.f32 %v1662_v3, %v9700_v54  ;;  %v9820_v31 = vadd.f32 %v1675_v26, %v9703_v59  ;;  %v6864_v54 = vld [vmem:[%s10253_s3 + $0x884] sm:$0xf]  ;;  %v5820_v59 = vld [vmem:[%s10253_s3 + $0x888] sm:$0xf0]  ;;  %v6903_v3 = vld [vmem:[%s10253_s3 + $0x9b4] sm:$0xf0] }
 0x2e5   :  { %3000 = vmatpush.bf16.msra.mxu2 %v5867_v38  ;;  %3013 = vmatpush.bf16.msra.mxu3 %v5871_v45  ;;  %v6910_v38 = vld [vmem:[%s10253_s3 + $0x9f4] sm:$0xf]  ;;  %v6038_v45 = vld [vmem:[%s10253_s3 + $0x9f8] sm:$0xf0]  ;;  %v5823_v24 = vor.u32 %v6864_v54, %v5820_v59  ;;  %v6005_v44 = vor.u32 %v6903_v3, %v6004_v4 }
 0x2e6   :  { %v6902_v26 = vld [vmem:[%s10253_s3 + $0x9b4] sm:$0xf] }
 0x2e7   :  { %v3690_v51 = vpop.f32.mrf.mxu0  ;;  %v3703_v17 = vpop.f32.mrf.mxu1  ;;  %v6009_v15 = vor.u32 %v6902_v26, %v6006_v28  ;;  %v6182_v26 = vld [vmem:[%s10253_s3 + $0xad0] sm:$0xf]  ;;  %v6939_v28 = vld [vmem:[%s10253_s3 + $0xad4] sm:$0xf0] }
 0x2e8   :  { %v6001_v51 = vor.u32 %v6900_v5, %v5998_v37  ;;  %v5988_v17 = vld [vmem:[%s10253_s3 + $0x990] sm:$0xf]  ;;  %v6937_v5 = vld [vmem:[%s10253_s3 + $0xac4] sm:$0xf0]  ;;  %v6936_v37 = vld [vmem:[%s10253_s3 + $0xac4] sm:$0xf] }
 0x2e9   :  { %3001 = vmatpush.bf16.msra.mxu2 %v5859_v18  ;;  %3014 = vmatpush.bf16.msra.mxu3 %v5863_v35  ;;  %v6037_v18 = vor.u32 %v6911_v22, %v6036_v21  ;;  %v6041_v35 = vor.u32 %v6910_v38, %v6038_v45  ;;  %v1818_v22 = vadd.f32 %v8861_v62, %v9817_v27  ;;  %v6899_v45 = vld [vmem:[%s10253_s3 + $0x994] sm:$0xf0] }
 0x2ea   :  { %v1819_v38 = vadd.f32 %v8863_v63, %v9820_v31  ;;  %v5989_v63 = vor.u32 %v6899_v45, %v5988_v17  ;;  %v5980_v31 = vld [vmem:[%s10253_s3 + $0x980] sm:$0xf]  ;;  %v6934_v45 = vld [vmem:[%s10253_s3 + $0xab4] sm:$0xf] }
 0x2eb   :  { %v1664_v6 = vpop.f32.mrf.mxu2  ;;  %v1677_v42 = vpop.f32.mrf.mxu3 }
 0x2ed   :  { %3002 = vmatpush.bf16.msra.mxu2 %v5851_v14  ;;  %3015 = vmatpush.bf16.msra.mxu3 %v5855_v32  ;;  %v2917_v14 = vpack.c.b16 %v8115_v47, %v8115_v47  ;;  %v6029_v32 = vor.u32 %v6909_v39, %v6028_v36  ;;  %v6021_v47 = vor.u32 %v6907_v53, %v6020_v55  ;;  %v6896_v36 = vld [vmem:[%s10253_s3 + $0x984] sm:$0xf]  ;;  %v5982_v39 = vld [vmem:[%s10253_s3 + $0x988] sm:$0xf0]  ;;  %v6200_v55 = vld [vmem:[%s10253_s3 + $0xaf8] sm:$0xf0] }
 0x2f1   :  { %3003 = vmatpush.bf16.msra.mxu2 %v5843_v60  ;;  %3016 = vmatpush.bf16.msra.mxu3 %v5847_v13  ;;  %v6022_v60 = vld [vmem:[%s10253_s3 + $0x9d8] sm:$0xf0] }
 0x2f2   :  { %v6025_v13 = vor.u32 %v6906_v57, %v6022_v60  ;;  %v5985_v57 = vor.u32 %v6896_v36, %v5982_v39 }
 0x2f5   :  { %3004 = vmatpush.bf16.msra.mxu2 %v5835_v52  ;;  %3017 = vmatpush.bf16.msra.mxu3 %v5839_v50  ;;  %v6013_v52 = vor.u32 %v6905_v30, %v6012_v41  ;;  %v6017_v50 = vor.u32 %v6904_v29, %v6014_v34  ;;  %v6941_v29 = vld [vmem:[%s10253_s3 + $0xae4] sm:$0xf0]  ;;  %v6940_v34 = vld [vmem:[%s10253_s3 + $0xae4] sm:$0xf] }
 0x2f9   :  { %3005 = vmatpush.bf16.msra.mxu2 %v5827_v58  ;;  %3018 = vmatpush.bf16.msra.mxu3 %v5831_v46  ;;  %v5996_v58 = vld [vmem:[%s10253_s3 + $0x9a0] sm:$0xf]  ;;  %v6901_v46 = vld [vmem:[%s10253_s3 + $0x9a4] sm:$0xf0] }
 0x2fa   :  { %v5997_v21 = vor.u32 %v6901_v46, %v5996_v58  ;;  %v6174_v46 = vld [vmem:[%s10253_s3 + $0xac0] sm:$0xf] }
 0x2fd   :  { %3006 = vmatpush.bf16.msra.mxu2 %v5819_v56  ;;  %3019 = vmatpush.bf16.msra.mxu3 %v5823_v24  ;;  %v6898_v56 = vld [vmem:[%s10253_s3 + $0x994] sm:$0xf]  ;;  %v5990_v24 = vld [vmem:[%s10253_s3 + $0x998] sm:$0xf0] }
 0x2fe   :  { %v5993_v27 = vor.u32 %v6898_v56, %v5990_v24  ;;  %v6168_v56 = vld [vmem:[%s10253_s3 + $0xab8] sm:$0xf0] }
 0x2ff   :  { %v9908_v54 = vpop.f32.mrf.mxu0  ;;  %v9910_v59 = vpop.f32.mrf.mxu1 }
 0x300   :  { %3007 = vmatmul.bf16.vlgmr.msra.gmra.mxu2 %v2917_v14  ;;  %3020 = vmatmul.bf16.vlgmr.msra.gmra.mxu3 %v2917_v14 }
 0x301   :  { %3269 = vmatpush.bf16.msrb.mxu2 %v6037_v18  ;;  %3282 = vmatpush.bf16.msrb.mxu3 %v6041_v35  ;;  %v6897_v35 = vld [vmem:[%s10253_s3 + $0x984] sm:$0xf0] }
 0x302   :  { %v5981_v53 = vor.u32 %v6897_v35, %v5980_v31  ;;  %v6160_v31 = vld [vmem:[%s10253_s3 + $0xaa8] sm:$0xf0] }
 0x303   :  { %v1930_v6 = vpop.f32.mrf.mxu2  ;;  %v1943_v42 = vpop.f32.mrf.mxu3 }
 0x304   :  { %v9928_v18 = vadd.f32 %v1930_v6, %v1818_v22  ;;  %v9930_v62 = vadd.f32 %v1943_v42, %v1819_v38  ;;  %v6166_v22 = vld [vmem:[%s10253_s3 + $0xab0] sm:$0xf]  ;;  %v6935_v38 = vld [vmem:[%s10253_s3 + $0xab4] sm:$0xf0]  ;;  %v6171_v6 = vor.u32 %v6934_v45, %v6168_v56  ;;  %v6158_v42 = vld [vmem:[%s10253_s3 + $0xaa0] sm:$0xf] }
 0x305   :  { %3270 = vmatpush.bf16.msrb.mxu2 %v6029_v32  ;;  %3283 = vmatpush.bf16.msrb.mxu3 %v6033_v1  ;;  %v6943_v32 = vld [vmem:[%s10253_s3 + $0xaf4] sm:$0xf0]  ;;  %v6942_v1 = vld [vmem:[%s10253_s3 + $0xaf4] sm:$0xf]  ;;  %v6167_v24 = vor.u32 %v6935_v38, %v6166_v22  ;;  %v6346_v22 = vld [vmem:[%s10253_s3 + $0xbd8] sm:$0xf0] }
 0x306   :  { %v6199_v60 = vor.u32 %v6943_v32, %v6198_v61  ;;  %v2087_v36 = vadd.f32 %v8979_v2, %v9928_v18  ;;  %v2088_v39 = vadd.f32 %v8981_v19, %v9930_v62  ;;  %v6152_v2 = vld [vmem:[%s10253_s3 + $0xa98] sm:$0xf0]  ;;  %v6336_v45 = vld [vmem:[%s10253_s3 + $0xbc0] sm:$0xf]  ;;  %v6969_v56 = vld [vmem:[%s10253_s3 + $0xbc4] sm:$0xf0] }
 0x307   :  { %v3959_v43 = vpop.f32.mrf.mxu0  ;;  %v3972_v14 = vpop.f32.mrf.mxu1 }
 0x308   :  { %v6150_v43 = vld [vmem:[%s10253_s3 + $0xa90] sm:$0xf] }
 0x309   :  { %3271 = vmatpush.bf16.msrb.mxu2 %v6021_v47  ;;  %3284 = vmatpush.bf16.msrb.mxu3 %v6025_v13  ;;  %v6203_v47 = vor.u32 %v6942_v1, %v6200_v55  ;;  %v6190_v13 = vld [vmem:[%s10253_s3 + $0xae0] sm:$0xf]  ;;  %v6931_v1 = vld [vmem:[%s10253_s3 + $0xa94] sm:$0xf0]  ;;  %v6930_v55 = vld [vmem:[%s10253_s3 + $0xa94] sm:$0xf] }
 0x30a   :  { %v6191_v4 = vor.u32 %v6941_v29, %v6190_v13  ;;  %v6151_v62 = vor.u32 %v6931_v1, %v6150_v43  ;;  %v6144_v13 = vld [vmem:[%s10253_s3 + $0xa88] sm:$0xf0]  ;;  %v6974_v29 = vld [vmem:[%s10253_s3 + $0xbf4] sm:$0xf]  ;;  %v6320_v43 = vld [vmem:[%s10253_s3 + $0xba0] sm:$0xf] }
 0x30b   :  { %v1932_v41 = vpop.f32.mrf.mxu2  ;;  %v1945_v30 = vpop.f32.mrf.mxu3  ;;  %v6322_v1 = vld [vmem:[%s10253_s3 + $0xba8] sm:$0xf0] }
 0x30c   :  { %v6360_v41 = vld [vmem:[%s10253_s3 + $0xbf0] sm:$0xf]  ;;  %v6975_v30 = vld [vmem:[%s10253_s3 + $0xbf4] sm:$0xf0] }
 0x30d   :  { %3272 = vmatpush.bf16.msrb.mxu2 %v6013_v52  ;;  %3285 = vmatpush.bf16.msrb.mxu3 %v6017_v50  ;;  %v6192_v52 = vld [vmem:[%s10253_s3 + $0xae8] sm:$0xf0]  ;;  %v3187_v50 = vpack.c.b16 %v8257_v23, %v8257_v23  ;;  %v6183_v23 = vor.u32 %v6939_v28, %v6182_v26  ;;  %v6361_v26 = vor.u32 %v6975_v30, %v6360_v41  ;;  %v6962_v41 = vld [vmem:[%s10253_s3 + $0xb94] sm:$0xf] }
 0x30e   :  { %v6195_v3 = vor.u32 %v6940_v34, %v6192_v52  ;;  %v6362_v34 = vld [vmem:[%s10253_s3 + $0xbf8] sm:$0xf0] }
 0x30f   :  { %v6365_v28 = vor.u32 %v6974_v29, %v6362_v34  ;;  %v6304_v29 = vld [vmem:[%s10253_s3 + $0xb80] sm:$0xf]  ;;  %v6961_v34 = vld [vmem:[%s10253_s3 + $0xb84] sm:$0xf0] }
 0x311   :  { %3273 = vmatpush.bf16.msrb.mxu2 %v6005_v44  ;;  %3286 = vmatpush.bf16.msrb.mxu3 %v6009_v15  ;;  %v6938_v44 = vld [vmem:[%s10253_s3 + $0xad4] sm:$0xf]  ;;  %v6184_v15 = vld [vmem:[%s10253_s3 + $0xad8] sm:$0xf0] }
 0x312   :  { %v6187_v58 = vor.u32 %v6938_v44, %v6184_v15  ;;  %v6352_v44 = vld [vmem:[%s10253_s3 + $0xbe0] sm:$0xf]  ;;  %v6973_v15 = vld [vmem:[%s10253_s3 + $0xbe4] sm:$0xf0] }
 0x315   :  { %3274 = vmatpush.bf16.msrb.mxu2 %v5997_v21  ;;  %3287 = vmatpush.bf16.msrb.mxu3 %v6001_v51  ;;  %v6176_v21 = vld [vmem:[%s10253_s3 + $0xac8] sm:$0xf0]  ;;  %v6175_v51 = vor.u32 %v6937_v5, %v6174_v46  ;;  %v3457_v46 = vpack.c.b16 %v8274_v10, %v8274_v10  ;;  %v6353_v5 = vor.u32 %v6973_v15, %v6352_v44 }
 0x316   :  { %v6179_v17 = vor.u32 %v6936_v37, %v6176_v21  ;;  %v6344_v21 = vld [vmem:[%s10253_s3 + $0xbd0] sm:$0xf]  ;;  %v3727_v44 = vpack.c.b16 %v8303_v49, %v8303_v49 }
 0x319   :  { %3275 = vmatpush.bf16.msrb.mxu2 %v5989_v63  ;;  %3288 = vmatpush.bf16.msrb.mxu3 %v5993_v27  ;;  %v6933_v63 = vld [vmem:[%s10253_s3 + $0xaa4] sm:$0xf0]  ;;  %v6932_v27 = vld [vmem:[%s10253_s3 + $0xaa4] sm:$0xf] }
 0x31a   :  { %v6159_v35 = vor.u32 %v6933_v63, %v6158_v42  ;;  %v6163_v61 = vor.u32 %v6932_v27, %v6160_v31  ;;  %v6337_v42 = vor.u32 %v6969_v56, %v6336_v45  ;;  %v6328_v27 = vld [vmem:[%s10253_s3 + $0xbb0] sm:$0xf]  ;;  %v6967_v31 = vld [vmem:[%s10253_s3 + $0xbb4] sm:$0xf0] }
 0x31d   :  { %3276 = vmatpush.bf16.msrb.mxu2 %v5981_v53  ;;  %3289 = vmatpush.bf16.msrb.mxu3 %v5985_v57  ;;  %v6155_v53 = vor.u32 %v6930_v55, %v6152_v2  ;;  %v6142_v57 = vld [vmem:[%s10253_s3 + $0xa80] sm:$0xf] }
 0x320   :  { %3277 = vmatmul.bf16.vlgmr.msrb.gmra.mxu2 %v3187_v50  ;;  %3290 = vmatmul.bf16.vlgmr.msrb.gmra.mxu3 %v3187_v50 }
 0x321   :  { %3539 = vmatpush.bf16.msra.mxu2 %v6199_v60  ;;  %3552 = vmatpush.bf16.msra.mxu3 %v6203_v47  ;;  %v6929_v60 = vld [vmem:[%s10253_s3 + $0xa84] sm:$0xf0]  ;;  %v6928_v47 = vld [vmem:[%s10253_s3 + $0xa84] sm:$0xf] }
 0x322   :  { %v6143_v52 = vor.u32 %v6929_v60, %v6142_v57  ;;  %v6147_v50 = vor.u32 %v6928_v47, %v6144_v13  ;;  %v6312_v57 = vld [vmem:[%s10253_s3 + $0xb90] sm:$0xf]  ;;  %v6963_v13 = vld [vmem:[%s10253_s3 + $0xb94] sm:$0xf0] }
 0x323   :  { %v2200_v14 = vpop.f32.mrf.mxu2  ;;  %v2213_v32 = vpop.f32.mrf.mxu3 }
 0x324   :  { %v10034_v19 = vadd.f32 %v2200_v14, %v2087_v36  ;;  %v10036_v18 = vadd.f32 %v2213_v32, %v2088_v39  ;;  %v6330_v36 = vld [vmem:[%s10253_s3 + $0xbb8] sm:$0xf0]  ;;  %v6329_v39 = vor.u32 %v6967_v31, %v6328_v27  ;;  %v6965_v14 = vld [vmem:[%s10253_s3 + $0xba4] sm:$0xf0]  ;;  %v6964_v32 = vld [vmem:[%s10253_s3 + $0xba4] sm:$0xf] }
 0x325   :  { %3540 = vmatpush.bf16.msra.mxu2 %v6191_v4  ;;  %3553 = vmatpush.bf16.msra.mxu3 %v6195_v3  ;;  %v6321_v55 = vor.u32 %v6965_v14, %v6320_v43  ;;  %v6997_v31 = vld [vmem:[%s10255_s5 + $0x28] sm:$0xff]  ;;  %v7003_v43 = vld [vmem:[%s10255_s5 + $0x58] sm:$0xff] }
 0x326   :  { %v2357_v2 = vadd.f32 %v9099_v40, %v10034_v19  ;;  %v6314_v40 = vld [vmem:[%s10253_s3 + $0xb98] sm:$0xf0] }
 0x327   :  { %v6317_v30 = vor.u32 %v6962_v41, %v6314_v40  ;;  %v7000_v41 = vld [vmem:[%s10255_s5 + $0x40] sm:$0xff]  ;;  %v7013_v40 = vld [vmem:[%s10257_s7 + $0x28] sm:$0xff] }
 0x329   :  { %3541 = vmatpush.bf16.msra.mxu2 %v6183_v23  ;;  %3554 = vmatpush.bf16.msra.mxu3 %v6187_v58  ;;  %v6972_v23 = vld [vmem:[%s10253_s3 + $0xbe4] sm:$0xf]  ;;  %v6354_v58 = vld [vmem:[%s10253_s3 + $0xbe8] sm:$0xf0] }
 0x32a   :  { %v6357_v37 = vor.u32 %v6972_v23, %v6354_v58 }
 0x32b   :  { %v2202_v4 = vpop.f32.mrf.mxu2  ;;  %v2215_v3 = vpop.f32.mrf.mxu3 }
 0x32c   :  { %v6305_v4 = vor.u32 %v6961_v34, %v6304_v29  ;;  %v7012_v29 = vld [vmem:[%s10257_s7 + $0x20] sm:$0xff] }
 0x32d   :  { %3542 = vmatpush.bf16.msra.mxu2 %v6175_v51  ;;  %3555 = vmatpush.bf16.msra.mxu3 %v6179_v17  ;;  %v6971_v51 = vld [vmem:[%s10253_s3 + $0xbd4] sm:$0xf0]  ;;  %v6970_v17 = vld [vmem:[%s10253_s3 + $0xbd4] sm:$0xf] }
 0x32e   :  { %v6345_v10 = vor.u32 %v6971_v51, %v6344_v21  ;;  %v6349_v38 = vor.u32 %v6970_v17, %v6346_v22 }
 0x331   :  { %3543 = vmatpush.bf16.msra.mxu2 %v6167_v24  ;;  %3556 = vmatpush.bf16.msra.mxu3 %v6171_v6  ;;  %v6968_v24 = vld [vmem:[%s10253_s3 + $0xbc4] sm:$0xf]  ;;  %v6338_v6 = vld [vmem:[%s10253_s3 + $0xbc8] sm:$0xf0] }
 0x332   :  { %v6341_v63 = vor.u32 %v6968_v24, %v6338_v6 }
 0x335   :  { %3544 = vmatpush.bf16.msra.mxu2 %v6159_v35  ;;  %3557 = vmatpush.bf16.msra.mxu3 %v6163_v61  ;;  %v6966_v35 = vld [vmem:[%s10253_s3 + $0xbb4] sm:$0xf] }
 0x336   :  { %v6333_v61 = vor.u32 %v6966_v35, %v6330_v36  ;;  %v7005_v35 = vld [vmem:[%s10255_s5 + $0x68] sm:$0xff]  ;;  %v6996_v36 = vld [vmem:[%s10255_s5 + $0x20] sm:$0xff] }
 0x339   :  { %3545 = vmatpush.bf16.msra.mxu2 %v6151_v62  ;;  %3558 = vmatpush.bf16.msra.mxu3 %v6155_v53  ;;  %v2358_v62 = vadd.f32 %v9101_v8, %v10036_v18  ;;  %v6325_v53 = vor.u32 %v6964_v32, %v6322_v1  ;;  %v6313_v18 = vor.u32 %v6963_v13, %v6312_v57  ;;  %v6994_v1 = vld [vmem:[%s10255_s5 + $0x10] sm:$0xff]  ;;  %v7001_v57 = vld [vmem:[%s10255_s5 + $0x48] sm:$0xff]  ;;  %v6992_v13 = vld [vmem:[%s10255_s5] sm:$0xff] }
 0x33d   :  { %3546 = vmatpush.bf16.msra.mxu2 %v6143_v52  ;;  %3559 = vmatpush.bf16.msra.mxu3 %v6147_v50  ;;  %v6960_v52 = vld [vmem:[%s10253_s3 + $0xb84] sm:$0xf]  ;;  %v6306_v50 = vld [vmem:[%s10253_s3 + $0xb88] sm:$0xf0] }
 0x33e   :  { %v6309_v3 = vor.u32 %v6960_v52, %v6306_v50 }
 0x340   :  { %3547 = vmatmul.bf16.vlgmr.msra.gmra.mxu2 %v3457_v46  ;;  %3560 = vmatmul.bf16.vlgmr.msra.gmra.mxu3 %v3457_v46 }
 0x341   :  { %3809 = vmatpush.bf16.msrb.mxu2 %v6361_v26  ;;  %3822 = vmatpush.bf16.msrb.mxu3 %v6365_v28 }
 0x343   :  { %v2470_v60 = vpop.f32.mrf.mxu2  ;;  %v2483_v47 = vpop.f32.mrf.mxu3 }
 0x344   :  { %v2487_v8 = vadd.f32 %v2470_v60, %v2357_v2  ;;  %v2488_v19 = vadd.f32 %v2483_v47, %v2358_v62  ;;  %v7015_v60 = vld [vmem:[%s10257_s7 + $0x38] sm:$0xff]  ;;  %v7014_v47 = vld [vmem:[%s10257_s7 + $0x30] sm:$0xff] }
 0x345   :  { %3810 = vmatpush.bf16.msrb.mxu2 %v6353_v5  ;;  %3823 = vmatpush.bf16.msrb.mxu3 %v6357_v37 }
 0x346   :  { %v2627_v15 = vadd.f32 %v9307_v25, %v2487_v8  ;;  %v2628_v23 = vadd.f32 %v9309_v11, %v2488_v19  ;;  %v6999_v11 = vld [vmem:[%s10255_s5 + $0x38] sm:$0xff]  ;;  %4216 = vmatpush.bf16.msra.mxu0 %v7015_v60 }
 0x349   :  { %3811 = vmatpush.bf16.msrb.mxu2 %v6345_v10  ;;  %3824 = vmatpush.bf16.msrb.mxu3 %v6349_v38 }
 0x34a   :  { %4217 = vmatpush.bf16.msra.mxu0 %v7014_v47 }
 0x34b   :  { %v2472_v26 = vpop.f32.mrf.mxu2  ;;  %v2485_v28 = vpop.f32.mrf.mxu3 }
 0x34d   :  { %3812 = vmatpush.bf16.msrb.mxu2 %v6337_v42  ;;  %3825 = vmatpush.bf16.msrb.mxu3 %v6341_v63  ;;  %v7007_v42 = vld [vmem:[%s10255_s5 + $0x78] sm:$0xff] }
 0x34e   :  { %4218 = vmatpush.bf16.msra.mxu0 %v7013_v40 }
 0x351   :  { %3813 = vmatpush.bf16.msrb.mxu2 %v6329_v39  ;;  %3826 = vmatpush.bf16.msrb.mxu3 %v6333_v61  ;;  %v7004_v39 = vld [vmem:[%s10255_s5 + $0x60] sm:$0xff]  ;;  %v6995_v61 = vld [vmem:[%s10255_s5 + $0x18] sm:$0xff] }
 0x352   :  { %4219 = vmatpush.bf16.msra.mxu0 %v7012_v29 }
 0x355   :  { %3814 = vmatpush.bf16.msrb.mxu2 %v6321_v55  ;;  %3827 = vmatpush.bf16.msrb.mxu3 %v6325_v53  ;;  %v7002_v55 = vld [vmem:[%s10255_s5 + $0x50] sm:$0xff]  ;;  %v6993_v53 = vld [vmem:[%s10255_s5 + $0x8] sm:$0xff] }
 0x359   :  { %3815 = vmatpush.bf16.msrb.mxu2 %v6313_v18  ;;  %3828 = vmatpush.bf16.msrb.mxu3 %v6317_v30 }
 0x35d   :  { %3816 = vmatpush.bf16.msrb.mxu2 %v6305_v4  ;;  %3829 = vmatpush.bf16.msrb.mxu3 %v6309_v3  ;;  %v7010_v4 = vld [vmem:[%s10257_s7 + $0x10] sm:$0xff]  ;;  %v3976_v3 = vld [vmem:[%s10254_s4] sm:$0x3] }
 0x360   :  { %3817 = vmatmul.bf16.vlgmr.msrb.gmra.mxu2 %v3727_v44  ;;  %3830 = vmatmul.bf16.vlgmr.msrb.gmra.mxu3 %v3727_v44 }
 0x361   :  { %4120 = vmatpush.bf16.msra.mxu2 %v6999_v11  ;;  %4133 = vmatpush.bf16.msra.mxu3 %v7007_v42 }
 0x363   :  { %v2740_v58 = vpop.f32.mrf.mxu2  ;;  %v2753_v46 = vpop.f32.mrf.mxu3 }
 0x364   :  { %v2757_v5 = vadd.f32 %v2740_v58, %v2627_v15  ;;  %v2758_v37 = vadd.f32 %v2753_v46, %v2628_v23  ;;  %v3978_v15 = vperm.slane %v3976_v3, 0  ;;  %v3979_v58 = vperm.slane %v3976_v3, 1 }
 0x366   :  { %v2896_v17 = vadd.f32 %v9464_v33, %v2757_v5  ;;  %v2897_v22 = vadd.f32 %v9466_v9, %v2758_v37  ;;  %v6998_v33 = vld [vmem:[%s10255_s5 + $0x30] sm:$0xff] }
 0x367   :  { %v7006_v9 = vld [vmem:[%s10255_s5 + $0x70] sm:$0xff]  ;;  %4121 = vmatpush.bf16.msra.mxu2 %v6998_v33  ;;  %v7042_v33 = vld [vmem:[%s10258_s8] ss:$0 sm:$0xff] }
 0x368   :  { %4134 = vmatpush.bf16.msra.mxu3 %v7006_v9 }
 0x36b   :  { %v2742_v21 = vpop.f32.mrf.mxu2  ;;  %v2755_v51 = vpop.f32.mrf.mxu3  ;;  %4122 = vmatpush.bf16.msra.mxu2 %v6997_v31 }
 0x36c   :  { %4135 = vmatpush.bf16.msra.mxu3 %v7005_v35 }
 0x36f   :  { %4123 = vmatpush.bf16.msra.mxu2 %v6996_v36 }
 0x370   :  { %4136 = vmatpush.bf16.msra.mxu3 %v7004_v39 }
 0x373   :  { %4124 = vmatpush.bf16.msra.mxu2 %v6995_v61 }
 0x374   :  { %4137 = vmatpush.bf16.msra.mxu3 %v7003_v43 }
 0x377   :  { %4125 = vmatpush.bf16.msra.mxu2 %v6994_v1 }
 0x378   :  { %4138 = vmatpush.bf16.msra.mxu3 %v7002_v55 }
 0x37b   :  { %4126 = vmatpush.bf16.msra.mxu2 %v6993_v53 }
 0x37c   :  { %4139 = vmatpush.bf16.msra.mxu3 %v7001_v57 }
 0x37f   :  { %4127 = vmatpush.bf16.msra.mxu2 %v6992_v13 }
 0x380   :  { %4140 = vmatpush.bf16.msra.mxu3 %v7000_v41 }
 0x383   :  { %v3008_v10 = vpop.f32.mrf.mxu2  ;;  %v3021_v38 = vpop.f32.mrf.mxu3 }
 0x384   :  { %v3025_v45 = vadd.f32 %v3008_v10, %v2896_v17  ;;  %v3026_v49 = vadd.f32 %v3021_v38, %v2897_v22 }
 0x386   :  { %v3165_v8 = vadd.f32 %v9572_v0, %v3025_v45  ;;  %v3166_v19 = vadd.f32 %v9574_v20, %v3026_v49  ;;  %v7011_v0 = vld [vmem:[%s10257_s7 + $0x18] sm:$0xff] }
 0x387   :  { %4220 = vmatpush.bf16.msra.mxu0 %v7011_v0 }
 0x38b   :  { %v3010_v56 = vpop.f32.mrf.mxu2  ;;  %v3023_v24 = vpop.f32.mrf.mxu3  ;;  %4221 = vmatpush.bf16.msra.mxu0 %v7010_v4 }
 0x3a3   :  { %v3278_v6 = vpop.f32.mrf.mxu2  ;;  %v3291_v25 = vpop.f32.mrf.mxu3 }
 0x3a4   :  { %v3295_v18 = vadd.f32 %v3278_v6, %v3165_v8  ;;  %v3296_v30 = vadd.f32 %v3291_v25, %v3166_v19 }
 0x3a6   :  { %v3435_v34 = vadd.f32 %v9683_v48, %v3295_v18  ;;  %v3436_v52 = vadd.f32 %v9685_v7, %v3296_v30 }
 0x3ab   :  { %v3280_v63 = vpop.f32.mrf.mxu2  ;;  %v3293_v27 = vpop.f32.mrf.mxu3 }
 0x3c3   :  { %v3548_v14 = vpop.f32.mrf.mxu2  ;;  %v3561_v32 = vpop.f32.mrf.mxu3 }
 0x3c4   :  { %v3565_v50 = vadd.f32 %v3548_v14, %v3435_v34  ;;  %v3566_v20 = vadd.f32 %v3561_v32, %v3436_v52 }
 0x3c6   :  { %v3705_v48 = vadd.f32 %v9800_v16, %v3565_v50  ;;  %v3706_v7 = vadd.f32 %v9802_v12, %v3566_v20  ;;  %v7009_v12 = vld [vmem:[%s10257_s7 + $0x8] sm:$0xff] }
 0x3c7   :  { %4222 = vmatpush.bf16.msra.mxu0 %v7009_v12 }
 0x3cb   :  { %v3550_v2 = vpop.f32.mrf.mxu2  ;;  %v3563_v62 = vpop.f32.mrf.mxu3 }
 0x3e3   :  { %v3818_v26 = vpop.f32.mrf.mxu2  ;;  %v3831_v28 = vpop.f32.mrf.mxu3 }
 0x3e4   :  { %v3835_v44 = vadd.f32 %v3818_v26, %v3705_v48  ;;  %v3836_v23 = vadd.f32 %v3831_v28, %v3706_v7 }
 0x3e6   :  { %v3974_v46 = vadd.f32 %v9908_v54, %v3835_v44  ;;  %v3975_v5 = vadd.f32 %v9910_v59, %v3836_v23  ;;  %v7008_v54 = vld [vmem:[%s10257_s7] sm:$0xff]  ;;  %s4235_s7 = sshll.u32 %s7069_s29, 4  ;;  %s4236_s7 = int_to_ptr.vmem [resolvable:$true] %s4235_s7 }
 0x3e7   :  { %4223 = vmatpush.bf16.msra.mxu0 %v7008_v54  ;;  %v7041_v59 = vld [vmem:[%s10256_s6] ss:$0 sm:$0xff] }
 0x3e8   :  { %v3982_v37 = vadd.f32 %v3978_v15, %v3974_v46  ;;  %v3983_v21 = vadd.f32 %v3979_v58, %v3975_v5 }
 0x3ea   :  { %v3984_v51 = vmax.f32 %v3982_v37, 0.0  ;;  %v3985_v17 = vmax.f32 %v3983_v21, 0.0 }
 0x3eb   :  { %v3820_v22 = vpop.f32.mrf.mxu2  ;;  %v3833_v10 = vpop.f32.mrf.mxu3 }
 0x3ec   :  { %v3986_v16 = vpack.c.bf16 %v3984_v51, %v3984_v51  ;;  %v3987_v38 = vpack.c.bf16 %v3985_v17, %v3985_v17 }
 0x3ee   :  { %4128 = vmatmul.bf16.vlgmr.msra.gmra.mxu2 %v3986_v16  ;;  %4141 = vmatmul.bf16.vlgmr.msra.gmra.mxu3 %v3987_v38 }
 0x471   :  { %v4129_v45 = vpop.f32.mrf.mxu2  ;;  %v4142_v49 = vpop.f32.mrf.mxu3 }
 0x472   :  { %v4130_v56 = vadd.f32 %v7041_v59, %v4129_v45 }
 0x474   :  { %v4143_v24 = vadd.f32 %v4142_v49, %v4130_v56 }
 0x476   :  { %v4146_v6 = vmax.f32 %v4143_v24, 0.0 }
 0x478   :  { %v4147_v25 = vpack.c.bf16 %v4146_v6, %v4146_v6 }
 0x479   :  { %v4131_v11 = vpop.f32.mrf.mxu2  ;;  %v4144_v42 = vpop.f32.mrf.mxu3 }
 0x47a   :  { %4224 = vmatmul.bf16.vlgmr.msra.gmra.mxu0 %v4147_v25 }
 0x4f7   :  { %v4225_v9 = vpop.f32.mrf.mxu0 }
 0x4f8   :  { %v4226_v63 = vadd.f32 %v7042_v33, %v4225_v9 }
 0x4fa   :  { %4229 = vst [vmem:[#allocation3] sm:$0x3] %v4226_v63 }
 0x4fb   :  { %4240 = dma.vmem_to_hbm [thread:$0]  %s4236_s7, 32, %s4238_s11, [#allocation4]  }
 0x4ff   :  { %v4227_v27 = vpop.f32.mrf.mxu0 }
 0x500   :  { %7067 = dma.done.wait [#allocation4], 32  }
 0x501   :  { %7068 = vsyncadd [#allocation4], 4294967264 }
 0x502   :  { %4245 = vsyncpa [#allocation4], 1 }

</bundles_post_ra>
